<compile_context>
chip_gen: v7x
topology: tpu7x:2x2x1
jax: 0.10.0
libtpu: 0.0.40
codegen_flags: <defaults>
</compile_context>

<pallas_src>
import numpy as np
import jax
import jax.numpy as jnp
from jax import lax
from jax.experimental import pallas as pl
from jax.experimental.pallas import tpu as pltpu

PRIOR_STD = 1.0  # torch code passes prior_var=1.0 as the *scale* of Normal(0, prior_var)
_LOG_SQRT_2PI = 0.5 * float(np.log(2.0 * np.pi))


def _softplus(x):
    # numerically stable log(1 + exp(x))
    return jnp.maximum(x, 0.0) + jnp.log(1.0 + jnp.exp(-jnp.abs(x)))


def blinear_kernel(x_ref, wm_ref, ws_ref, bm_ref, bs_ref, ew_ref, eb_ref,
                   y_ref, lp_ref, lq_ref, acc_ref):
    k_id = pl.program_id(2)

    @pl.when(k_id == 0)
    def _():
        acc_ref[...] = jnp.zeros_like(acc_ref)

    wm = wm_ref[...]                      # (tn, tk)
    ws = ws_ref[...]
    ew = ew_ref[...]
    sig_w = _softplus(ws)
    w = wm + sig_w * ew                   # sampled weight tile

    # y += x @ w.T : contract the shared in_features (last) dim of both operands
    # directly on the MXU -- no materialized transpose of the sampled tile.
    acc_ref[...] += lax.dot_general(
        x_ref[...], w,
        dimension_numbers=(((1,), (1,)), ((), ())),
        preferred_element_type=jnp.float32)

    # bias tile (depends only on the out-tile index j)
    bm = bm_ref[...]                      # (1, tn)
    bs = bs_ref[...]
    eb = eb_ref[...]
    sig_b = _softplus(bs)
    b = bm + sig_b * eb

    # Per-(out_tile, in_tile) partial log-prob sums.  The -count*log(sqrt(2*pi))
    # (and -count*log(prior_std)) constants are hoisted to the wrapper; the
    # posterior term uses (w - w_mean)/sigma == eps, so no per-element divide.
    inv_pvar = jnp.float32(1.0 / (PRIOR_STD * PRIOR_STD))
    lp = -0.5 * inv_pvar * jnp.sum(w * w)
    lq = -0.5 * jnp.sum(ew * ew) - jnp.sum(jnp.log(sig_w))

    # Fold the bias contribution into the k == 0 partial so it is counted once per j.
    lp_b = -0.5 * inv_pvar * jnp.sum(b * b)
    lq_b = -0.5 * jnp.sum(eb * eb) - jnp.sum(jnp.log(sig_b))
    is_k0 = k_id == 0
    lp = lp + jnp.where(is_k0, lp_b, 0.0)
    lq = lq + jnp.where(is_k0, lq_b, 0.0)

    # Partials depend only on (j, k): rewritten with identical values for every batch
    # tile, so writes are idempotent and safe under "parallel" batch/out axes.
    lp_ref[...] = jnp.full(lp_ref.shape, lp, jnp.float32)
    lq_ref[...] = jnp.full(lq_ref.shape, lq, jnp.float32)

    @pl.when(k_id == pl.num_programs(2) - 1)
    def _():
        y_ref[...] = (acc_ref[...] + b).astype(y_ref.dtype)


def _pick_tile(dim, candidates):
    for c in candidates:
        if dim >= c and dim % c == 0:
            return c
    return dim  # full-extent block is always a legal BlockSpec


def blinear_forward(x, w_mean, w_std, b_mean, b_std, eps_w, eps_b):
    n, in_f = x.shape
    out_f = w_mean.shape[0]

    bm2 = b_mean.reshape(1, out_f)
    bs2 = b_std.reshape(1, out_f)
    eb2 = eps_b.reshape(1, out_f)

    tm = _pick_tile(n, (128, 64, 32, 16, 8))
    tn = _pick_tile(out_f, (256, 128))      # lane-dense, MXU-friendly output tiles
    tk = _pick_tile(in_f, (512, 256, 128))
    nb, nj, nk = n // tm, out_f // tn, in_f // tk

    weight_spec = pl.BlockSpec((tn, tk), lambda i, j, k: (j, k))
    bias_spec = pl.BlockSpec((1, tn), lambda i, j, k: (0, j))
    part_spec = pl.BlockSpec((1, 1, 8, 128), lambda i, j, k: (j, k, 0, 0))

    grid_spec = pltpu.PrefetchScalarGridSpec(
        num_scalar_prefetch=0,
        grid=(nb, nj, nk),
        in_specs=[
            pl.BlockSpec((tm, tk), lambda i, j, k: (i, k)),   # x
            weight_spec,                                      # w_mean
            weight_spec,                                      # w_std
            bias_spec,                                        # b_mean
            bias_spec,                                        # b_std
            weight_spec,                                      # eps_w
            bias_spec,                                        # eps_b
        ],
        out_specs=(
            pl.BlockSpec((tm, tn), lambda i, j, k: (i, j)),   # y
            part_spec,                                        # log-prior partials
            part_spec,                                        # log-posterior partials
        ),
        scratch_shapes=[pltpu.VMEM((tm, tn), jnp.float32)],
    )

    y, lp_part, lq_part = pl.pallas_call(
        blinear_kernel,
        grid_spec=grid_spec,
        out_shape=(
            jax.ShapeDtypeStruct((n, out_f), jnp.float32),
            jax.ShapeDtypeStruct((nj, nk, 8, 128), jnp.float32),
            jax.ShapeDtypeStruct((nj, nk, 8, 128), jnp.float32),
        ),
        compiler_params=pltpu.CompilerParams(
            dimension_semantics=("parallel", "parallel", "arbitrary"),
            vmem_limit_bytes=32 * 1024 * 1024,
        ),
    )(x, w_mean, w_std, bm2, bs2, eps_w, eb2)

    # Hoisted normalization constants + tiny final reduction over the per-tile partials.
    count = out_f * in_f + out_f
    log_prior = jnp.sum(lp_part[:, :, 0, 0]) - count * (_LOG_SQRT_2PI + float(np.log(PRIOR_STD)))
    log_post = jnp.sum(lq_part[:, :, 0, 0]) - count * _LOG_SQRT_2PI
    return y, log_prior, log_post


# ----------------------------- reference (numpy, f64) -----------------------------

def _softplus_np(x):
    return np.maximum(x, 0.0) + np.log1p(np.exp(-np.abs(x)))


def blinear_reference(x, w_mean, w_std, b_mean, b_std, eps_w, eps_b, prior_std=PRIOR_STD):
    x, w_mean, w_std, b_mean, b_std, eps_w, eps_b = (
        np.asarray(a, dtype=np.float64)
        for a in (x, w_mean, w_std, b_mean, b_std, eps_w, eps_b))
    sig_w = _softplus_np(w_std)
    sig_b = _softplus_np(b_std)
    w = w_mean + sig_w * eps_w
    b = b_mean + sig_b * eps_b
    lsq2pi = 0.5 * np.log(2.0 * np.pi)

    def logprob(v, mu, sigma):
        z = (v - mu) / sigma
        return -0.5 * z * z - np.log(sigma) - lsq2pi

    lp = logprob(w, 0.0, prior_std).sum() + logprob(b, 0.0, prior_std).sum()
    lq = logprob(w, w_mean, sig_w).sum() + logprob(b, b_mean, sig_b).sum()
    y = x @ w.T + b
    return y, lp, lq


if __name__ == "__main__":
    # Modest shapes that still exercise the full (batch, out, in) tiling grid:
    # tm=128, tn=256, tk=512  ->  grid = (2, 2, 2).
    batch, in_features, out_features = 256, 1024, 512

    key = jax.random.PRNGKey(0)
    kx, kwm, kws, kbm, kbs, kew, keb = jax.random.split(key, 7)

    x = jax.random.normal(kx, (batch, in_features), dtype=jnp.float32)
    # PyTorch __init__ uses zeros; use small non-trivial values so the softplus /
    # sampling / log-prob paths are exercised.
    w_mean = 0.1 * jax.random.normal(kwm, (out_features, in_features), dtype=jnp.float32)
    w_std = 0.1 * jax.random.normal(kws, (out_features, in_features), dtype=jnp.float32)
    b_mean = 0.1 * jax.random.normal(kbm, (out_features,), dtype=jnp.float32)
    b_std = 0.1 * jax.random.normal(kbs, (out_features,), dtype=jnp.float32)

    # standard-normal epsilon draws (torch's Normal(0,1).sample), done in glue JAX
    eps_w = jax.random.normal(kew, (out_features, in_features), dtype=jnp.float32)
    eps_b = jax.random.normal(keb, (out_features,), dtype=jnp.float32)

    fwd = jax.jit(blinear_forward)
    y, log_prior, log_post = fwd(x, w_mean, w_std, b_mean, b_std, eps_w, eps_b)
    jax.block_until_ready((y, log_prior, log_post))

    y_ref, lp_ref, lq_ref = blinear_reference(
        x, w_mean, w_std, b_mean, b_std, eps_w, eps_b)

    np.testing.assert_allclose(np.asarray(y, np.float64), y_ref, rtol=1e-3, atol=1e-3)
    np.testing.assert_allclose(float(log_prior), lp_ref, rtol=2e-4)
    np.testing.assert_allclose(float(log_post), lq_ref, rtol=2e-4)

    print("KERNEL_OK")
</pallas_src>

<mosaic_0001>
module attributes {stable_mosaic.version = 11 : i64} {
  func.func @blinear_kernel(%arg0: i32, %arg1: i32, %arg2: i32, %arg3: memref<128x512xf32, #tpu.memory_space<vmem>>, %arg4: memref<256x512xf32, #tpu.memory_space<vmem>>, %arg5: memref<256x512xf32, #tpu.memory_space<vmem>>, %arg6: memref<1x256xf32, #tpu.memory_space<vmem>>, %arg7: memref<1x256xf32, #tpu.memory_space<vmem>>, %arg8: memref<256x512xf32, #tpu.memory_space<vmem>>, %arg9: memref<1x256xf32, #tpu.memory_space<vmem>>, %arg10: memref<128x256xf32, #tpu.memory_space<vmem>>, %arg11: memref<1x1x8x128xf32, #tpu.memory_space<vmem>>, %arg12: memref<1x1x8x128xf32, #tpu.memory_space<vmem>>, %arg13: memref<128x256xf32, #tpu.memory_space<vmem>>) attributes {dimension_semantics = [#tpu.dimension_semantics<parallel>, #tpu.dimension_semantics<parallel>, #tpu.dimension_semantics<arbitrary>], iteration_bounds = array<i64: 2, 2, 2>, scalar_prefetch = 0 : i64, scratch_operands = 1 : i64, tpu.core_type = #tpu.core_type<tc>, window_params = [{transform_indices = @transform_0, window_bounds = array<i64: 128, 512>}, {transform_indices = @transform_1, window_bounds = array<i64: 256, 512>}, {transform_indices = @transform_2, window_bounds = array<i64: 256, 512>}, {transform_indices = @transform_3, window_bounds = array<i64: 1, 256>}, {transform_indices = @transform_4, window_bounds = array<i64: 1, 256>}, {transform_indices = @transform_5, window_bounds = array<i64: 256, 512>}, {transform_indices = @transform_6, window_bounds = array<i64: 1, 256>}, {transform_indices = @transform_7, window_bounds = array<i64: 128, 256>}, {transform_indices = @transform_8, window_bounds = array<i64: 1, 1, 8, 128>}, {transform_indices = @transform_9, window_bounds = array<i64: 1, 1, 8, 128>}]} {
    %c0_i32 = arith.constant 0 : i32
    %0 = arith.cmpi eq, %arg2, %c0_i32 : i32
    %1 = arith.extui %0 : i1 to i32
    %c0_i32_0 = arith.constant 0 : i32
    %2 = arith.cmpi ne, %1, %c0_i32_0 : i32
    scf.if %2 {
      %cst_48 = arith.constant 0.000000e+00 : f32
      %88 = vector.broadcast %cst_48 : f32 to vector<128x256xf32>
      %c0_49 = arith.constant 0 : index
      %c0_50 = arith.constant 0 : index
      %89 = vector.load %arg13[%c0_49, %c0_50] : memref<128x256xf32, #tpu.memory_space<vmem>>, vector<128x256xf32>
      tpu.vector_store %arg13[%c0_49, %c0_50], %88 {strides = array<i32>} : memref<128x256xf32, #tpu.memory_space<vmem>>, vector<128x256xf32>,
    } else {
    }
    %c0 = arith.constant 0 : index
    %c0_1 = arith.constant 0 : index
    %3 = vector.load %arg4[%c0, %c0_1] : memref<256x512xf32, #tpu.memory_space<vmem>>, vector<256x512xf32>
    %c0_2 = arith.constant 0 : index
    %c0_3 = arith.constant 0 : index
    %4 = vector.load %arg5[%c0_2, %c0_3] : memref<256x512xf32, #tpu.memory_space<vmem>>, vector<256x512xf32>
    %c0_4 = arith.constant 0 : index
    %c0_5 = arith.constant 0 : index
    %5 = vector.load %arg8[%c0_4, %c0_5] : memref<256x512xf32, #tpu.memory_space<vmem>>, vector<256x512xf32>
    %cst = arith.constant 0.000000e+00 : f32
    %6 = vector.broadcast %cst : f32 to vector<256x512xf32>
    %7 = arith.maximumf %4, %6 : vector<256x512xf32>
    %8 = math.absf %4 : vector<256x512xf32>
    %cst_6 = arith.constant 0.000000e+00 : f32
    %9 = vector.broadcast %cst_6 : f32 to vector<256x512xf32>
    %10 = arith.subf %9, %8 : vector<256x512xf32>
    %11 = math.exp %10 : vector<256x512xf32>
    %cst_7 = arith.constant 1.000000e+00 : f32
    %12 = vector.broadcast %cst_7 : f32 to vector<256x512xf32>
    %13 = arith.addf %12, %11 : vector<256x512xf32>
    %14 = math.log %13 : vector<256x512xf32>
    %15 = arith.addf %7, %14 : vector<256x512xf32>
    %16 = arith.mulf %15, %5 : vector<256x512xf32>
    %17 = arith.addf %3, %16 : vector<256x512xf32>
    %c0_8 = arith.constant 0 : index
    %c0_9 = arith.constant 0 : index
    %18 = vector.load %arg13[%c0_8, %c0_9] : memref<128x256xf32, #tpu.memory_space<vmem>>, vector<128x256xf32>
    %c0_10 = arith.constant 0 : index
    %c0_11 = arith.constant 0 : index
    %19 = vector.load %arg3[%c0_10, %c0_11] : memref<128x512xf32, #tpu.memory_space<vmem>>, vector<128x512xf32>
    %cst_12 = arith.constant dense<0.000000e+00> : vector<128x256xf32>
    %20 = tpu.matmul %19, %17, %cst_12 {dimension_numbers = #tpu.dot_dimension_numbers<[1], [1], [0], [0], [0, 0, 1, 0], [], []>} : vector<128x512xf32>, vector<256x512xf32>, vector<128x256xf32> -> vector<128x256xf32>
    %21 = arith.addf %18, %20 : vector<128x256xf32>
    %c0_13 = arith.constant 0 : index
    %c0_14 = arith.constant 0 : index
    %22 = vector.load %arg13[%c0_13, %c0_14] : memref<128x256xf32, #tpu.memory_space<vmem>>, vector<128x256xf32>
    tpu.vector_store %arg13[%c0_13, %c0_14], %21 {strides = array<i32>} : memref<128x256xf32, #tpu.memory_space<vmem>>, vector<128x256xf32>,
    %c0_15 = arith.constant 0 : index
    %c0_16 = arith.constant 0 : index
    %23 = vector.load %arg6[%c0_15, %c0_16] : memref<1x256xf32, #tpu.memory_space<vmem>>, vector<1x256xf32>
    %c0_17 = arith.constant 0 : index
    %c0_18 = arith.constant 0 : index
    %24 = vector.load %arg7[%c0_17, %c0_18] : memref<1x256xf32, #tpu.memory_space<vmem>>, vector<1x256xf32>
    %c0_19 = arith.constant 0 : index
    %c0_20 = arith.constant 0 : index
    %25 = vector.load %arg9[%c0_19, %c0_20] : memref<1x256xf32, #tpu.memory_space<vmem>>, vector<1x256xf32>
    %cst_21 = arith.constant 0.000000e+00 : f32
    %26 = vector.broadcast %cst_21 : f32 to vector<1x256xf32>
    %27 = arith.maximumf %24, %26 : vector<1x256xf32>
    %28 = math.absf %24 : vector<1x256xf32>
    %cst_22 = arith.constant 0.000000e+00 : f32
    %29 = vector.broadcast %cst_22 : f32 to vector<1x256xf32>
    %30 = arith.subf %29, %28 : vector<1x256xf32>
    %31 = math.exp %30 : vector<1x256xf32>
    %cst_23 = arith.constant 1.000000e+00 : f32
    %32 = vector.broadcast %cst_23 : f32 to vector<1x256xf32>
    %33 = arith.addf %32, %31 : vector<1x256xf32>
    %34 = math.log %33 : vector<1x256xf32>
    %35 = arith.addf %27, %34 : vector<1x256xf32>
    %36 = arith.mulf %35, %25 : vector<1x256xf32>
    %37 = arith.addf %23, %36 : vector<1x256xf32>
    %cst_24 = arith.constant -5.000000e-01 : f32
    %cst_25 = arith.constant 1.000000e+00 : f32
    %38 = arith.mulf %cst_24, %cst_25 : f32
    %39 = arith.mulf %17, %17 : vector<256x512xf32>
    %40 = vector.shape_cast %39 : vector<256x512xf32> to vector<1x256x512xf32>
    %cst_26 = arith.constant dense<0.000000e+00> : vector<1xf32>
    %41 = vector.multi_reduction <add>, %40, %cst_26 [1, 2] : vector<1x256x512xf32> to vector<1xf32>
    %42 = vector.shape_cast %41 : vector<1xf32> to vector<1x1x1xf32>
    %43 = vector.extract %42[0, 0, 0] : f32 from vector<1x1x1xf32>
    %44 = arith.mulf %38, %43 : f32
    %45 = arith.mulf %5, %5 : vector<256x512xf32>
    %46 = vector.shape_cast %45 : vector<256x512xf32> to vector<1x256x512xf32>
    %cst_27 = arith.constant dense<0.000000e+00> : vector<1xf32>
    %47 = vector.multi_reduction <add>, %46, %cst_27 [1, 2] : vector<1x256x512xf32> to vector<1xf32>
    %48 = vector.shape_cast %47 : vector<1xf32> to vector<1x1x1xf32>
    %49 = vector.extract %48[0, 0, 0] : f32 from vector<1x1x1xf32>
    %cst_28 = arith.constant -5.000000e-01 : f32
    %50 = arith.mulf %cst_28, %49 : f32
    %51 = math.log %15 : vector<256x512xf32>
    %52 = vector.shape_cast %51 : vector<256x512xf32> to vector<1x256x512xf32>
    %cst_29 = arith.constant dense<0.000000e+00> : vector<1xf32>
    %53 = vector.multi_reduction <add>, %52, %cst_29 [1, 2] : vector<1x256x512xf32> to vector<1xf32>
    %54 = vector.shape_cast %53 : vector<1xf32> to vector<1x1x1xf32>
    %55 = vector.extract %54[0, 0, 0] : f32 from vector<1x1x1xf32>
    %56 = arith.subf %50, %55 : f32
    %cst_30 = arith.constant -5.000000e-01 : f32
    %cst_31 = arith.constant 1.000000e+00 : f32
    %57 = arith.mulf %cst_30, %cst_31 : f32
    %58 = arith.mulf %37, %37 : vector<1x256xf32>
    %59 = vector.shape_cast %58 : vector<1x256xf32> to vector<1x1x256xf32>
    %cst_32 = arith.constant dense<0.000000e+00> : vector<1xf32>
    %60 = vector.multi_reduction <add>, %59, %cst_32 [1, 2] : vector<1x1x256xf32> to vector<1xf32>
    %61 = vector.shape_cast %60 : vector<1xf32> to vector<1x1x1xf32>
    %62 = vector.extract %61[0, 0, 0] : f32 from vector<1x1x1xf32>
    %63 = arith.mulf %57, %62 : f32
    %64 = arith.mulf %25, %25 : vector<1x256xf32>
    %65 = vector.shape_cast %64 : vector<1x256xf32> to vector<1x1x256xf32>
    %cst_33 = arith.constant dense<0.000000e+00> : vector<1xf32>
    %66 = vector.multi_reduction <add>, %65, %cst_33 [1, 2] : vector<1x1x256xf32> to vector<1xf32>
    %67 = vector.shape_cast %66 : vector<1xf32> to vector<1x1x1xf32>
    %68 = vector.extract %67[0, 0, 0] : f32 from vector<1x1x1xf32>
    %cst_34 = arith.constant -5.000000e-01 : f32
    %69 = arith.mulf %cst_34, %68 : f32
    %70 = math.log %35 : vector<1x256xf32>
    %71 = vector.shape_cast %70 : vector<1x256xf32> to vector<1x1x256xf32>
    %cst_35 = arith.constant dense<0.000000e+00> : vector<1xf32>
    %72 = vector.multi_reduction <add>, %71, %cst_35 [1, 2] : vector<1x1x256xf32> to vector<1xf32>
    %73 = vector.shape_cast %72 : vector<1xf32> to vector<1x1x1xf32>
    %74 = vector.extract %73[0, 0, 0] : f32 from vector<1x1x1xf32>
    %75 = arith.subf %69, %74 : f32
    %c0_i32_36 = arith.constant 0 : i32
    %76 = arith.cmpi eq, %arg2, %c0_i32_36 : i32
    %cst_37 = arith.constant 0.000000e+00 : f32
    %77 = arith.select %76, %63, %cst_37 : f32
    %78 = arith.addf %44, %77 : f32
    %cst_38 = arith.constant 0.000000e+00 : f32
    %79 = arith.select %76, %75, %cst_38 : f32
    %80 = arith.addf %56, %79 : f32
    %81 = vector.broadcast %78 : f32 to vector<1x1x8x128xf32>
    %c0_39 = arith.constant 0 : index
    %c0_40 = arith.constant 0 : index
    %c0_41 = arith.constant 0 : index
    %c0_42 = arith.constant 0 : index
    %82 = vector.load %arg11[%c0_39, %c0_40, %c0_41, %c0_42] : memref<1x1x8x128xf32, #tpu.memory_space<vmem>>, vector<1x1x8x128xf32>
    tpu.vector_store %arg11[%c0_39, %c0_40, %c0_41, %c0_42], %81 {strides = array<i32>} : memref<1x1x8x128xf32, #tpu.memory_space<vmem>>, vector<1x1x8x128xf32>,
    %83 = vector.broadcast %80 : f32 to vector<1x1x8x128xf32>
    %c0_43 = arith.constant 0 : index
    %c0_44 = arith.constant 0 : index
    %c0_45 = arith.constant 0 : index
    %c0_46 = arith.constant 0 : index
    %84 = vector.load %arg12[%c0_43, %c0_44, %c0_45, %c0_46] : memref<1x1x8x128xf32, #tpu.memory_space<vmem>>, vector<1x1x8x128xf32>
    tpu.vector_store %arg12[%c0_43, %c0_44, %c0_45, %c0_46], %83 {strides = array<i32>} : memref<1x1x8x128xf32, #tpu.memory_space<vmem>>, vector<1x1x8x128xf32>,
    %c1_i32 = arith.constant 1 : i32
    %85 = arith.cmpi eq, %arg2, %c1_i32 : i32
    %86 = arith.extui %85 : i1 to i32
    %c0_i32_47 = arith.constant 0 : i32
    %87 = arith.cmpi ne, %86, %c0_i32_47 : i32
    scf.if %87 {
      %c0_48 = arith.constant 0 : index
      %c0_49 = arith.constant 0 : index
      %88 = vector.load %arg13[%c0_48, %c0_49] : memref<128x256xf32, #tpu.memory_space<vmem>>, vector<128x256xf32>
      %89 = vector.broadcast %37 : vector<1x256xf32> to vector<128x256xf32>
      %90 = arith.addf %88, %89 : vector<128x256xf32>
      %c0_50 = arith.constant 0 : index
      %c0_51 = arith.constant 0 : index
      %91 = vector.load %arg10[%c0_50, %c0_51] : memref<128x256xf32, #tpu.memory_space<vmem>>, vector<128x256xf32>
      tpu.vector_store %arg10[%c0_50, %c0_51], %90 {strides = array<i32>} : memref<128x256xf32, #tpu.memory_space<vmem>>, vector<128x256xf32>,
    } else {
    }
    return
  }
  func.func @transform_0(%arg0: i32, %arg1: i32, %arg2: i32) -> (i32, i32) {
    %c0_i32 = arith.constant 0 : i32
    return %arg0, %arg2 : i32, i32
  }
  func.func @transform_1(%arg0: i32, %arg1: i32, %arg2: i32) -> (i32, i32) {
    %c0_i32 = arith.constant 0 : i32
    return %arg1, %arg2 : i32, i32
  }
  func.func @transform_2(%arg0: i32, %arg1: i32, %arg2: i32) -> (i32, i32) {
    %c0_i32 = arith.constant 0 : i32
    return %arg1, %arg2 : i32, i32
  }
  func.func @transform_3(%arg0: i32, %arg1: i32, %arg2: i32) -> (i32, i32) {
    %c0_i32 = arith.constant 0 : i32
    %c0_i32_0 = arith.constant 0 : i32
    return %c0_i32, %arg1 : i32, i32
  }
  func.func @transform_4(%arg0: i32, %arg1: i32, %arg2: i32) -> (i32, i32) {
    %c0_i32 = arith.constant 0 : i32
    %c0_i32_0 = arith.constant 0 : i32
    return %c0_i32, %arg1 : i32, i32
  }
  func.func @transform_5(%arg0: i32, %arg1: i32, %arg2: i32) -> (i32, i32) {
    %c0_i32 = arith.constant 0 : i32
    return %arg1, %arg2 : i32, i32
  }
  func.func @transform_6(%arg0: i32, %arg1: i32, %arg2: i32) -> (i32, i32) {
    %c0_i32 = arith.constant 0 : i32
    %c0_i32_0 = arith.constant 0 : i32
    return %c0_i32, %arg1 : i32, i32
  }
  func.func @transform_7(%arg0: i32, %arg1: i32, %arg2: i32) -> (i32, i32) {
    %c0_i32 = arith.constant 0 : i32
    return %arg0, %arg1 : i32, i32
  }
  func.func @transform_8(%arg0: i32, %arg1: i32, %arg2: i32) -> (i32, i32, i32, i32) {
    %c0_i32 = arith.constant 0 : i32
    %c0_i32_0 = arith.constant 0 : i32
    %c0_i32_1 = arith.constant 0 : i32
    return %arg1, %arg2, %c0_i32, %c0_i32_0 : i32, i32, i32, i32
  }
  func.func @transform_9(%arg0: i32, %arg1: i32, %arg2: i32) -> (i32, i32, i32, i32) {
    %c0_i32 = arith.constant 0 : i32
    %c0_i32_0 = arith.constant 0 : i32
    %c0_i32_1 = arith.constant 0 : i32
    return %arg1, %arg2, %c0_i32, %c0_i32_0 : i32, i32, i32, i32
  }
}

</mosaic_0001>

<bundles_post_ra>
// kernel: blinear_forward.1
= control target key start
LH: loop header
LB: loop body
LE: loop exit
PB: predicated region body
PF: predicated region fallthrough
CT: control target
= control target key end

     0   :  { %s9317_s0 = inlined_call_operand.hbm [shape: f32[256,1024], index: 0, kind: input, shape index: {}]   ;;  %s9318_s1 = inlined_call_operand.hbm [shape: f32[512,1024], index: 1, kind: input, shape index: {}]   ;;  %s9319_s2 = inlined_call_operand.hbm [shape: f32[512,1024], index: 2, kind: input, shape index: {}]   ;;  %s9320_s3 = inlined_call_operand.hbm [shape: f32[1,512], index: 3, kind: input, shape index: {}]   ;;  %s9321_s4 = inlined_call_operand.hbm [shape: f32[1,512], index: 4, kind: input, shape index: {}]   ;;  %s9322_s5 = inlined_call_operand.hbm [shape: f32[512,1024], index: 5, kind: input, shape index: {}]   ;;  %s9323_s6 = inlined_call_operand.hbm [shape: f32[1,512], index: 6, kind: input, shape index: {}]   ;;  %s9324_s7 = inlined_call_operand.hbm [shape: f32[256,512], index: 7, kind: output, shape index: {0}]   ;;  %s9325_s8 = inlined_call_operand.vmem [shape: f32[2,2,8,128], index: 8, kind: output, shape index: {1}]   ;;  %s9326_s9 = inlined_call_operand.vmem [shape: f32[2,2,8,128], index: 9, kind: output, shape index: {2}]  }
   0x1   :  { %9398 = sst [smem:[#allocation54_spill]] %s9317_s0 }
   0x2   :  { %9399 = sst [smem:[#allocation55_spill]] %s9318_s1 }
   0x3   :  { %9400 = sst [smem:[#allocation56_spill]] %s9319_s2 }
   0x4   :  { %9401 = sst [smem:[#allocation57_spill]] %s9320_s3 }
   0x5   :  { %9402 = sst [smem:[#allocation58_spill]] %s9321_s4 }
   0x6   :  { %9403 = sst [smem:[#allocation59_spill]] %s9322_s5 }
   0x7   :  { %9404 = sst [smem:[#allocation60_spill]] %s9323_s6 }
   0x8   :  { %9405 = sst [smem:[#allocation61_spill]] %s9324_s7 }
   0x9   :  { %9406 = sst [smem:[#allocation62_spill]] %s9325_s8 }
   0xa   :  { %9407 = sst [smem:[#allocation63_spill]] %s9326_s9 }
   0xb   :  { %15 = vsyncpa [#allocation4], 0 }
   0xc   :  { %17 = vsyncpa [#allocation4 + $0x1], 0 }
   0xd   :  { %18 = vsyncpa [#allocation7], 0 }
   0xe   :  { %20 = vsyncpa [#allocation7 + $0x1], 0 }
   0xf   :  { %21 = vsyncpa [#allocation10], 0 }
  0x10   :  { %23 = vsyncpa [#allocation10 + $0x1], 0 }
  0x11   :  { %24 = vsyncpa [#allocation13], 0 }
  0x12   :  { %26 = vsyncpa [#allocation13 + $0x1], 0 }
  0x13   :  { %27 = vsyncpa [#allocation5], 0 }
  0x14   :  { %29 = vsyncpa [#allocation5 + $0x1], 0  ;;  %s6150_s30 = smov 0   ;;  %s6152_s10 = smov 0  }
  0x15   :  { %s6154_s11 = smov 0   ;;  %s6156_s12 = smov 0  }
  0x16   :  { %s6158_s13 = smov 0   ;;  %s6160_s14 = smov 0  }
  0x17   :  { %s6162_s15 = smov 0   ;;  %s6164_s16 = smov 0  }
  0x18   :  { %s6166_s17 = smov 0   ;;  %s6168_s18 = smov 0  }
  0x19   :  { %s6170_s19 = smov 0   ;;  %s6172_s20 = smov 0  }
  0x1a   :  { %s6174_s21 = smov 0   ;;  %s6176_s22 = smov 0  }
  0x1b   :  { %s6178_s23 = smov 0   ;;  %s6180_s24 = smov 0  }
  0x1c   :  { %s6182_s25 = smov 0   ;;  %s6184_s26 = smov 0  }
  0x1d   :  { %s6186_s27 = smov 0  }
  0x1e LB: > { %9408 = sst [smem:[#allocation22_spill]] %s6011_s30  ;;  %s47_s28 = sadd.s32 1, %s6071_s24  ;;  %s6083_s27 = sphi %s6186_s27, %s35_s27   ;;  %s6079_s26 = sphi %s6184_s26, %s9556_s26   ;;  %s6075_s25 = sphi %s6182_s25, %s9555_s25   ;;  %s6071_s24 = sphi %s6180_s24, %s9554_s24   ;;  %s6067_s23 = sphi %s6178_s23, %s9542_s23   ;;  %s6063_s22 = sphi %s6176_s22, %s9541_s22   ;;  %s6059_s21 = sphi %s6174_s21, %s9553_s21   ;;  %s6055_s20 = sphi %s6172_s20, %s9552_s20   ;;  %s6051_s19 = sphi %s6170_s19, %s9540_s19   ;;  %s6047_s18 = sphi %s6168_s18, %s9539_s18   ;;  %s6043_s17 = sphi %s6166_s17, %s9551_s17   ;;  %s6039_s16 = sphi %s6164_s16, %s9550_s16   ;;  %s6035_s15 = sphi %s6162_s15, %s9536_s15   ;;  %s6031_s14 = sphi %s6160_s14, %s9535_s14   ;;  %s6027_s13 = sphi %s6158_s13, %s9549_s13   ;;  %s6023_s12 = sphi %s6156_s12, %s9533_s12   ;;  %s6019_s11 = sphi %s6154_s11, %s9547_s11   ;;  %s6015_s10 = sphi %s6152_s10, %s9545_s10   ;;  %s6011_s30 = sphi %s6150_s30, %s9532_s30  }
  0x1f   : > { %9409 = sst [smem:[#allocation23_spill]] %s6015_s10  ;;  %s50_s29 = sadd.s32 1, %s6075_s25 }
  0x20   : > { %9410 = sst [smem:[#allocation24_spill]] %s6027_s13  ;;  %p48_p0 = scmp.ge.s32.totalorder %s47_s28, 2 }
  0x21   : > { %9411 = sst [smem:[#allocation25_spill]] %s6031_s14  ;;  %p9345_p1 = scmp.eq.s32.totalorder %s6083_s27, 0 }
  0x22   : > { %9412 = sst [smem:[#allocation26_spill]] %s6039_s16  ;;  %s91_s7 = sadd.s32 1, %s6043_s17 }
  0x23   : > { %9413 = sst [smem:[#allocation27_spill]] %s6043_s17  ;;  %p98_p2 = scmp.ne.s32.totalorder %s6043_s17, %s6039_s16 }
  0x24   : > { %9414 = sst [smem:[#allocation28_spill]] %s6047_s18  ;;  %s9558_s28 = smov (%p48_p0, %s47_s28), 0 }
  0x25   : > { %9415 = sst [smem:[#allocation29_spill]] %s6051_s19  ;;  %s9560_s29 = smov (!%p48_p0, %s50_s29), %s6075_s25 }
  0x26   : > { %9416 = sst [smem:[#allocation30_spill]] %s6055_s20  ;;  %p6262_p3 = por %p98_p2, %p9345_p1 }
  0x27   : > { %9417 = sst [smem:[#allocation31_spill]] %s6059_s21  ;;  %p9343_p4 = scmp.ge.s32.totalorder %s9560_s29, 2 }
  0x28   : > { %9418 = sst [smem:[#allocation32_spill]] %s6063_s22  ;;  %p9344_p6 = scmp.lt.s32.totalorder %s6083_s27, 8 }
  0x29   : > { %9419 = sst [smem:[#allocation33_spill]] %s6067_s23  ;;  %s6258_s23 = ssub.s32 %s6071_s24, %s9558_s28 }
  0x2a   : > { %9420 = sst [smem:[#allocation34_spill]] %s6075_s25  ;;  %s9342_s21 = sshll.u32 %s6071_s24, 2 }
  0x2b   : > { %9421 = sst [smem:[#allocation35_spill]] %s6079_s26  ;;  %s6283_s6 = sand.u32 1, %s6083_s27  }
  0x2c   : > { %9422 = sst [smem:[#allocation36_spill]] %s9558_s28  ;;  %s372_s4 = sand.u32 1, %s6043_s17  }
  0x2d   : > { %9423 = sst [smem:[#allocation37_spill]] %s9560_s29  ;;  %s6289_s0 = sshll.u32 %s372_s4, 10 }
  0x2e   : > { %9424 = sst [smem:[#allocation38_spill]] %s6258_s23  ;;  %s4515_s18 = sshll.u32 %s6075_s25, 8 }
  0x2f   : > { %s6273_s8 = scalar_select %p9343_p4, 0, %s9560_s29  }
  0x30   : > { %9427 = sst [smem:[#allocation40_spill]] %s6283_s6  ;;  %s381_s19 = sadd.s32 %s4515_s18, %s9342_s21 }
  0x31   : > { %9426 = sst [smem:[#allocation39_spill]] %s6273_s8  ;;  %s6278_s22 = ssub.s32 %s6075_s25, %s6273_s8 }
  0x32   : > { %s88_s28 = sor.u32 %s6278_s22, %s6258_s23  ;;  %s6294_s29 = sshll.u32 %s381_s19, 7 }
  0x33   : > { %p89_p7 = scmp.eq.s32.totalorder %s88_s28, 0  ;;  %s374_s8 = scalar_lea.vmem [#allocation6], %s6289_s0 }
  0x34   : > { %s384_s20 = sshll.u32 %s374_s8, 4  ;;  %s9429_s1 = sld [smem:[#allocation55_spill]]  ;;  %s6303_s20 = int_to_ptr.vmem [resolvable:$true] %s384_s20 }
  0x35   : > { %s6287_s2 = scalar_select %p89_p7, %s6043_s17, %s91_s7  }
  0x36   : > { %p6309_p8 = pnand %p9344_p6, %p6262_p3 }
  0x37   : > { %9428 = sst [smem:[#allocation41_spill]] %s6287_s2 }
  0x38   : > { %s9430_s4 = scalar_select %p6309_p8, 1, 0 }
  0x39   : > { %p6320_p12 = pneg %p6309_p8 }
  0x3a   : > { %s6301_s28 = scalar_lea.hbm %s9429_s1, %s6294_s29  ;;  %9431 = sst [smem:[#allocation42_spill]] %s9430_s4 }
  0x3b   : > { %s5671_s8 = scalar_lea.hbm %s6301_s28, 16384  ;;  %s5676_s23 = scalar_lea.hbm %s9429_s1, 65536 }
  0x3c   : > { %p5672_p11 = scmp.ne.s32.totalorder %s6301_s28, %s5671_s8  ;;  %p5677_p2 = scmp.lt.u32.totalorder %s6301_s28, %s9429_s1 }
  0x3d   : > { %s9432_s18 = scalar_select %p6320_p12, 1, 0 }
  0x3e   : > { %p5674_p13 = pnand %p6320_p12, %p5672_p11  ;;  %p5678_p3 = scmp.lt.u32.totalorder %s5676_s23, %s5671_s8 }
  0x3f   : > { %p5680_p4 = scmp.lt.u32.totalorder %s5671_s8, %s6301_s28 }
  0x40   : > { %p5675_p0 = pneg %p5674_p13  ;;  %p5679_p7 = por %p5678_p3, %p5677_p2 }
  0x42   : > { %p5681_p6 = por %p5680_p4, %p5679_p7 }
  0x44   : > { %p5682_p1 = pnand %p5681_p6, %p5675_p0 }
  0x46   : > { %5685 = shalt.err (!%p5682_p1)
}
  0x47   : > { %s5686_s7 = scalar_lea.vmem %s6303_s20, 16384  ;;  %s6085_s9 = smov [#allocation6]  }
  0x48   : > { %p5687_p11 = scmp.ne.s32.totalorder %s6303_s20, %s5686_s7  ;;  %s5691_s19 = sshll.u32 %s6085_s9, 4  ;;  %s5692_s19 = int_to_ptr.vmem [resolvable:$false] %s5691_s19 }
  0x49   : > { %s5693_s21 = scalar_lea.vmem %s5692_s19, 32768  ;;  %p5694_p9 = scmp.lt.s32.totalorder %s6303_s20, %s5692_s19 }
  0x4a   : > { %p5689_p13 = pnand %p5687_p11, %p6320_p12  ;;  %p5695_p10 = scmp.lt.s32.totalorder %s5693_s21, %s5686_s7 }
  0x4c   : > { %p5690_p5 = pneg %p5689_p13  ;;  %p5696_p2 = por %p5695_p10, %p5694_p9 }
  0x4e   : > { %p5697_p3 = pnand %p5696_p2, %p5690_p5 }
  0x50   : > { %5700 = shalt.err (!%p5697_p3)
}
  0x51   : > { %s9346_s8 = smov 1024   ;;  %s9348_s7 = smov 512  }
  0x52   : > { %s9350_s23 = smov 32   ;;  %s9433_s26 = scalar_lea.sflag [#allocation7], %s6283_s6 }
  0x53   : > { %4716 = dma.hbm_to_vmem [thread:$0]  (!%p6309_p8), %s6301_s28, 16384, %s6303_s20, %s9433_s26, %s9346_s8, %s9348_s7, %s9350_s23  }
  0x54   : > { %p9434_p1 = scmp.lt.s32.totalorder %s6083_s27, 9  ;;  %p9435_p4 = scmp.ge.s32.totalorder %s6083_s27, 1 }
  0x55   : > { %s6357_s19 = sadd.s32 4294967295, %s6083_s27   ;;  %s4460_s21 = sadd.s32 4294967294, %s6083_s27  }
  0x56   : > { %p6352_p5 = pnand %p9435_p4, %p9434_p1  ;;  %9438 = sst [smem:[#allocation44_spill]] %s6357_s19 }
  0x57   : > { %p9361_p6 = scmp.eq.s32.totalorder %s6357_s19, 0  ;;  %p143_p9 = scmp.eq.s32.totalorder %s6278_s22, 0 }
  0x58   : > { %s9436_s9 = scalar_select %p6352_p5, 1, 0 }
  0x59   : > { %s145_s1 = sadd.s32 1, %s6031_s14  ;;  %p9439_p10 = scmp.ne.s32.totalorder %s6039_s16, %s6035_s15 }
  0x5a   : > { %9437 = sst [smem:[#allocation43_spill]] %s9436_s9  ;;  %p152_p7 = scmp.ne.s32.totalorder %s6031_s14, %s6027_s13 }
  0x5b   : > { %p6368_p0 = por %p9439_p10, %p9361_p6  ;;  %p9443_p11 = scmp.eq.s32.totalorder %s6083_s27, 0 }
  0x5c   : > { %s6375_s28 = scalar_select %p143_p9, %s6031_s14, %s145_s1  }
  0x5d   : > { %s9440_s20 = scalar_select %p6368_p0, 1, 0 }
  0x5e   : > { %9442 = sst [smem:[#allocation46_spill]] %s6375_s28  ;;  %p6379_p13 = por %p152_p7, %p9443_p11 }
  0x5f   : > { %9441 = sst [smem:[#allocation45_spill]] %s9440_s20  ;;  %p158_p2 = scmp.ne.s32.totalorder %s6027_s13, %s6023_s12 }
  0x60   : > { %p263_p3 = scmp.ne.s32.totalorder %s6019_s11, %s6015_s10  ;;  %p264_p1 = scmp.eq.s32.totalorder %s6357_s19, 7 }
  0x61   : > { %p6390_p4 = por %p158_p2, %p9361_p6  ;;  %p269_p10 = scmp.ne.s32.totalorder %s6015_s10, %s6011_s30 }
  0x62   : > { %p6396_p9 = por %p264_p1, %p263_p3  ;;  %p270_p7 = scmp.eq.s32.totalorder %s4460_s21, 7 }
  0x63   : > { %s9445_s15 = scalar_select %p6390_p4, 1, 0 }
  0x64   : > { %s9447_s1 = scalar_select %p6396_p9, 1, 0 }
  0x65   : > { %9446 = sst [smem:[#allocation47_spill]] %s9445_s15  ;;  %s420_s8 = sand.u32 1, %s6031_s14  }
  0x66   : > { %9448 = sst [smem:[#allocation48_spill]] %s9447_s1  ;;  %p6401_p11 = por %p270_p7, %p269_p10 }
  0x67   : > { %s6405_s12 = sshll.u32 %s420_s8, 1  ;;  %s6408_s23 = sshll.u32 %s6075_s25, 5 }
  0x68   : > { %s9449_s7 = scalar_select %p6401_p11, 1, 0 }
  0x69   : > { %9451 = sst [smem:[#allocation50_spill]] %s6405_s12  ;;  %s9453_s3 = sld [smem:[#allocation57_spill]] }
  0x6a   : > { %9450 = sst [smem:[#allocation49_spill]] %s9449_s7  ;;  %s422_s21 = scalar_lea.vmem [#allocation9], %s6405_s12 }
  0x6b   : > { %9452 = sst [smem:[#allocation51_spill]] %s6408_s23  ;;  %s430_s14 = sshll.u32 %s422_s21, 4  ;;  %s6417_s14 = int_to_ptr.vmem [resolvable:$true] %s430_s14 }
  0x6c   : > { %p9454_p2 = scmp.lt.s32.totalorder %s6083_s27, 8  ;;  %s9457_s5 = sld [smem:[#allocation59_spill]] }
  0x6e   : > { %p6423_p3 = pnand %p9454_p2, %p6379_p13 }
  0x6f   : > { %s6414_s28 = scalar_lea.hbm %s9453_s3, %s6408_s23  ;;  %s5706_s10 = scalar_lea.hbm %s9453_s3, 64 }
  0x70   : > { %s9455_s8 = scalar_select %p6423_p3, 1, 0 }
  0x71   : > { %s5701_s30 = scalar_lea.hbm %s6414_s28, 32  ;;  %p6438_p10 = pneg %p6423_p3 }
  0x72   : > { %9456 = sst [smem:[#allocation52_spill]] %s9455_s8  ;;  %s6431_s2 = scalar_lea.hbm %s9457_s5, %s6294_s29 }
  0x73   : > { %p5702_p1 = scmp.ne.s32.totalorder %s6414_s28, %s5701_s30  ;;  %p5707_p2 = scmp.lt.u32.totalorder %s6414_s28, %s9453_s3 }
  0x74   : > { %s9458_s21 = scalar_select %p6438_p10, 1, 0 }
  0x75   : > { %p5704_p13 = pnand %p6438_p10, %p5702_p1  ;;  %p5708_p6 = scmp.lt.u32.totalorder %s5706_s10, %s5701_s30 }
  0x76   : > { %9459 = sst [smem:[#allocation53_spill]] %s9458_s21  ;;  %p5710_p9 = scmp.lt.u32.totalorder %s5701_s30, %s6414_s28 }
  0x77   : > { %p5705_p7 = pneg %p5704_p13  ;;  %p5709_p11 = por %p5708_p6, %p5707_p2 }
  0x79   : > { %p5711_p4 = por %p5710_p9, %p5709_p11 }
  0x7b   : > { %p5712_p0 = pnand %p5711_p4, %p5705_p7 }
  0x7d   : > { %5715 = shalt.err (!%p5712_p0)
}
  0x7e   : > { %s5716_s17 = scalar_lea.vmem %s6417_s14, 32  ;;  %s6089_s1 = smov [#allocation9]  }
  0x7f   : > { %p5717_p1 = scmp.ne.s32.totalorder %s6417_s14, %s5716_s17  ;;  %s5721_s26 = sshll.u32 %s6089_s1, 4  ;;  %s5722_s26 = int_to_ptr.vmem [resolvable:$false] %s5721_s26 }
  0x80   : > { %s5723_s25 = scalar_lea.vmem %s5722_s26, 64  ;;  %p5724_p8 = scmp.lt.s32.totalorder %s6417_s14, %s5722_s26 }
  0x81   : > { %p5719_p13 = pnand %p5717_p1, %p6438_p10  ;;  %p5725_p12 = scmp.lt.s32.totalorder %s5723_s25, %s5716_s17 }
  0x83   : > { %p5720_p5 = pneg %p5719_p13  ;;  %p5726_p6 = por %p5725_p12, %p5724_p8 }
  0x85   : > { %p5727_p2 = pnand %p5726_p6, %p5720_p5 }
  0x87   : > { %5730 = shalt.err (!%p5727_p2)
}
  0x88   : > { %s9460_s30 = scalar_lea.sflag [#allocation10], %s6283_s6  ;;  %s460_s10 = scalar_lea.vmem [#allocation12], %s6289_s0 }
  0x89   : > { %4722 = dma.hbm_to_vmem [thread:$0]  (!%p6423_p3), %s6414_s28, 32, %s6417_s14, %s9460_s30  }
  0x8a   : > { %s470_s7 = sshll.u32 %s460_s10, 4  ;;  %s9378_s17 = scalar_lea.sflag [#allocation13], %s6283_s6  ;;  %s6464_s7 = int_to_ptr.vmem [resolvable:$true] %s470_s7 }
  0x8b   : > { %s5731_s1 = scalar_lea.hbm %s6431_s2, 16384  ;;  %p9461_p12 = scmp.ne.s32.totalorder %s9432_s18, 0 }
  0x8c   : > { %p5732_p8 = scmp.ne.s32.totalorder %s6431_s2, %s5731_s1  ;;  %s5736_s3 = scalar_lea.hbm %s9457_s5, 65536 }
  0x8d   : > { %p5737_p4 = scmp.lt.u32.totalorder %s6431_s2, %s9457_s5  ;;  %p5738_p9 = scmp.lt.u32.totalorder %s5736_s3, %s5731_s1 }
  0x8e   : > { %p5734_p5 = pnand %p5732_p8, %p9461_p12  ;;  %p5740_p7 = scmp.lt.u32.totalorder %s5731_s1, %s6431_s2 }
  0x8f   : > { %p5739_p11 = por %p5738_p9, %p5737_p4 }
  0x90   : > { %p5735_p0 = pneg %p5734_p5 }
  0x91   : > { %p5741_p1 = por %p5740_p7, %p5739_p11 }
  0x93   : > { %p5742_p13 = pnand %p5741_p1, %p5735_p0 }
  0x95   : > { %5745 = shalt.err (!%p5742_p13)
}
  0x96   : > { %s5746_s14 = scalar_lea.vmem %s6464_s7, 16384  ;;  %s6090_s28 = smov [#allocation12]  }
  0x97   : > { %p5747_p6 = scmp.ne.s32.totalorder %s6464_s7, %s5746_s14  ;;  %s5751_s30 = sshll.u32 %s6090_s28, 4  ;;  %s5752_s30 = int_to_ptr.vmem [resolvable:$false] %s5751_s30 }
  0x98   : > { %s5753_s13 = scalar_lea.vmem %s5752_s30, 32768  ;;  %p5754_p5 = scmp.lt.s32.totalorder %s6464_s7, %s5752_s30 }
  0x99   : > { %p5749_p2 = pnand %p5747_p6, %p9461_p12  ;;  %p5755_p3 = scmp.lt.s32.totalorder %s5753_s13, %s5746_s14 }
  0x9b   : > { %p5750_p8 = pneg %p5749_p2  ;;  %p5756_p4 = por %p5755_p3, %p5754_p5 }
  0x9d   : > { %p5757_p9 = pnand %p5756_p4, %p5750_p8 }
  0x9f   : > { %5760 = shalt.err (!%p5757_p9)
}
  0xa0   : > { %p9462_p0 = scmp.ne.s32.totalorder %s9430_s4, 0  ;;  %s9463_s3 = smov 32  }
  0xa1   : > { %s9464_s15 = smov 512   ;;  %s9465_s10 = smov 1024  }
  0xa2   : > { %s9466_s1 = sld [smem:[#allocation35_spill]]  ;;  %s9467_s26 = sld [smem:[#allocation30_spill]] }
  0xa3   : > { %s9468_s25 = sld [smem:[#allocation37_spill]]  ;;  %s9469_s28 = sld [smem:[#allocation29_spill]] }
  0xa4   : > { %s9470_s30 = sld [smem:[#allocation28_spill]]  ;;  %s9471_s14 = sld [smem:[#allocation38_spill]] }
  0xa5   : > { %4728 = dma.hbm_to_vmem [thread:$0]  (!%p9462_p0), %s6431_s2, 16384, %s6464_s7, %s9378_s17, %s9465_s10, %s9464_s15, %s9463_s3  }
  0xa6   : > { %s253_s20 = sadd.s32 1, %s6019_s11  ;;  %p9473_p13 = scmp.eq.s32.totalorder %s6083_s27, 0 }
  0xa7   : > { %p9475_p2 = scmp.eq.s32.totalorder %s6357_s19, 0  ;;  %s9478_s19 = sshll.u32 %s6071_s24, 2 }
  0xa8   : > { %s54_s13 = sadd.s32 1, %s9466_s1  ;;  %s63_s5 = sadd.s32 1, %s9467_s26 }
  0xa9   : > { %p9472_p3 = scmp.ge.s32.totalorder %s9468_s25, 2  ;;  %p70_p11 = scmp.ne.s32.totalorder %s9467_s26, %s9469_s28 }
  0xaa   : > { %p76_p7 = scmp.ne.s32.totalorder %s9469_s28, %s9470_s30  ;;  %s346_s2 = sand.u32 1, %s9467_s26  }
  0xab   : > { %s9562_s13 = smov (!%p9472_p3, %s54_s13), %s9466_s1  ;;  %p6505_p6 = por %p9473_p13, %p70_p11 }
  0xac   : > { %p56_p1 = scmp.ge.s32.totalorder %s9562_s13, 2  ;;  %p6511_p8 = por %p9475_p2, %p76_p7 }
  0xad   : > { %s4514_s7 = sshll.u32 %s9466_s1, 7  ;;  %s4463_s17 = sshll.u32 %s346_s2, 9 }
  0xae   : > { %s9476_s9 = scalar_select %p6511_p8, 1, 0 }
  0xaf   : > { %s9564_s13 = smov (%p56_p1, %s9562_s13), 0  ;;  %s357_s8 = sadd.s32 %s4514_s7, %s9478_s19 }
  0xb0   : > { %9477 = sst [smem:[#allocation37_spill]] %s9476_s9  ;;  %s58_s25 = ssub.s32 %s9466_s1, %s9564_s13 }
  0xb1   : > { %s60_s28 = sor.u32 %s9471_s14, %s58_s25  ;;  %s250_s30 = sor.u32 %s6278_s22, %s58_s25 }
  0xb2   : > { %p61_p5 = scmp.eq.s32.totalorder %s60_s28, 0  ;;  %p251_p4 = scmp.eq.s32.totalorder %s250_s30, 0 }
  0xb3   : > { %s4467_s21 = sshll.u32 %s357_s8, 7  ;;  %s9479_s6 = sld [smem:[#allocation54_spill]] }
  0xb4   : > { %s9566_s26 = smov (!%p61_p5, %s9467_s26), %s63_s5  ;;  %s350_s1 = scalar_lea.vmem [#allocation3], %s4463_s17 }
  0xb5   : > { %s6529_s9 = scalar_select %p251_p4, %s6019_s11, %s253_s20  }
  0xb6   : > { %s360_s22 = sshll.u32 %s350_s1, 4  ;;  %p9480_p9 = scmp.lt.s32.totalorder %s6083_s27, 8  ;;  %s6536_s22 = int_to_ptr.vmem [resolvable:$true] %s360_s22 }
  0xb7   : > { %s9482_s8 = sld [smem:[#allocation56_spill]]  ;;  %s398_s12 = scalar_lea.vmem [#allocation8], %s6289_s0 }
  0xb8   : > { %p6542_p3 = pnand %p9480_p9, %p6505_p6  ;;  %s6555_s17 = scalar_lea.sflag [#allocation4], %s346_s2 }
  0xb9   : > { %s6534_s4 = scalar_lea.hbm %s9479_s6, %s4467_s21  ;;  %s6553_s21 = sshll.u32 %s398_s12, 4  ;;  %s6587_s21 = int_to_ptr.vmem [resolvable:$true] %s6553_s21 }
  0xba   : > { %s5761_s14 = scalar_lea.hbm %s6534_s4, 8192  ;;  %p5763_p7 = pneg %p6542_p3 }
  0xbb   : > { %p5762_p11 = scmp.ne.s32.totalorder %s6534_s4, %s5761_s14  ;;  %s5766_s25 = scalar_lea.hbm %s9479_s6, 32768 }
  0xbc   : > { %p5767_p6 = scmp.lt.u32.totalorder %s6534_s4, %s9479_s6  ;;  %p5768_p2 = scmp.lt.u32.totalorder %s5766_s25, %s5761_s14 }
  0xbd   : > { %s6550_s23 = scalar_lea.hbm %s9482_s8, %s6294_s29  ;;  %p5764_p1 = pnand %p5763_p7, %p5762_p11 }
  0xbe   : > { %p5769_p5 = por %p5768_p2, %p5767_p6  ;;  %p5770_p4 = scmp.lt.u32.totalorder %s5761_s14, %s6534_s4 }
  0xbf   : > { %p5765_p13 = pneg %p5764_p1 }
  0xc0   : > { %p5771_p9 = por %p5770_p4, %p5769_p5 }
  0xc2   : > { %p5772_p8 = pnand %p5771_p9, %p5765_p13 }
  0xc4   : > { %5775 = shalt.err (!%p5772_p8)
}
  0xc5   : > { %s5776_s0 = scalar_lea.vmem %s6536_s22, 8192  ;;  %s6091_s2 = smov [#allocation3]  }
  0xc6   : > { %p5777_p11 = scmp.ne.s32.totalorder %s6536_s22, %s5776_s0  ;;  %s5781_s30 = sshll.u32 %s6091_s2, 4  ;;  %s5782_s30 = int_to_ptr.vmem [resolvable:$false] %s5781_s30 }
  0xc7   : > { %s5783_s1 = scalar_lea.vmem %s5782_s30, 16384  ;;  %p5784_p0 = scmp.lt.s32.totalorder %s6536_s22, %s5782_s30 }
  0xc8   : > { %p5779_p1 = pnand %p5777_p11, %p5763_p7  ;;  %p5785_p6 = scmp.lt.s32.totalorder %s5783_s1, %s5776_s0 }
  0xca   : > { %p5780_p10 = pneg %p5779_p1  ;;  %p5786_p2 = por %p5785_p6, %p5784_p0 }
  0xcc   : > { %p5787_p5 = pnand %p5786_p2, %p5780_p10 }
  0xce   : > { %5790 = shalt.err (!%p5787_p5)
}
  0xcf   : > { %4713 = dma.hbm_to_vmem [thread:$0]  (!%p6542_p3), %s6534_s4, 8192, %s6536_s22, %s6555_s17, %s9465_s10, %s9464_s15, %s9463_s3  }
  0xd0   : > { %s5791_s19 = scalar_lea.hbm %s6550_s23, 16384  ;;  %s5796_s12 = scalar_lea.hbm %s9482_s8, 65536 }
  0xd1   : > { %p5792_p10 = scmp.ne.s32.totalorder %s6550_s23, %s5791_s19  ;;  %p5797_p7 = scmp.lt.u32.totalorder %s6550_s23, %s9482_s8 }
  0xd2   : > { %p5798_p13 = scmp.lt.u32.totalorder %s5796_s12, %s5791_s19  ;;  %p5800_p9 = scmp.lt.u32.totalorder %s5791_s19, %s6550_s23 }
  0xd3   : > { %p5794_p0 = pnand %p5792_p10, %p9461_p12 }
  0xd4   : > { %p5799_p4 = por %p5798_p13, %p5797_p7 }
  0xd5   : > { %p5795_p8 = pneg %p5794_p0 }
  0xd6   : > { %p5801_p11 = por %p5800_p9, %p5799_p4 }
  0xd8   : > { %p5802_p3 = pnand %p5801_p11, %p5795_p8 }
  0xda   : > { %5805 = shalt.err (!%p5802_p3)
}
  0xdb   : > { %s5806_s4 = scalar_lea.vmem %s6587_s21, 16384  ;;  %s6092_s22 = smov [#allocation8]  }
  0xdc   : > { %p5807_p1 = scmp.ne.s32.totalorder %s6587_s21, %s5806_s4  ;;  %s5811_s17 = sshll.u32 %s6092_s22, 4  ;;  %s5812_s17 = int_to_ptr.vmem [resolvable:$false] %s5811_s17 }
  0xdd   : > { %s5813_s7 = scalar_lea.vmem %s5812_s17, 32768  ;;  %p5814_p5 = scmp.lt.s32.totalorder %s6587_s21, %s5812_s17 }
  0xde   : > { %p5809_p6 = pnand %p5807_p1, %p9461_p12  ;;  %p5815_p10 = scmp.lt.s32.totalorder %s5813_s7, %s5806_s4 }
  0xe0   : > { %p5810_p2 = pneg %p5809_p6  ;;  %p5816_p0 = por %p5815_p10, %p5814_p5 }
  0xe2   : > { %p5817_p7 = pnand %p5816_p0, %p5810_p2 }
  0xe4   : > { %5820 = shalt.err (!%p5817_p7)
}
  0xe5   : > { %s9483_s25 = sld [smem:[#allocation42_spill]]  ;;  %s9485_s28 = sld [smem:[#allocation40_spill]] }
  0xe6   : > { %s9487_s18 = sld [smem:[#allocation51_spill]]  ;;  %s9488_s0 = sld [smem:[#allocation50_spill]] }
  0xe7   : > { %s9489_s2 = sld [smem:[#allocation53_spill]]  ;;  %s9490_s19 = sld [smem:[#allocation58_spill]] }
  0xeb   : > { %p9484_p8 = scmp.ne.s32.totalorder %s9483_s25, 0  ;;  %s9486_s29 = scalar_lea.sflag [#allocation7], %s9485_s28 }
  0xec   : > { %s441_s12 = scalar_lea.vmem [#allocation11], %s9488_s0 }
  0xed   : > { %4719 = dma.hbm_to_vmem [thread:$0]  (!%p9484_p8), %s6550_s23, 16384, %s6587_s21, %s9486_s29, %s9465_s10, %s9464_s15, %s9463_s3  }
  0xee   : > { %s9491_s5 = smov %s9490_s19  ;;  %s6619_s20 = scalar_lea.hbm %s9490_s19, %s9487_s18 }
  0xef   : > { %s449_s14 = sshll.u32 %s441_s12, 4  ;;  %s5821_s16 = scalar_lea.hbm %s6619_s20, 32  ;;  %s450_s14 = int_to_ptr.vmem [resolvable:$true] %s449_s14 }
  0xf0   : > { %p5822_p12 = scmp.ne.s32.totalorder %s6619_s20, %s5821_s16  ;;  %p9492_p13 = scmp.ne.s32.totalorder %s9489_s2, 0 }
  0xf1   : > { %s5826_s3 = scalar_lea.hbm %s9491_s5, 64  ;;  %p5827_p11 = scmp.lt.u32.totalorder %s6619_s20, %s9491_s5 }
  0xf2   : > { %p5824_p4 = pnand %p5822_p12, %p9492_p13  ;;  %p5828_p3 = scmp.lt.u32.totalorder %s5826_s3, %s5821_s16 }
  0xf3   : > { %p5830_p6 = scmp.lt.u32.totalorder %s5821_s16, %s6619_s20 }
  0xf4   : > { %p5825_p9 = pneg %p5824_p4  ;;  %p5829_p1 = por %p5828_p3, %p5827_p11 }
  0xf6   : > { %p5831_p2 = por %p5830_p6, %p5829_p1 }
  0xf8   : > { %p5832_p5 = pnand %p5831_p2, %p5825_p9 }
  0xfa   : > { %5835 = shalt.err (!%p5832_p5)
}
  0xfb   : > { %s5836_s23 = scalar_lea.vmem %s450_s14, 32  ;;  %s6093_s21 = smov [#allocation11]  }
  0xfc   : > { %p5837_p10 = scmp.ne.s32.totalorder %s450_s14, %s5836_s23  ;;  %s5841_s17 = sshll.u32 %s6093_s21, 4  ;;  %s5842_s17 = int_to_ptr.vmem [resolvable:$false] %s5841_s17 }
  0xfd   : > { %s5843_s7 = scalar_lea.vmem %s5842_s17, 64  ;;  %p5844_p8 = scmp.lt.s32.totalorder %s450_s14, %s5842_s17 }
  0xfe   : > { %p5839_p0 = pnand %p5837_p10, %p9492_p13  ;;  %p5845_p12 = scmp.lt.s32.totalorder %s5843_s7, %s5836_s23 }
 0x100   : > { %p5840_p7 = pneg %p5839_p0  ;;  %p5846_p4 = por %p5845_p12, %p5844_p8 }
 0x102   : > { %p5847_p3 = pnand %p5846_p4, %p5840_p7 }
 0x104   : > { %5850 = shalt.err (!%p5847_p3)
}
 0x105   : > { %s9493_s25 = sld [smem:[#allocation52_spill]]  ;;  %s9495_s29 = scalar_lea.sflag [#allocation10], %s9485_s28 }
 0x106   : > { %s9496_s19 = sld [smem:[#allocation60_spill]]  ;;  %s484_s16 = scalar_lea.vmem [#allocation14], %s9488_s0 }
 0x107   : > { %s492_s22 = sshll.u32 %s484_s16, 4  ;;  %s493_s22 = int_to_ptr.vmem [resolvable:$true] %s492_s22 }
 0x10b   : > { %p9494_p11 = scmp.ne.s32.totalorder %s9493_s25, 0 }
 0x10c   : > { %s9497_s4 = smov %s9496_s19  ;;  %s6645_s12 = scalar_lea.hbm %s9496_s19, %s9487_s18 }
 0x10d   : > { %4725 = dma.hbm_to_vmem [thread:$0]  (!%p9494_p11), %s6619_s20, 32, %s450_s14, %s9495_s29  }
 0x10e   : > { %s5851_s3 = scalar_lea.hbm %s6645_s12, 32  ;;  %s5856_s20 = scalar_lea.hbm %s9497_s4, 64 }
 0x10f   : > { %p5852_p9 = scmp.ne.s32.totalorder %s6645_s12, %s5851_s3  ;;  %p5857_p2 = scmp.lt.u32.totalorder %s6645_s12, %s9497_s4 }
 0x110   : > { %p5858_p5 = scmp.lt.u32.totalorder %s5856_s20, %s5851_s3  ;;  %p5860_p0 = scmp.lt.u32.totalorder %s5851_s3, %s6645_s12 }
 0x111   : > { %p5854_p1 = pnand %p5852_p9, %p9492_p13 }
 0x112   : > { %p5859_p10 = por %p5858_p5, %p5857_p2 }
 0x113   : > { %p5855_p6 = pneg %p5854_p1 }
 0x114   : > { %p5861_p7 = por %p5860_p0, %p5859_p10 }
 0x116   : > { %p5862_p8 = pnand %p5861_p7, %p5855_p6 }
 0x118   : > { %5865 = shalt.err (!%p5862_p8)
}
 0x119   : > { %s5866_s18 = scalar_lea.vmem %s493_s22, 32  ;;  %s6094_s0 = smov [#allocation14]  }
 0x11a   : > { %p5867_p12 = scmp.ne.s32.totalorder %s493_s22, %s5866_s18  ;;  %s5871_s21 = sshll.u32 %s6094_s0, 4  ;;  %s5872_s21 = int_to_ptr.vmem [resolvable:$false] %s5871_s21 }
 0x11b   : > { %s5873_s17 = scalar_lea.vmem %s5872_s21, 64  ;;  %p5874_p9 = scmp.lt.s32.totalorder %s493_s22, %s5872_s21 }
 0x11c   : > { %p5869_p4 = pnand %p5867_p12, %p9492_p13  ;;  %p5875_p1 = scmp.lt.s32.totalorder %s5873_s17, %s5866_s18 }
 0x11e   : > { %p5870_p3 = pneg %p5869_p4  ;;  %p5876_p11 = por %p5875_p1, %p5874_p9 }
 0x120   : > { %p5877_p2 = pnand %p5876_p11, %p5870_p3 }
 0x122   : > { %5880 = shalt.err (!%p5877_p2)
}
 0x123   : > { %p9498_p5 = scmp.ne.s32.totalorder %s9493_s25, 0  ;;  %s9499_s7 = scalar_lea.sflag [#allocation13], %s9485_s28 }
 0x124   : > { %s9500_s29 = sld [smem:[#allocation43_spill]] }
 0x125   : > { %4731 = dma.hbm_to_vmem [thread:$0]  (!%p9498_p5), %s6645_s12, 32, %s493_s22, %s9499_s7  }
 0x12a   : > { %p9501_p6 = scmp.ne.s32.totalorder %s9500_s29, 0 }
 0x12b   : > { %s9502_s2 = sld [smem:[#allocation29_spill]] (!%p9501_p6)  ;;  %s9503_s30 = sld [smem:[#allocation37_spill]] (!%p9501_p6) }
 0x12c   : > { %501 = sbr.rel (%p9501_p6) target bundleno = 1287 (0x507), region = 48 }
 0x131   : > { %s503_s1 = sand.u32 (!%p9501_p6), 1, %s9502_s2   ;;  %p9504_p13 = scmp.ne.s32.totalorder (!%p9501_p6), %s9503_s30, 0 }
 0x132   : > { %s4493_s19 = sshll.u32 (!%p9501_p6), %s503_s1, 9  ;;  %s504_s16 = scalar_lea.sflag (!%p9501_p6), [#allocation4], %s503_s1 }
 0x133   : > { %s6670_s3 = scalar_lea.vmem [#allocation3], %s4493_s19 }
 0x134   : > { %5986 = dma.done.wait (%p9504_p13), %s504_s16, 8192  }
 0x135   : > { %5988 = vsyncadd (%p9504_p13), %s504_s16, 4294959104  ;;  %s9505_s25 = sld [smem:[#allocation44_spill]]  ;;  %s9506_s15 = sld [smem:[#allocation26_spill]] }
 0x136   : > { %s9507_s28 = sld [smem:[#allocation45_spill]] }
 0x13b   : > { %s512_s10 = sand.u32 1, %s9505_s25   ;;  %s514_s12 = sand.u32 1, %s9506_s15  }
 0x13c   : > { %s4494_s22 = sshll.u32 %s514_s12, 10  ;;  %s513_s20 = scalar_lea.sflag [#allocation7], %s512_s10 }
 0x13d   : > { %s6678_s14 = scalar_lea.vmem [#allocation6], %s4494_s22  ;;  %p9508_p11 = scmp.ne.s32.totalorder %s9507_s28, 0 }
 0x13f   : > { %5990 = dma.done.wait (%p9508_p11), %s513_s20, 32768  }
 0x140   : > { %5992 = vsyncadd (%p9508_p11), %s513_s20, 4294934528  ;;  %s9509_s23 = sld [smem:[#allocation24_spill]]  ;;  %s6687_s17 = scalar_lea.vmem [#allocation8], %s4494_s22 }
 0x141   : > { %s9510_s18 = sld [smem:[#allocation47_spill]]  ;;  %s531_s7 = scalar_lea.sflag [#allocation10], %s512_s10 }
 0x146   : > { %s532_s0 = sand.u32 1, %s9509_s23  }
 0x147   : > { %s6685_s21 = sshll.u32 %s532_s0, 1  ;;  %p9511_p10 = scmp.ne.s32.totalorder %s9510_s18, 0 }
 0x149   : > { %5994 = dma.done.wait (%p9511_p10), %s531_s7, 64  }
 0x14a   : > { %5996 = vsyncadd (%p9511_p10), %s531_s7, 4294967232  ;;  %s549_s30 = scalar_lea.sflag [#allocation13], %s512_s10  ;;  %s6695_s1 = scalar_lea.vmem [#allocation12], %s4494_s22 }
 0x14b   : > { %5998 = dma.done.wait (%p9508_p11), %s549_s30, 16384  }
 0x14c   : > { %6000 = vsyncadd (%p9508_p11), %s549_s30, 4294950912 }
 0x14d   : > { %6002 = dma.done.wait (%p9511_p10), %s549_s30, 32  }
 0x14e   : > { %6004 = vsyncadd (%p9511_p10), %s549_s30, 4294967264  ;;  %s9512_s16 = sld [smem:[#allocation23_spill]]  ;;  %s9514_s15 = sld [smem:[#allocation31_spill]] }
 0x14f   : > { %s9513_s25 = sld [smem:[#allocation32_spill]]  ;;  %s9515_s7 = sld [smem:[#allocation62_spill]] }
 0x150   : > { %s9516_s2 = sld [smem:[#allocation63_spill]] }
 0x154   : > { %s619_s10 = sand.u32 1, %s9512_s16   ;;  %p657_p7 = scmp.lt.s32.totalorder %s9514_s15, 1 }
 0x155   : > { %p655_p0 = scmp.lt.s32.totalorder %s9513_s25, 1  ;;  %s4500_s28 = sshll.u32 %s619_s10, 8 }
 0x156   : > { %p671_p8 = scmp.eq.s32.totalorder %s9514_s15, 0  ;;  %s6724_s5 = scalar_lea.vmem [#allocation15], %s4500_s28 }
 0x157   : > { %s9568_s25 = smov (!%p655_p0, %s9513_s25), 1  ;;  %p4505_p12 = scmp.ne.s32.totalorder %s9514_s15, 0 }
 0x158   : > { %s658_s12 = scalar_select %p657_p7, %s9514_s15, 1 }
 0x159   : > { %s4501_s22 = sshll.u32 %s9568_s25, 1  ;;  %674 = sbr.rel (%p4505_p12) target bundleno = 362 (0x16a), region = 80  ;;  %v6095_v0 = vmov (!%p4505_p12), 0.0  }
 0x15a   : > { %s660_s20 = sadd.s32 %s4501_s22, %s658_s12  ;;  %675 = vst [vmem:[#allocation2] sm:$0xff] (!%p4505_p12), %v6095_v0  ;;  %676 = vst [vmem:[#allocation2 + $0x8] sm:$0xff] (!%p4505_p12), %v6095_v0 }
 0x15b   : > { %s4502_s23 = sshll.u32 %s660_s20, 3  ;;  %677 = vst [vmem:[#allocation2 + $0x10] sm:$0xff] (!%p4505_p12), %v6095_v0  ;;  %678 = vst [vmem:[#allocation2 + $0x18] sm:$0xff] (!%p4505_p12), %v6095_v0 }
 0x15c   : > { %s6717_s30 = scalar_lea.vmem %s9515_s7, %s4502_s23  ;;  %s6722_s4 = scalar_lea.vmem %s9516_s2, %s4502_s23  ;;  %679 = vst [vmem:[#allocation2 + $0x20] sm:$0xff] (!%p4505_p12), %v6095_v0  ;;  %680 = vst [vmem:[#allocation2 + $0x28] sm:$0xff] (!%p4505_p12), %v6095_v0 }
 0x15d   : > { %681 = vst [vmem:[#allocation2 + $0x30] sm:$0xff] (!%p4505_p12), %v6095_v0  ;;  %682 = vst [vmem:[#allocation2 + $0x38] sm:$0xff] (!%p4505_p12), %v6095_v0 }
 0x15e   : > { %683 = vst [vmem:[#allocation2 + $0x40] sm:$0xff] (!%p4505_p12), %v6095_v0  ;;  %684 = vst [vmem:[#allocation2 + $0x48] sm:$0xff] (!%p4505_p12), %v6095_v0 }
 0x15f   : > { %685 = vst [vmem:[#allocation2 + $0x50] sm:$0xff] (!%p4505_p12), %v6095_v0  ;;  %686 = vst [vmem:[#allocation2 + $0x58] sm:$0xff] (!%p4505_p12), %v6095_v0 }
 0x160   : > { %687 = vst [vmem:[#allocation2 + $0x60] sm:$0xff] %v6095_v0  ;;  %688 = vst [vmem:[#allocation2 + $0x68] sm:$0xff] %v6095_v0 }
 0x161   : > { %689 = vst [vmem:[#allocation2 + $0x70] sm:$0xff] %v6095_v0  ;;  %690 = vst [vmem:[#allocation2 + $0x78] sm:$0xff] %v6095_v0 }
 0x162   : > { %691 = vst [vmem:[#allocation2 + $0x80] sm:$0xff] %v6095_v0  ;;  %692 = vst [vmem:[#allocation2 + $0x88] sm:$0xff] %v6095_v0 }
 0x163   : > { %693 = vst [vmem:[#allocation2 + $0x90] sm:$0xff] %v6095_v0  ;;  %694 = vst [vmem:[#allocation2 + $0x98] sm:$0xff] %v6095_v0 }
 0x164   : > { %695 = vst [vmem:[#allocation2 + $0xa0] sm:$0xff] %v6095_v0  ;;  %696 = vst [vmem:[#allocation2 + $0xa8] sm:$0xff] %v6095_v0 }
 0x165   : > { %697 = vst [vmem:[#allocation2 + $0xb0] sm:$0xff] %v6095_v0  ;;  %698 = vst [vmem:[#allocation2 + $0xb8] sm:$0xff] %v6095_v0 }
 0x166   : > { %699 = vst [vmem:[#allocation2 + $0xc0] sm:$0xff] %v6095_v0  ;;  %700 = vst [vmem:[#allocation2 + $0xc8] sm:$0xff] %v6095_v0 }
 0x167   : > { %701 = vst [vmem:[#allocation2 + $0xd0] sm:$0xff] %v6095_v0  ;;  %702 = vst [vmem:[#allocation2 + $0xd8] sm:$0xff] %v6095_v0 }
 0x168   : > { %703 = vst [vmem:[#allocation2 + $0xe0] sm:$0xff] %v6095_v0  ;;  %704 = vst [vmem:[#allocation2 + $0xe8] sm:$0xff] %v6095_v0 }
 0x169   : > { %705 = vst [vmem:[#allocation2 + $0xf0] sm:$0xff] %v6095_v0  ;;  %706 = vst [vmem:[#allocation2 + $0xf8] sm:$0xff] %v6095_v0 }
 0x16a PF: > { %v6728_v1 = vld [vmem:[%s6687_s17 + $0x8] sm:$0xff]  ;;  %v6736_v5 = vld [vmem:[%s6687_s17 + $0x18] sm:$0xff]  ;;  %v6742_v8 = vld [vmem:[%s6695_s1 + $0x8] sm:$0xff]  ;;  %s9519_s29 = scalar_lea.vmem [#allocation9], %s6685_s21  ;;  %vm3930_vm0 = vcmask 1040384  }
 0x16b   : > { %v6731_v2 = vld [vmem:[%s6687_s17 + $0x28] sm:$0xff]  ;;  %v1220_v3 = vand.u32 2147483647, %v6728_v1  ;;  %v6739_v7 = vld [vmem:[%s6687_s17 + $0x38] sm:$0xff]  ;;  %v1222_v10 = vand.u32 2147483647, %v6736_v5  ;;  %v3261_v20 = vmul.f32 %v6742_v8, %v6742_v8 }
 0x16c   : > { %v1224_v4 = vand.u32 2147483647, %v6731_v2  ;;  %v1226_v11 = vand.u32 2147483647, %v6739_v7  ;;  %v6747_v13 = vld [vmem:[%s6687_s17] sm:$0xff]  ;;  %v6753_v18 = vld [vmem:[%s6695_s1] sm:$0xff] }
 0x16d   : > { %v1348_v6 = vsub.f32 0.0, %v1220_v3  ;;  %v1350_v15 = vsub.f32 0.0, %v1222_v10  ;;  %v6750_v17 = vld [vmem:[%s6687_s17 + $0x20] sm:$0xff]  ;;  %v6756_v19 = vld [vmem:[%s6695_s1 + $0x28] sm:$0xff]  ;;  %v1219_v21 = vand.u32 2147483647, %v6747_v13  ;;  %v3260_v28 = vmul.f32 %v6753_v18, %v6753_v18 }
 0x16e   : > { %v1352_v9 = vsub.f32 0.0, %v1224_v4  ;;  %v1354_v16 = vsub.f32 0.0, %v1226_v11  ;;  %v1223_v24 = vand.u32 2147483647, %v6750_v17  ;;  %v1092_v25 = vmax.f32 %v6728_v1, 0.0  ;;  %v6764_v26 = vld [vmem:[%s6695_s1 + $0x18] sm:$0xff] }
 0x16f   : > { %v1477_v12 = vmul.f32 1.442695, %v1348_v6  ;;  %v1481_v22 = vmul.f32 1.442695, %v1350_v15  ;;  %v1347_v27 = vsub.f32 0.0, %v1219_v21  ;;  %v6769_v29 = vld [vmem:[%s6687_s17 + $0x10] sm:$0xff]  ;;  %v3265_v32 = vmul.f32 %v6756_v19, %v6756_v19 }
 0x170   : > { %v1485_v14 = vmul.f32 1.442695, %v1352_v9  ;;  %v1489_v23 = vmul.f32 1.442695, %v1354_v16  ;;  %v6772_v30 = vld [vmem:[%s6687_s17 + $0x30] sm:$0xff]  ;;  %v1096_v31 = vmax.f32 %v6731_v2, 0.0  ;;  %v3388_v37 = vadd.f32 %v3261_v20, %v3260_v28 }
 0x171   : > { %4897 = vpow2.f32 %v1477_v12  ;;  %v6778_v33 = vld [vmem:[%s6695_s1 + $0x20] sm:$0xff]  ;;  %v1351_v34 = vsub.f32 0.0, %v1223_v24  ;;  %v6781_v35 = vld [vmem:[%s6695_s1 + $0x10] sm:$0xff]  ;;  %v1475_v36 = vmul.f32 1.442695, %v1347_v27  ;;  %v6788_v40 = vld [vmem:[%s6695_s1 + $0x38] sm:$0xff]  ;;  %v3263_v41 = vmul.f32 %v6764_v26, %v6764_v26 }
 0x172   : > { %4899 = vpow2.f32 %v1485_v14  ;;  %v1221_v38 = vand.u32 2147483647, %v6769_v29  ;;  %v6785_v39 = vld [vmem:[%s6687_s17 + $0x48] sm:$0xff]  ;;  %v1225_v43 = vand.u32 2147483647, %v6772_v30  ;;  %v3262_v44 = vmul.f32 %v6781_v35, %v6781_v35  ;;  %v6802_v49 = vld [vmem:[%s6695_s1 + $0x30] sm:$0xff] }
 0x173   : > { %4901 = vpow2.f32 %v1481_v22  ;;  %v1483_v42 = vmul.f32 1.442695, %v1351_v34  ;;  %v6796_v45 = vld [vmem:[%s6687_s17 + $0x68] sm:$0xff]  ;;  %v1094_v46 = vmax.f32 %v6736_v5, 0.0  ;;  %v3264_v47 = vmul.f32 %v6778_v33, %v6778_v33  ;;  %v6806_v53 = vld [vmem:[%s6687_s17 + $0x58] sm:$0xff]  ;;  %v6821_v15 = vld [vmem:[%s6695_s1 + $0x48] sm:$0xff] }
 0x174   : > { %4903 = vpow2.f32 %v1489_v23  ;;  %v1349_v48 = vsub.f32 0.0, %v1221_v38  ;;  %v1353_v50 = vsub.f32 0.0, %v1225_v43  ;;  %v3389_v51 = vadd.f32 %v3388_v37, %v3262_v44  ;;  %v6814_v62 = vld [vmem:[%s6687_s17 + $0x78] sm:$0xff]  ;;  %v6827_v27 = vld [vmem:[%s6687_s17 + $0x40] sm:$0xff]  ;;  %v6836_v44 = vld [vmem:[%s6695_s1 + $0x40] sm:$0xff] }
 0x175   : > { %4905 = vpow2.f32 %v1475_v36  ;;  %v1228_v52 = vand.u32 2147483647, %v6785_v39  ;;  %v1098_v54 = vmax.f32 %v6739_v7, 0.0  ;;  %v3267_v55 = vmul.f32 %v6788_v40, %v6788_v40  ;;  %v6831_v38 = vld [vmem:[%s6687_s17 + $0x60] sm:$0xff]  ;;  %v712_v1 = vld [vmem:[%s6678_s14 + $0x28] sm:$0xff] }
 0x176   : > { %4907 = vpow2.f32 %v1483_v42  ;;  %v1479_v56 = vmul.f32 1.442695, %v1349_v48  ;;  %v1232_v57 = vand.u32 2147483647, %v6796_v45  ;;  %v1091_v58 = vmax.f32 %v6747_v13, 0.0 }
 0x177   : > { %v1487_v59 = vmul.f32 1.442695, %v1353_v50  ;;  %v3390_v60 = vadd.f32 %v3389_v51, %v3263_v41  ;;  %v1356_v61 = vsub.f32 0.0, %v1228_v52  ;;  %v3266_v0 = vmul.f32 %v6802_v49, %v6802_v49 }
 0x178   : > { %4909 = vpow2.f32 %v1479_v56  ;;  %v1360_v3 = vsub.f32 0.0, %v1232_v57  ;;  %v1230_v4 = vand.u32 2147483647, %v6806_v53  ;;  %v1095_v14 = vmax.f32 %v6750_v17, 0.0 }
 0x179   : > { %4911 = vpow2.f32 %v1487_v59  ;;  %v3391_v10 = vadd.f32 %v3390_v60, %v3264_v47  ;;  %v1493_v11 = vmul.f32 1.442695, %v1356_v61  ;;  %v1234_v16 = vand.u32 2147483647, %v6814_v62  ;;  %v6839_v47 = vld [vmem:[%s6695_s1 + $0x68] sm:$0xff]  ;;  %v6844_v61 = vld [vmem:[%s6695_s1 + $0x58] sm:$0xff] }
 0x17a   : > { %v1358_v20 = vsub.f32 0.0, %v1230_v4  ;;  %v1093_v22 = vmax.f32 %v6769_v29, 0.0  ;;  %v1097_v23 = vmax.f32 %v6772_v30, 0.0  ;;  %v1100_v36 = vmax.f32 %v6785_v39, 0.0 }
 0x17b   : > { %v4898_v63 = vpop.eup %4897  ;;  %v3392_v24 = vadd.f32 %v3391_v10, %v3265_v32  ;;  %v1501_v37 = vmul.f32 1.442695, %v1360_v3  ;;  %v3269_v43 = vmul.f32 %v6821_v15, %v6821_v15  ;;  %v1362_v48 = vsub.f32 0.0, %v1234_v16  ;;  %v6849_v3 = vld [vmem:[%s6687_s17 + $0x50] sm:$0xff]  ;;  %v6859_v16 = vld [vmem:[%s6695_s1 + $0x50] sm:$0xff] }
 0x17c   : > { %v4900_v6 = vpop.eup %4899  ;;  %v1732_v9 = vadd.f32 1.0, %v4898_v63  ;;  %v1497_v50 = vmul.f32 1.442695, %v1358_v20  ;;  %v1227_v51 = vand.u32 2147483647, %v6827_v27  ;;  %v1104_v4 = vmax.f32 %v6796_v45, 0.0 }
 0x17d   : > { %v1736_v12 = vadd.f32 1.0, %v4900_v6  ;;  %v4902_v21 = vpop.eup %4901  ;;  %v3393_v42 = vadd.f32 %v3392_v24, %v3266_v0  ;;  %v1231_v59 = vand.u32 2147483647, %v6831_v38  ;;  %v3268_v0 = vmul.f32 %v6836_v44, %v6836_v44  ;;  %v6862_v24 = vld [vmem:[%s6695_s1 + $0x78] sm:$0xff] }
 0x17e   : > { %4913 = vlog2.f32 %v1732_v9  ;;  %v4904_v28 = vpop.eup %4903  ;;  %v1734_v34 = vadd.f32 1.0, %v4902_v21  ;;  %v1355_v63 = vsub.f32 0.0, %v1227_v51  ;;  %v1102_v10 = vmax.f32 %v6806_v53, 0.0 }
 0x17f   : > { %4915 = vlog2.f32 %v1736_v12  ;;  %v1738_v41 = vadd.f32 1.0, %v4904_v28  ;;  %v4906_v32 = vpop.eup %4905  ;;  %v3394_v57 = vadd.f32 %v3393_v42, %v3267_v55  ;;  %v6854_v55 = vmul.f32 %v6839_v47, %v6839_v47 }
 0x180   : > { %4917 = vpow2.f32 %v1493_v11  ;;  %v4908_v52 = vpop.eup %4907  ;;  %v1731_v56 = vadd.f32 1.0, %v4906_v32  ;;  %v1359_v6 = vsub.f32 0.0, %v1231_v59  ;;  %v1106_v11 = vmax.f32 %v6814_v62, 0.0 }
 0x181   : > { %4919 = vlog2.f32 %v1734_v34  ;;  %v1735_v60 = vadd.f32 1.0, %v4908_v52  ;;  %v3395_v12 = vadd.f32 %v3394_v57, %v3268_v0  ;;  %v1505_v28 = vmul.f32 1.442695, %v1362_v48 }
 0x182   : > { %4921 = vlog2.f32 %v1738_v41  ;;  %v4910_v9 = vpop.eup %4909  ;;  %v3271_v34 = vmul.f32 %v6844_v61, %v6844_v61  ;;  %v1491_v42 = vmul.f32 1.442695, %v1355_v63  ;;  %v1499_v52 = vmul.f32 1.442695, %v1359_v6 }
 0x183   : > { %4923 = vpow2.f32 %v1501_v37  ;;  %v4912_v20 = vpop.eup %4911  ;;  %v1733_v21 = vadd.f32 1.0, %v4910_v9  ;;  %v1229_v37 = vand.u32 2147483647, %v6849_v3  ;;  %v3396_v32 = vadd.f32 %v3395_v12, %v3269_v43  ;;  %v6875_v43 = vld [vmem:[%s6695_s1 + $0x60] sm:$0xff] }
 0x184   : > { %4925 = vlog2.f32 %v1731_v56  ;;  %v1737_v41 = vadd.f32 1.0, %v4912_v20  ;;  %v3270_v57 = vmul.f32 %v6859_v16, %v6859_v16  ;;  %v6871_v48 = vmul.f32 %v6862_v24, %v6862_v24 }
 0x185   : > { %4927 = vlog2.f32 %v1735_v60  ;;  %v1357_v56 = vsub.f32 0.0, %v1229_v37  ;;  %v1099_v0 = vmax.f32 %v6827_v27, 0.0  ;;  %v1103_v37 = vmax.f32 %v6831_v38, 0.0 }
 0x186   : > { %4929 = vpow2.f32 %v1497_v50  ;;  %v3397_v9 = vadd.f32 %v3396_v32, %v3270_v57  ;;  %v708_v57 = vld [vmem:[%s6678_s14 + $0x8] sm:$0xff] }
 0x187   : > { %4931 = vlog2.f32 %v1733_v21  ;;  %v1495_v6 = vmul.f32 1.442695, %v1357_v56 }
 0x188   : > { %v4914_v51 = vpop.eup %4913  ;;  %4933 = vlog2.f32 %v1737_v41  ;;  %v6887_v56 = vadd.f32 %v3397_v9, %v3271_v34 }
 0x189   : > { %v4916_v59 = vpop.eup %4915  ;;  %v1862_v60 = vmul.f32 0.6931472, %v4914_v51  ;;  %4935 = vpow2.f32 %v1505_v28 }
 0x18a   : > { %v4918_v50 = vpop.eup %4917  ;;  %v1870_v63 = vmul.f32 0.6931472, %v4916_v59  ;;  %4937 = vpow2.f32 %v1491_v42  ;;  %v6885_v59 = vld [vmem:[%s6687_s17 + $0x70] sm:$0xff]  ;;  %v6894_v42 = vmul.f32 %v6875_v43, %v6875_v43 }
 0x18b   : > { %v4920_v12 = vpop.eup %4919  ;;  %v2116_v20 = vadd.f32 %v1862_v60, %v1092_v25  ;;  %v1740_v21 = vadd.f32 1.0, %v4918_v50  ;;  %4939 = vpow2.f32 %v1499_v52  ;;  %v1101_v52 = vmax.f32 %v6849_v3, 0.0  ;;  %v7015_v3 = vld [vmem:[%s6695_s1 + $0xa8] sm:$0xff] }
 0x18c   : > { %v4922_v41 = vpop.eup %4921  ;;  %v6882_v51 = vadd.f32 %v1870_v63, %v1096_v31  ;;  %v1866_v28 = vmul.f32 0.6931472, %v4920_v12  ;;  %4941 = vpow2.f32 %v1495_v6  ;;  %v710_v63 = vld [vmem:[%s6678_s14 + $0x18] sm:$0xff]  ;;  %v1233_v6 = vand.u32 2147483647, %v6885_v59 }
 0x18d   : > { %v4924_v32 = vpop.eup %4923  ;;  %v2244_v25 = vmul.f32 %v2116_v20, %v6742_v8  ;;  %v1874_v60 = vmul.f32 0.6931472, %v4922_v41  ;;  %4943 = vlog2.f32 %v2116_v20 }
 0x18e   : > { %v4926_v2 = vpop.eup %4925  ;;  %v2248_v31 = vmul.f32 %v6882_v51, %v6756_v19  ;;  %v2118_v34 = vadd.f32 %v1866_v28, %v1094_v46  ;;  %4945 = vlog2.f32 %v1740_v21  ;;  %v714_v19 = vld [vmem:[%s6678_s14 + $0x38] sm:$0xff]  ;;  %v1105_v21 = vmax.f32 %v6885_v59, 0.0 }
 0x18f   : > { %v4928_v50 = vpop.eup %4927  ;;  %v6904_v8 = vadd.f32 %v1874_v60, %v1098_v54  ;;  %v1860_v9 = vmul.f32 0.6931472, %v4926_v2  ;;  %v2372_v12 = vadd.f32 %v2244_v25, %v708_v57  ;;  %v1744_v54 = vadd.f32 1.0, %v4924_v32  ;;  %v707_v25 = vld [vmem:[%s6678_s14] sm:$0xff] }
 0x190   : > { %v6907_v41 = vadd.f32 %v2248_v31, %v712_v1  ;;  %v2246_v5 = vmul.f32 %v2118_v34, %v6764_v26  ;;  %v1868_v46 = vmul.f32 0.6931472, %v4928_v50  ;;  %v4930_v20 = vpop.eup %4929  ;;  %4947 = vlog2.f32 %v2118_v34 }
 0x191   : > { %v2250_v28 = vmul.f32 %v6904_v8, %v6788_v40  ;;  %v2115_v7 = vadd.f32 %v1860_v9, %v1091_v58  ;;  %v4932_v60 = vpop.eup %4931  ;;  %v711_v40 = vld [vmem:[%s6678_s14 + $0x20] sm:$0xff]  ;;  %v2996_v50 = vmul.f32 %v2372_v12, %v2372_v12  ;;  %v1361_v9 = vsub.f32 0.0, %v1233_v6 }
 0x192   : > { %v4522_v57 = vpack.c.bf16 %v6907_v41, %v2372_v12  ;;  %v2374_v1 = vadd.f32 %v2246_v5, %v710_v63  ;;  %v2119_v26 = vadd.f32 %v1868_v46, %v1095_v14  ;;  %v4934_v2 = vpop.eup %4933  ;;  %v1864_v58 = vmul.f32 0.6931472, %v4932_v60 }
 0x193   : > { %v6920_v31 = vadd.f32 %v2250_v28, %v714_v19  ;;  %v2243_v13 = vmul.f32 %v2115_v7, %v6753_v18  ;;  %4949 = vlog2.f32 %v2115_v7  ;;  %v4936_v32 = vpop.eup %4935  ;;  %v1872_v34 = vmul.f32 0.6931472, %v4934_v2  ;;  %v6929_v18 = vld [vmem:[%s6695_s1 + $0x70] sm:$0xff]  ;;  %v709_v7 = vld [vmem:[%s6678_s14 + $0x10] sm:$0xff] }
 0x194   : > { %4523 = vmatprep.subr.bf16.mxu1 %v4522_v57  ;;  %v2247_v63 = vmul.f32 %v2119_v26, %v6778_v33  ;;  %v4938_v17 = vpop.eup %4937  ;;  %4951 = vlog2.f32 %v2119_v26  ;;  %v2117_v5 = vadd.f32 %v1864_v58, %v1093_v22  ;;  %v1742_v33 = vadd.f32 1.0, %v4930_v20  ;;  %v713_v57 = vld [vmem:[%s6678_s14 + $0x30] sm:$0xff] }
 0x195   : > { %v4586_v14 = vpack.c.bf16 %v6920_v31, %v2374_v1  ;;  %v2371_v19 = vadd.f32 %v2243_v13, %v707_v25  ;;  %v4940_v46 = vpop.eup %4939  ;;  %v2121_v12 = vadd.f32 %v1872_v34, %v1097_v23  ;;  %4953 = vlog2.f32 %v1744_v54 }
 0x196   : > { %v2375_v28 = vadd.f32 %v2247_v63, %v711_v40  ;;  %v4942_v6 = vpop.eup %4941  ;;  %v2245_v25 = vmul.f32 %v2117_v5, %v6781_v35  ;;  %4955 = vlog2.f32 %v2117_v5  ;;  %v1746_v26 = vadd.f32 1.0, %v4936_v32 }
 0x197   : > { %4587 = vmatprep.subr.bf16.mxu0 %v4586_v14  ;;  %v2995_v60 = vmul.f32 %v2371_v19, %v2371_v19  ;;  %v4944_v29 = vpop.eup %4943  ;;  %4957 = vlog2.f32 %v6882_v51  ;;  %v2249_v2 = vmul.f32 %v2121_v12, %v6802_v49  ;;  %v3274_v30 = vmul.f32 %v6929_v18, %v6929_v18  ;;  %v6941_v49 = vld [vmem:[%s6687_s17 + $0x88] sm:$0xff] }
 0x198   : > { %v4524_v22 = vpack.c.bf16 %v2375_v28, %v2371_v19  ;;  %v4946_v23 = vpop.eup %4945  ;;  %v2373_v54 = vadd.f32 %v2245_v25, %v709_v7  ;;  %4959 = vlog2.f32 %v2121_v12  ;;  %v1503_v40 = vmul.f32 1.442695, %v1361_v9  ;;  %v6947_v12 = vld [vmem:[%s6687_s17 + $0xa8] sm:$0xff] }
 0x199   : > { %v3123_v20 = vadd.f32 %v2996_v50, %v2995_v60  ;;  %v2377_v13 = vadd.f32 %v2249_v2, %v713_v57  ;;  %v1878_v35 = vmul.f32 0.6931472, %v4946_v23  ;;  %4961 = vlog2.f32 %v1742_v33 }
 0x19a   : > { %4525 = vmatpush1.bf16.xpose.msra.mxu1 %v4524_v22  ;;  %v1739_v58 = vadd.f32 1.0, %v4938_v17  ;;  %v2998_v32 = vmul.f32 %v2374_v1, %v2374_v1  ;;  %v2997_v51 = vmul.f32 %v2373_v54, %v2373_v54  ;;  %4963 = vlog2.f32 %v1746_v26  ;;  %v4948_v34 = vpop.eup %4947 }
 0x19b   : > { %v1743_v63 = vadd.f32 1.0, %v4940_v46  ;;  %v3528_v14 = vmul.f32 0.6931472, %v4944_v29  ;;  %4965 = vlog2.f32 %v6904_v8  ;;  %v2999_v50 = vmul.f32 %v2375_v28, %v2375_v28 }
 0x19c   : > { %v4588_v19 = vpack.c.bf16 %v2377_v13, %v2373_v54  ;;  %v3124_v9 = vadd.f32 %v3123_v20, %v2997_v51  ;;  %4967 = vlog2.f32 %v1739_v58  ;;  %v1741_v7 = vadd.f32 1.0, %v4942_v6  ;;  %v720_v58 = vld [vmem:[%s6678_s14 + $0x68] sm:$0xff] }
 0x19d   : > { %v4950_v5 = vpop.eup %4949  ;;  %v3399_v17 = vadd.f32 %v6887_v56, %v6894_v42  ;;  %v3000_v1 = vmul.f32 %v6907_v41, %v6907_v41  ;;  %v2124_v33 = vadd.f32 %v1878_v35, %v1100_v36  ;;  %v1236_v8 = vand.u32 2147483647, %v6941_v49 }
 0x19e   : > { %v3526_v46 = vmul.f32 0.6931472, %v4950_v5  ;;  %4589 = vmatpush1.bf16.xpose.msra.mxu0 %v4588_v19  ;;  %v4952_v28 = vpop.eup %4951  ;;  %v3532_v60 = vmul.f32 0.6931472, %v4948_v34  ;;  %v3125_v57 = vadd.f32 %v3124_v9, %v2998_v32  ;;  %4969 = vlog2.f32 %v1743_v63 }
 0x19f   : > { %v3400_v6 = vadd.f32 %v3399_v17, %v6854_v55  ;;  %v4954_v25 = vpop.eup %4953  ;;  %v3001_v42 = vmul.f32 %v2377_v13, %v2377_v13  ;;  %4971 = vpow2.f32 %v1503_v40  ;;  %v1240_v41 = vand.u32 2147483647, %v6947_v12  ;;  %v716_v40 = vld [vmem:[%s6678_s14 + $0x48] sm:$0xff] }
 0x1a0   : > { %v3781_v56 = vadd.f32 %v3528_v14, %v3526_v46  ;;  %v4956_v26 = vpop.eup %4955  ;;  %v3126_v29 = vadd.f32 %v3125_v57, %v2999_v50  ;;  %v1886_v39 = vmul.f32 0.6931472, %v4954_v25  ;;  %4973 = vlog2.f32 %v1741_v7 }
 0x1a1   : > { %v3401_v36 = vadd.f32 %v3400_v6, %v3274_v30  ;;  %v4958_v22 = vpop.eup %4957  ;;  %v3530_v2 = vmul.f32 0.6931472, %v4956_v26  ;;  %v2252_v23 = vmul.f32 %v2124_v33, %v6821_v15  ;;  %v1364_v20 = vsub.f32 0.0, %v1236_v8  ;;  %v718_v6 = vld [vmem:[%s6678_s14 + $0x58] sm:$0xff] }
 0x1a2   : > { %v1368_v54 = vsub.f32 0.0, %v1240_v41  ;;  %v4960_v55 = vpop.eup %4959  ;;  %v3002_v13 = vmul.f32 %v6920_v31, %v6920_v31  ;;  %v3127_v35 = vadd.f32 %v3126_v29, %v3000_v1  ;;  %v2128_v32 = vadd.f32 %v1886_v39, %v1104_v4 }
 0x1a3   : > { %v6964_v51 = vadd.f32 %v3401_v36, %v6871_v48  ;;  %v4962_v30 = vpop.eup %4961  ;;  %v3534_v63 = vmul.f32 0.6931472, %v4952_v28  ;;  %v3782_v34 = vadd.f32 %v3781_v56, %v3530_v2  ;;  %v1509_v14 = vmul.f32 1.442695, %v1364_v20 }
 0x1a4   : > { %v1517_v15 = vmul.f32 1.442695, %v1368_v54  ;;  %v4964_v50 = vpop.eup %4963  ;;  %v3536_v19 = vmul.f32 0.6931472, %v4958_v22  ;;  %v3128_v5 = vadd.f32 %v3127_v35, %v3001_v42  ;;  %v2256_v31 = vmul.f32 %v2128_v32, %v6839_v47  ;;  %v722_v42 = vld [vmem:[%s6678_s14 + $0x78] sm:$0xff] }
 0x1a5   : > { %v1882_v9 = vmul.f32 0.6931472, %v4962_v30  ;;  %v4966_v7 = vpop.eup %4965  ;;  %v3783_v17 = vadd.f32 %v3782_v34, %v3532_v60  ;;  %v2380_v1 = vadd.f32 %v2252_v23, %v716_v40  ;;  %v1890_v45 = vmul.f32 0.6931472, %v4964_v50  ;;  %v715_v23 = vld [vmem:[%s6678_s14 + $0x40] sm:$0xff]  ;;  %v6994_v40 = vld [vmem:[%s6695_s1 + $0x88] sm:$0xff] }
 0x1a6   : > { %4975 = vpow2.f32 %v1509_v14  ;;  %v4968_v4 = vpop.eup %4967  ;;  %v6967_v48 = vadd.f32 %v3128_v5, %v3002_v13  ;;  %v6969_v46 = vadd.f32 %v2256_v31, %v720_v58  ;;  %v3538_v28 = vmul.f32 0.6931472, %v4960_v55  ;;  %v719_v13 = vld [vmem:[%s6678_s14 + $0x60] sm:$0xff] }
 0x1a7   : > { %v2126_v8 = vadd.f32 %v1882_v9, %v1102_v10  ;;  %4977 = vpow2.f32 %v1517_v15  ;;  %v3784_v57 = vadd.f32 %v3783_v17, %v3534_v63  ;;  %v2130_v47 = vadd.f32 %v1890_v45, %v1106_v11  ;;  %v717_v15 = vld [vmem:[%s6678_s14 + $0x50] sm:$0xff] }
 0x1a8   : > { %v1876_v60 = vmul.f32 0.6931472, %v4968_v4  ;;  %v4970_v25 = vpop.eup %4969  ;;  %v4526_v56 = vpack.c.bf16 %v6969_v46, %v2380_v1  ;;  %4979 = vlog2.f32 %v2124_v33  ;;  %v1108_v26 = vmax.f32 %v6941_v49, 0.0 }
 0x1a9   : > { %v2254_v41 = vmul.f32 %v2126_v8, %v6844_v61  ;;  %v4972_v53 = vpop.eup %4971  ;;  %v3540_v10 = vmul.f32 0.6931472, %v4966_v7  ;;  %v3785_v29 = vadd.f32 %v3784_v57, %v3536_v19  ;;  %v2258_v39 = vmul.f32 %v2130_v47, %v6862_v24  ;;  %v6989_v24 = vld [vmem:[%s6687_s17 + $0x98] sm:$0xff]  ;;  %v7026_v57 = vld [vmem:[%s6687_s17 + $0x80] sm:$0xff] }
 0x1aa   : > { %v1884_v62 = vmul.f32 0.6931472, %v4970_v25  ;;  %v4974_v11 = vpop.eup %4973  ;;  %4527 = vmatprep.subr.bf16.mxu1 %v4526_v56  ;;  %4981 = vlog2.f32 %v2126_v8  ;;  %v2123_v33 = vadd.f32 %v1876_v60, %v1099_v0  ;;  %v1745_v61 = vadd.f32 1.0, %v4972_v53  ;;  %v6998_v0 = vld [vmem:[%s6687_s17 + $0xb8] sm:$0xff] }
 0x1ab   : > { %v2382_v36 = vadd.f32 %v2254_v41, %v718_v6  ;;  %v3786_v22 = vadd.f32 %v3785_v29, %v3538_v28  ;;  %v6983_v2 = vadd.f32 %v2258_v39, %v722_v42  ;;  %v1880_v54 = vmul.f32 0.6931472, %v4974_v11  ;;  %v7029_v6 = vld [vmem:[%s6687_s17 + $0xa0] sm:$0xff]  ;;  %v7034_v42 = vld [vmem:[%s6695_s1 + $0x80] sm:$0xff] }
 0x1ac   : > { %v2127_v20 = vadd.f32 %v1884_v62, %v1103_v37  ;;  %v3004_v55 = vmul.f32 %v2380_v1, %v2380_v1  ;;  %v2251_v35 = vmul.f32 %v2123_v33, %v6836_v44  ;;  %4983 = vlog2.f32 %v2123_v33 }
 0x1ad   : > { %v1112_v27 = vmax.f32 %v6947_v12, 0.0  ;;  %v7000_v58 = vadd.f32 %v3786_v22, %v3540_v10  ;;  %4985 = vlog2.f32 %v2128_v32  ;;  %v4590_v38 = vpack.c.bf16 %v6983_v2, %v2382_v36 }
 0x1ae   : > { %v2255_v37 = vmul.f32 %v2127_v20, %v6875_v43  ;;  %v2379_v30 = vadd.f32 %v2251_v35, %v715_v23  ;;  %4987 = vlog2.f32 %v2127_v20  ;;  %v2125_v44 = vadd.f32 %v1880_v54, %v1101_v52 }
 0x1af   : > { %v1238_v63 = vand.u32 2147483647, %v6989_v24  ;;  %4591 = vmatprep.subr.bf16.mxu0 %v4590_v38  ;;  %4989 = vlog2.f32 %v1745_v61  ;;  %v7010_v32 = vmul.f32 %v6994_v40, %v6994_v40  ;;  %v1242_v50 = vand.u32 2147483647, %v6998_v0  ;;  %v7051_v38 = vld [vmem:[%s6687_s17 + $0xb0] sm:$0xff] }
 0x1b0   : > { %v4976_v34 = vpop.eup %4975  ;;  %v2383_v14 = vadd.f32 %v2255_v37, %v719_v13  ;;  %v3003_v19 = vmul.f32 %v2379_v30, %v2379_v30  ;;  %v2253_v5 = vmul.f32 %v2125_v44, %v6859_v16  ;;  %4991 = vlog2.f32 %v2125_v44 }
 0x1b1   : > { %v4978_v43 = vpop.eup %4977  ;;  %v1748_v52 = vadd.f32 1.0, %v4976_v34  ;;  %4993 = vlog2.f32 %v2130_v47  ;;  %v1366_v7 = vsub.f32 0.0, %v1238_v63  ;;  %v1370_v4 = vsub.f32 0.0, %v1242_v50 }
 0x1b2   : > { %v4528_v31 = vpack.c.bf16 %v2383_v14, %v2379_v30  ;;  %v1752_v9 = vadd.f32 1.0, %v4978_v43  ;;  %v4980_v17 = vpop.eup %4979  ;;  %v3130_v1 = vadd.f32 %v6967_v48, %v3003_v19  ;;  %v7018_v45 = vadd.f32 %v2253_v5, %v717_v15 }
 0x1b3   : > { %4995 = vlog2.f32 %v1748_v52  ;;  %v7022_v16 = vmul.f32 %v7015_v3, %v7015_v3  ;;  %v1110_v8 = vmax.f32 %v6989_v24, 0.0  ;;  %v1513_v28 = vmul.f32 1.442695, %v1366_v7 }
 0x1b4   : > { %4529 = vmatpush1.bf16.xpose.msra.mxu1 %v4528_v31  ;;  %4997 = vlog2.f32 %v1752_v9  ;;  %v4982_v48 = vpop.eup %4981  ;;  %v3006_v47 = vmul.f32 %v2382_v36, %v2382_v36  ;;  %v3131_v60 = vadd.f32 %v3130_v1, %v3004_v55  ;;  %v3005_v25 = vmul.f32 %v7018_v45, %v7018_v45  ;;  %v7041_v36 = vld [vmem:[%s6687_s17 + $0x90] sm:$0xff] }
 0x1b5   : > { %v1521_v56 = vmul.f32 1.442695, %v1370_v4  ;;  %v3008_v41 = vmul.f32 %v6969_v46, %v6969_v46  ;;  %v3544_v53 = vmul.f32 0.6931472, %v4980_v17  ;;  %v3007_v10 = vmul.f32 %v2383_v14, %v2383_v14  ;;  %v7061_v17 = vld [vmem:[%s6695_s1 + $0x90] sm:$0xff] }
 0x1b6   : > { %4999 = vpow2.f32 %v1513_v28  ;;  %v4984_v29 = vpop.eup %4983  ;;  %v3132_v39 = vadd.f32 %v3131_v60, %v3005_v25  ;;  %v1235_v62 = vand.u32 2147483647, %v7026_v57  ;;  %v1239_v11 = vand.u32 2147483647, %v7029_v6  ;;  %v721_v28 = vld [vmem:[%s6678_s14 + $0x70] sm:$0xff] }
 0x1b7   : > { %5001 = vpow2.f32 %v1521_v56  ;;  %v4986_v33 = vpop.eup %4985  ;;  %v7045_v61 = vmul.f32 %v6983_v2, %v6983_v2  ;;  %v3542_v22 = vmul.f32 0.6931472, %v4984_v29  ;;  %v1114_v46 = vmax.f32 %v6998_v0, 0.0 }
 0x1b8   : > { %v3276_v23 = vmul.f32 %v7034_v42, %v7034_v42  ;;  %v4988_v20 = vpop.eup %4987  ;;  %v3548_v54 = vmul.f32 0.6931472, %v4982_v48  ;;  %v3133_v55 = vadd.f32 %v3132_v39, %v3006_v47  ;;  %v1363_v13 = vsub.f32 0.0, %v1235_v62 }
 0x1b9   : > { %v1367_v35 = vsub.f32 0.0, %v1239_v11  ;;  %v4990_v37 = vpop.eup %4989  ;;  %v3550_v30 = vmul.f32 0.6931472, %v4988_v20  ;;  %v3788_v44 = vadd.f32 %v7000_v58, %v3542_v22  ;;  %v1237_v63 = vand.u32 2147483647, %v7041_v36  ;;  %v724_v11 = vld [vmem:[%s6678_s14 + $0x88] sm:$0xff] }
 0x1ba   : > { %v3403_v2 = vadd.f32 %v6964_v51, %v3276_v23  ;;  %v4992_v34 = vpop.eup %4991  ;;  %v1888_v14 = vmul.f32 0.6931472, %v4990_v37  ;;  %v3134_v15 = vadd.f32 %v3133_v55, %v3007_v10  ;;  %v1507_v50 = vmul.f32 1.442695, %v1363_v13  ;;  %v7068_v10 = vld [vmem:[%s6695_s1 + $0x98] sm:$0xff]  ;;  %v7076_v23 = vld [vmem:[%s6695_s1 + $0xa0] sm:$0xff] }
 0x1bb   : > { %v1515_v43 = vmul.f32 1.442695, %v1367_v35  ;;  %v4994_v19 = vpop.eup %4993  ;;  %v3789_v5 = vadd.f32 %v3788_v44, %v3544_v53  ;;  %v3546_v52 = vmul.f32 0.6931472, %v4992_v34  ;;  %v1241_v9 = vand.u32 2147483647, %v7051_v38 }
 0x1bc   : > { %v3404_v31 = vadd.f32 %v3403_v2, %v7010_v32  ;;  %v2129_v51 = vadd.f32 %v1888_v14, %v1105_v21  ;;  %v3135_v58 = vadd.f32 %v3134_v15, %v3008_v41  ;;  %5003 = vpow2.f32 %v1507_v50  ;;  %v728_v20 = vld [vmem:[%s6678_s14 + $0xa8] sm:$0xff]  ;;  %v7083_v37 = vld [vmem:[%s6695_s1 + $0xb8] sm:$0xff]  ;;  %v7101_v50 = vld [vmem:[%s6695_s1 + $0xb0] sm:$0xff] }
 0x1bd   : > { %v4996_v7 = vpop.eup %4995  ;;  %v1365_v1 = vsub.f32 0.0, %v1237_v63  ;;  %v3790_v48 = vadd.f32 %v3789_v5, %v3546_v52  ;;  %5005 = vpow2.f32 %v1515_v43  ;;  %v1369_v60 = vsub.f32 0.0, %v1241_v9  ;;  %v7095_v63 = vld [vmem:[%s6687_s17 + $0xe8] sm:$0xff] }
 0x1be   : > { %v4998_v4 = vpop.eup %4997  ;;  %v1894_v47 = vmul.f32 0.6931472, %v4996_v7  ;;  %v2257_v32 = vmul.f32 %v2129_v51, %v6929_v18  ;;  %5007 = vlog2.f32 %v2129_v51  ;;  %v3552_v56 = vmul.f32 0.6931472, %v4986_v33  ;;  %v7109_v7 = vld [vmem:[%s6687_s17 + $0xd8] sm:$0xff] }
 0x1bf   : > { %v1902_v25 = vmul.f32 0.6931472, %v4998_v4  ;;  %v1511_v59 = vmul.f32 1.442695, %v1365_v1  ;;  %v3791_v41 = vadd.f32 %v3790_v48, %v3548_v54  ;;  %v3278_v29 = vmul.f32 %v7061_v17, %v7061_v17 }
 0x1c0   : > { %v5000_v21 = vpop.eup %4999  ;;  %v2132_v53 = vadd.f32 %v1894_v47, %v1108_v26  ;;  %v2385_v62 = vadd.f32 %v2257_v32, %v721_v28  ;;  %v1519_v54 = vmul.f32 1.442695, %v1369_v60  ;;  %v3279_v12 = vmul.f32 %v7068_v10, %v7068_v10 }
 0x1c1   : > { %v5002_v39 = vpop.eup %5001  ;;  %v2136_v18 = vadd.f32 %v1902_v25, %v1112_v27  ;;  %v1750_v22 = vadd.f32 1.0, %v5000_v21  ;;  %5009 = vpow2.f32 %v1511_v59  ;;  %v3792_v33 = vadd.f32 %v3791_v41, %v3550_v30  ;;  %v7117_v59 = vld [vmem:[%s6687_s17 + $0xf8] sm:$0xff] }
 0x1c2   : > { %v2260_v49 = vmul.f32 %v2132_v53, %v6994_v40  ;;  %v1754_v26 = vadd.f32 1.0, %v5002_v39  ;;  %v4592_v55 = vpack.c.bf16 %v2385_v62, %v7018_v45  ;;  %v3009_v13 = vmul.f32 %v2385_v62, %v2385_v62 }
 0x1c3   : > { %v2264_v35 = vmul.f32 %v2136_v18, %v7015_v3  ;;  %v3793_v27 = vadd.f32 %v3792_v33, %v3552_v56  ;;  %5011 = vlog2.f32 %v1750_v22  ;;  %v3280_v40 = vmul.f32 %v7076_v23, %v7076_v23  ;;  %v7092_v3 = vld [vmem:[%s6687_s17 + $0xc8] sm:$0xff] }
 0x1c4   : > { %v2388_v30 = vadd.f32 %v2260_v49, %v724_v11  ;;  %4593 = vmatpush1.bf16.xpose.msra.mxu0 %v4592_v55  ;;  %v3136_v44 = vadd.f32 %v3135_v58, %v3009_v13  ;;  %5013 = vlog2.f32 %v1754_v26  ;;  %v3405_v45 = vadd.f32 %v3404_v31, %v3278_v29 }
 0x1c5   : > { %v7089_v2 = vadd.f32 %v2264_v35, %v728_v20  ;;  %v3556_v34 = vmul.f32 0.6931472, %v4994_v19  ;;  %v3283_v14 = vmul.f32 %v7083_v37, %v7083_v37  ;;  %v1107_v15 = vmax.f32 %v7026_v57, 0.0 }
 0x1c6   : > { %5015 = vpow2.f32 %v1519_v54  ;;  %v5004_v43 = vpop.eup %5003  ;;  %v7104_v5 = vadd.f32 %v3136_v44, %v7045_v61  ;;  %v1111_v31 = vmax.f32 %v7029_v6, 0.0  ;;  %v3406_v9 = vadd.f32 %v3405_v45, %v3279_v12  ;;  %v7132_v12 = vld [vmem:[%s6695_s1 + $0xe8] sm:$0xff]  ;;  %v7138_v44 = vld [vmem:[%s6687_s17 + $0xe0] sm:$0xff] }
 0x1c7   : > { %v4530_v52 = vpack.c.bf16 %v7089_v2, %v2388_v30  ;;  %v5006_v19 = vpop.eup %5005  ;;  %v1747_v51 = vadd.f32 1.0, %v5004_v43  ;;  %v1109_v58 = vmax.f32 %v7041_v36, 0.0  ;;  %v1244_v1 = vand.u32 2147483647, %v7092_v3 }
 0x1c8   : > { %v1248_v4 = vand.u32 2147483647, %v7095_v63  ;;  %v5008_v28 = vpop.eup %5007  ;;  %5017 = vlog2.f32 %v2132_v53  ;;  %v1751_v61 = vadd.f32 1.0, %v5006_v19  ;;  %v3282_v48 = vmul.f32 %v7101_v50, %v7101_v50 }
 0x1c9   : > { %4531 = vmatprep.subr.bf16.mxu1 %v4530_v52  ;;  %v3407_v47 = vadd.f32 %v3406_v9, %v3280_v40  ;;  %v3554_v60 = vmul.f32 0.6931472, %v5008_v28  ;;  %5019 = vlog2.f32 %v1747_v51  ;;  %v1372_v32 = vsub.f32 0.0, %v1244_v1  ;;  %v7135_v40 = vld [vmem:[%s6687_s17 + $0xc0] sm:$0xff]  ;;  %v7142_v52 = vld [vmem:[%s6695_s1 + $0xc0] sm:$0xff]  ;;  %v726_v1 = vld [vmem:[%s6678_s14 + $0x98] sm:$0xff] }
 0x1ca   : > { %v1376_v25 = vsub.f32 0.0, %v1248_v4  ;;  %5021 = vlog2.f32 %v1751_v61  ;;  %v1113_v56 = vmax.f32 %v7051_v38, 0.0  ;;  %v1246_v53 = vand.u32 2147483647, %v7109_v7 }
 0x1cb   : > { %v5010_v21 = vpop.eup %5009  ;;  %v3408_v41 = vadd.f32 %v3407_v47, %v7022_v16  ;;  %v3794_v29 = vadd.f32 %v3793_v27, %v3554_v60  ;;  %v1525_v62 = vmul.f32 1.442695, %v1372_v32  ;;  %5023 = vlog2.f32 %v2136_v18  ;;  %v7128_v16 = vld [vmem:[%s6695_s1 + $0xc8] sm:$0xff]  ;;  %v730_v47 = vld [vmem:[%s6678_s14 + $0xb8] sm:$0xff] }
 0x1cc   : > { %v1749_v39 = vadd.f32 1.0, %v5010_v21  ;;  %v1533_v11 = vmul.f32 1.442695, %v1376_v25  ;;  %v1250_v33 = vand.u32 2147483647, %v7117_v59  ;;  %v1374_v20 = vsub.f32 0.0, %v1246_v53 }
 0x1cd   : > { %v3409_v22 = vadd.f32 %v3408_v41, %v3282_v48  ;;  %v5012_v49 = vpop.eup %5011  ;;  %v7123_v26 = vadd.f32 %v3794_v29, %v3556_v34  ;;  %v7125_v54 = vmul.f32 %v2388_v30, %v2388_v30  ;;  %v1116_v55 = vmax.f32 %v7092_v3, 0.0 }
 0x1ce   : > { %5025 = vlog2.f32 %v1749_v39  ;;  %v5014_v13 = vpop.eup %5013  ;;  %v1898_v35 = vmul.f32 0.6931472, %v5012_v49  ;;  %v1378_v27 = vsub.f32 0.0, %v1250_v33  ;;  %v1120_v34 = vmax.f32 %v7095_v63, 0.0 }
 0x1cf   : > { %v3410_v18 = vadd.f32 %v3409_v22, %v3283_v14  ;;  %5027 = vpow2.f32 %v1525_v62  ;;  %v1906_v45 = vmul.f32 0.6931472, %v5014_v13  ;;  %v1529_v43 = vmul.f32 1.442695, %v1374_v20  ;;  %v723_v13 = vld [vmem:[%s6678_s14 + $0x80] sm:$0xff] }
 0x1d0   : > { %v5016_v30 = vpop.eup %5015  ;;  %5029 = vpow2.f32 %v1533_v11  ;;  %v7146_v14 = vmul.f32 %v7089_v2, %v7089_v2  ;;  %v2134_v9 = vadd.f32 %v1898_v35, %v1110_v8  ;;  %v3285_v51 = vmul.f32 %v7128_v16, %v7128_v16 }
 0x1d1   : > { %v1753_v19 = vadd.f32 1.0, %v5016_v30  ;;  %v2138_v4 = vadd.f32 %v1906_v45, %v1114_v46  ;;  %5031 = vpow2.f32 %v1529_v43  ;;  %v1537_v28 = vmul.f32 1.442695, %v1378_v27  ;;  %v727_v45 = vld [vmem:[%s6678_s14 + $0xa0] sm:$0xff] }
 0x1d2   : > { %v1243_v61 = vand.u32 2147483647, %v7135_v40  ;;  %v5018_v48 = vpop.eup %5017  ;;  %v2262_v2 = vmul.f32 %v2134_v9, %v7068_v10  ;;  %v7160_v24 = vmul.f32 %v7132_v12, %v7132_v12  ;;  %v1247_v8 = vand.u32 2147483647, %v7138_v44 }
 0x1d3   : > { %v3284_v60 = vmul.f32 %v7142_v52, %v7142_v52  ;;  %v5020_v32 = vpop.eup %5019  ;;  %v2266_v0 = vmul.f32 %v2138_v4, %v7083_v37  ;;  %5033 = vlog2.f32 %v2134_v9  ;;  %v1118_v46 = vmax.f32 %v7109_v7, 0.0  ;;  %v7181_v9 = vld [vmem:[%s6687_s17 + $0xd0] sm:$0xff]  ;;  %v7250_v7 = vld [vmem:[%s6687_s17 + $0x128] sm:$0xff] }
 0x1d4   : > { %v1371_v25 = vsub.f32 0.0, %v1243_v61  ;;  %v5022_v21 = vpop.eup %5021  ;;  %v2390_v41 = vadd.f32 %v2262_v2, %v726_v1  ;;  %v1892_v10 = vmul.f32 0.6931472, %v5020_v32  ;;  %5035 = vlog2.f32 %v1753_v19  ;;  %v7189_v61 = vld [vmem:[%s6695_s1 + $0xe0] sm:$0xff]  ;;  %v725_v2 = vld [vmem:[%s6678_s14 + $0x90] sm:$0xff] }
 0x1d5   : > { %v1375_v53 = vsub.f32 0.0, %v1247_v8  ;;  %v2394_v29 = vadd.f32 %v2266_v0, %v730_v47  ;;  %v1900_v39 = vmul.f32 0.6931472, %v5022_v21  ;;  %5037 = vpow2.f32 %v1537_v28  ;;  %v7167_v11 = vpop.eup %5023  ;;  %v7197_v32 = vld [vmem:[%s6687_s17 + $0xf0] sm:$0xff] }
 0x1d6   : > { %v1523_v62 = vmul.f32 1.442695, %v1371_v25  ;;  %5039 = vlog2.f32 %v2138_v4  ;;  %v2131_v37 = vadd.f32 %v1892_v10, %v1107_v15  ;;  %v3411_v33 = vadd.f32 %v3410_v18, %v3284_v60  ;;  %v7178_v15 = vld [vmem:[%s6695_s1 + $0xd8] sm:$0xff] }
 0x1d7   : > { %v1531_v22 = vmul.f32 1.442695, %v1375_v53  ;;  %v4594_v49 = vpack.c.bf16 %v2394_v29, %v2390_v41  ;;  %v2135_v35 = vadd.f32 %v1900_v39, %v1111_v31  ;;  %v1122_v27 = vmax.f32 %v7117_v59, 0.0 }
 0x1d8   : > { %v5026_v20 = vpop.eup %5025  ;;  %5041 = vpow2.f32 %v1523_v62  ;;  %v2259_v43 = vmul.f32 %v2131_v37, %v7034_v42  ;;  %v3412_v18 = vadd.f32 %v3411_v33, %v3285_v51  ;;  %v7183_v1 = vmul.f32 0.6931472, %v5018_v48 }
 0x1d9   : > { %v5028_v30 = vpop.eup %5027  ;;  %5043 = vlog2.f32 %v2131_v37  ;;  %v1896_v57 = vmul.f32 0.6931472, %v5026_v20  ;;  %4595 = vmatprep.subr.bf16.mxu0 %v4594_v49  ;;  %v2263_v6 = vmul.f32 %v2135_v35, %v7076_v23  ;;  %v3287_v48 = vmul.f32 %v7178_v15, %v7178_v15 }
 0x1da   : > { %v5030_v19 = vpop.eup %5029  ;;  %5045 = vlog2.f32 %v2135_v35  ;;  %v1756_v31 = vadd.f32 1.0, %v5028_v30  ;;  %v2387_v4 = vadd.f32 %v2259_v43, %v723_v13  ;;  %v1245_v23 = vand.u32 2147483647, %v7181_v9  ;;  %v7216_v43 = vld [vmem:[%s6695_s1 + $0xf0] sm:$0xff] }
 0x1db   : > { %v2133_v42 = vadd.f32 %v1896_v57, %v1109_v58  ;;  %v1760_v28 = vadd.f32 1.0, %v5030_v19  ;;  %5047 = vpow2.f32 %v1531_v22  ;;  %v5032_v51 = vpop.eup %5031  ;;  %v2391_v47 = vadd.f32 %v2263_v6, %v727_v45  ;;  %v7200_v58 = vld [vmem:[%s6695_s1 + $0xd0] sm:$0xff] }
 0x1dc   : > { %5049 = vlog2.f32 %v1756_v31  ;;  %v3011_v8 = vmul.f32 %v2387_v4, %v2387_v4  ;;  %v1758_v36 = vadd.f32 1.0, %v5032_v51  ;;  %v3014_v25 = vmul.f32 %v2390_v41, %v2390_v41 }
 0x1dd   : > { %v2261_v60 = vmul.f32 %v2133_v42, %v7061_v17  ;;  %5051 = vlog2.f32 %v2133_v42  ;;  %v5034_v0 = vpop.eup %5033  ;;  %v4532_v21 = vpack.c.bf16 %v2391_v47, %v2387_v4  ;;  %v3288_v10 = vmul.f32 %v7189_v61, %v7189_v61  ;;  %v729_v42 = vld [vmem:[%s6678_s14 + $0xb0] sm:$0xff] }
 0x1de   : > { %5053 = vlog2.f32 %v1760_v28  ;;  %v5036_v53 = vpop.eup %5035  ;;  %v7204_v39 = vmul.f32 %v2394_v29, %v2394_v29  ;;  %v3138_v62 = vadd.f32 %v7104_v5, %v3011_v8  ;;  %v1249_v33 = vand.u32 2147483647, %v7197_v32 }
 0x1df   : > { %v2389_v17 = vadd.f32 %v2261_v60, %v725_v2  ;;  %5055 = vlog2.f32 %v1758_v36  ;;  %v5038_v37 = vpop.eup %5037  ;;  %4533 = vmatpush1.bf16.xpose.msra.mxu1 %v4532_v21  ;;  %v1904_v22 = vmul.f32 0.6931472, %v5036_v53  ;;  %v1373_v41 = vsub.f32 0.0, %v1245_v23 }
 0x1e0   : > { %v3286_v20 = vmul.f32 %v7200_v58, %v7200_v58  ;;  %v7210_v49 = vpop.eup %5039  ;;  %v3564_v13 = vmul.f32 0.6931472, %v5034_v0  ;;  %v3139_v29 = vadd.f32 %v3138_v62, %v7125_v54  ;;  %v1762_v5 = vadd.f32 1.0, %v5038_v37 }
 0x1e1   : > { %v3013_v35 = vmul.f32 %v2389_v17, %v2389_v17  ;;  %v2137_v45 = vadd.f32 %v1904_v22, %v1113_v56  ;;  %v1377_v57 = vsub.f32 0.0, %v1249_v33  ;;  %v1527_v19 = vmul.f32 1.442695, %v1373_v41 }
 0x1e2   : > { %v5042_v30 = vpop.eup %5041  ;;  %v3413_v6 = vadd.f32 %v3412_v18, %v3286_v20  ;;  %v3015_v4 = vmul.f32 %v2391_v47, %v2391_v47  ;;  %5057 = vlog2.f32 %v1762_v5  ;;  %v3290_v56 = vmul.f32 %v7216_v43, %v7216_v43 }
 0x1e3   : > { %v5044_v31 = vpop.eup %5043  ;;  %v3140_v28 = vadd.f32 %v3139_v29, %v3013_v35  ;;  %v1755_v51 = vadd.f32 1.0, %v5042_v30  ;;  %v2265_v54 = vmul.f32 %v2137_v45, %v7101_v50  ;;  %5059 = vlog2.f32 %v2137_v45 }
 0x1e4   : > { %v5046_v2 = vpop.eup %5045  ;;  %v3558_v23 = vmul.f32 0.6931472, %v5044_v31  ;;  %v1535_v8 = vmul.f32 1.442695, %v1377_v57  ;;  %v3414_v36 = vadd.f32 %v3413_v6, %v3287_v48  ;;  %v994_v48 = vld [vmem:[%s6695_s1 + $0xf8] sm:$0xff]  ;;  %v7235_v6 = vld [vmem:[%s6687_s17 + $0x108] sm:$0xff] }
 0x1e5   : > { %v5048_v60 = vpop.eup %5047  ;;  %v3141_v38 = vadd.f32 %v3140_v28, %v3014_v25  ;;  %5061 = vlog2.f32 %v1755_v51  ;;  %v2393_v0 = vadd.f32 %v2265_v54, %v729_v42  ;;  %v3566_v30 = vmul.f32 0.6931472, %v5046_v2  ;;  %v732_v31 = vld [vmem:[%s6678_s14 + $0xc8] sm:$0xff] }
 0x1e6   : > { %v5050_v18 = vpop.eup %5049  ;;  %v3796_v47 = vadd.f32 %v7123_v26, %v3558_v23  ;;  %v1759_v21 = vadd.f32 1.0, %v5048_v60  ;;  %5063 = vpow2.f32 %v1527_v19  ;;  %v3415_v50 = vadd.f32 %v3414_v36, %v3288_v10  ;;  %v734_v60 = vld [vmem:[%s6678_s14 + $0xd8] sm:$0xff] }
 0x1e7   : > { %v5052_v53 = vpop.eup %5051  ;;  %v3142_v62 = vadd.f32 %v3141_v38, %v3015_v4  ;;  %v1910_v37 = vmul.f32 0.6931472, %v5050_v18  ;;  %5065 = vpow2.f32 %v1535_v8  ;;  %v4596_v33 = vpack.c.bf16 %v2393_v0, %v2389_v17  ;;  %v736_v4 = vld [vmem:[%s6678_s14 + $0xe8] sm:$0xff] }
 0x1e8   : > { %v5054_v22 = vpop.eup %5053  ;;  %v3797_v25 = vadd.f32 %v3796_v47, %v7183_v1  ;;  %v3017_v41 = vmul.f32 %v2393_v0, %v2393_v0  ;;  %v3562_v20 = vmul.f32 0.6931472, %v5052_v53  ;;  %5067 = vlog2.f32 %v1759_v21  ;;  %v738_v0 = vld [vmem:[%s6678_s14 + $0xf8] sm:$0xff] }
 0x1e9   : > { %v5056_v29 = vpop.eup %5055  ;;  %v3143_v35 = vadd.f32 %v3142_v62, %v7146_v14  ;;  %v1918_v26 = vmul.f32 0.6931472, %v5054_v22  ;;  %v2140_v5 = vadd.f32 %v1910_v37, %v1116_v55  ;;  %4597 = vmatpush1.bf16.xpose.msra.mxu0 %v4596_v33  ;;  %v3416_v1 = vadd.f32 %v3415_v50, %v7160_v24 }
 0x1ea   : > { %v3798_v10 = vadd.f32 %v3797_v25, %v3562_v20  ;;  %v1914_v45 = vmul.f32 0.6931472, %v5056_v29  ;;  %v3291_v19 = vmul.f32 %v994_v48, %v994_v48  ;;  %v3568_v3 = vmul.f32 0.6931472, %v7167_v11  ;;  %v731_v20 = vld [vmem:[%s6678_s14 + $0xc0] sm:$0xff] }
 0x1eb   : > { %v3144_v17 = vadd.f32 %v3143_v35, %v3017_v41  ;;  %v7231_v57 = vadd.f32 %v1918_v26, %v1120_v34  ;;  %v2268_v14 = vmul.f32 %v2140_v5, %v7128_v16  ;;  %v3417_v24 = vadd.f32 %v3416_v1, %v3290_v56 }
 0x1ec   : > { %v3799_v55 = vadd.f32 %v3798_v10, %v3564_v13  ;;  %v2142_v42 = vadd.f32 %v1914_v45, %v1118_v46  ;;  %v5058_v28 = vpop.eup %5057  ;;  %5069 = vlog2.f32 %v2140_v5  ;;  %v1115_v34 = vmax.f32 %v7135_v40, 0.0  ;;  %v735_v45 = vld [vmem:[%s6678_s14 + $0xe0] sm:$0xff] }
 0x1ed   : > { %v7243_v63 = vadd.f32 %v3144_v17, %v7204_v39  ;;  %v2272_v16 = vmul.f32 %v7231_v57, %v7132_v12  ;;  %v5060_v51 = vpop.eup %5059  ;;  %v1922_v13 = vmul.f32 0.6931472, %v5058_v28  ;;  %v1252_v46 = vand.u32 2147483647, %v7235_v6 }
 0x1ee   : > { %v3800_v11 = vadd.f32 %v3799_v55, %v3566_v30  ;;  %v2270_v2 = vmul.f32 %v2142_v42, %v7178_v15  ;;  %v3570_v54 = vmul.f32 0.6931472, %v5060_v51  ;;  %v2396_v39 = vadd.f32 %v2268_v14, %v732_v31  ;;  %v7278_v55 = vld [vmem:[%s6695_s1 + $0x108] sm:$0xff] }
 0x1ef   : > { %v5062_v23 = vpop.eup %5061  ;;  %v2400_v8 = vadd.f32 %v2272_v16, %v736_v4  ;;  %v7254_v38 = vadd.f32 %v3417_v24, %v3291_v19  ;;  %v3572_v40 = vmul.f32 0.6931472, %v7210_v49  ;;  %v2146_v36 = vadd.f32 %v1922_v13, %v1122_v27  ;;  %v7270_v19 = vld [vmem:[%s6687_s17 + $0x118] sm:$0xff]  ;;  %v7285_v16 = vld [vmem:[%s6695_s1 + $0x128] sm:$0xff] }
 0x1f0   : > { %v5064_v12 = vpop.eup %5063  ;;  %v3801_v56 = vadd.f32 %v3800_v11, %v3568_v3  ;;  %v1908_v15 = vmul.f32 0.6931472, %v5062_v23  ;;  %v1119_v21 = vmax.f32 %v7138_v44, 0.0  ;;  %v1256_v62 = vand.u32 2147483647, %v7250_v7  ;;  %v7273_v3 = vld [vmem:[%s6687_s17 + $0x138] sm:$0xff] }
 0x1f1   : > { %v5066_v18 = vpop.eup %5065  ;;  %v4534_v47 = vpack.c.bf16 %v2400_v8, %v2396_v39  ;;  %v1757_v53 = vadd.f32 1.0, %v5064_v12  ;;  %v2274_v50 = vmul.f32 %v2146_v36, %v994_v48  ;;  %v2398_v22 = vadd.f32 %v2270_v2, %v734_v60  ;;  %v7298_v2 = vld [vmem:[%s6695_s1 + $0x100] sm:$0xff]  ;;  %v7301_v60 = vld [vmem:[%s6687_s17 + $0x120] sm:$0xff] }
 0x1f2   : > { %v3802_v37 = vadd.f32 %v3801_v56, %v3570_v54  ;;  %5071 = vlog2.f32 %v2142_v42  ;;  %v5068_v25 = vpop.eup %5067  ;;  %v2139_v49 = vadd.f32 %v1908_v15, %v1115_v34  ;;  %v1761_v59 = vadd.f32 1.0, %v5066_v18  ;;  %v7290_v34 = vld [vmem:[%s6687_s17 + $0x100] sm:$0xff] }
 0x1f3   : > { %4535 = vmatprep.subr.bf16.mxu1 %v4534_v47  ;;  %5073 = vlog2.f32 %v1757_v53  ;;  %v1380_v27 = vsub.f32 0.0, %v1252_v46  ;;  %v2402_v41 = vadd.f32 %v2274_v50, %v738_v0  ;;  %v1916_v44 = vmul.f32 0.6931472, %v5068_v25 }
 0x1f4   : > { %v7262_v33 = vadd.f32 %v3802_v37, %v3572_v40  ;;  %v1384_v29 = vsub.f32 0.0, %v1256_v62  ;;  %v2267_v35 = vmul.f32 %v2139_v49, %v7142_v52  ;;  %5075 = vlog2.f32 %v2139_v49 }
 0x1f5   : > { %v1541_v48 = vmul.f32 1.442695, %v1380_v27  ;;  %v4598_v26 = vpack.c.bf16 %v2402_v41, %v2398_v22  ;;  %v2143_v5 = vadd.f32 %v1916_v44, %v1119_v21  ;;  %v1117_v30 = vmax.f32 %v7181_v9, 0.0  ;;  %v733_v27 = vld [vmem:[%s6678_s14 + $0xd0] sm:$0xff] }
 0x1f6   : > { %v5070_v10 = vpop.eup %5069  ;;  %v2395_v1 = vadd.f32 %v2267_v35, %v731_v20  ;;  %v1121_v17 = vmax.f32 %v7197_v32, 0.0  ;;  %5077 = vlog2.f32 %v1761_v59  ;;  %v1549_v14 = vmul.f32 1.442695, %v1384_v29  ;;  %v7347_v32 = vld [vmem:[%s6695_s1 + $0x138] sm:$0xff] }
 0x1f7   : > { %5079 = vlog2.f32 %v7231_v57  ;;  %4599 = vmatprep.subr.bf16.mxu0 %v4598_v26  ;;  %v2271_v52 = vmul.f32 %v2143_v5, %v7189_v61  ;;  %v1124_v9 = vmax.f32 %v7235_v6, 0.0  ;;  %v1128_v31 = vmax.f32 %v7250_v7, 0.0 }
 0x1f8   : > { %v3020_v4 = vmul.f32 %v2396_v39, %v2396_v39  ;;  %v7282_v42 = vmul.f32 %v2400_v8, %v2400_v8  ;;  %v3019_v24 = vmul.f32 %v2395_v1, %v2395_v1  ;;  %5081 = vpow2.f32 %v1541_v48 }
 0x1f9   : > { %v2399_v28 = vadd.f32 %v2271_v52, %v735_v45  ;;  %5083 = vpow2.f32 %v1549_v14  ;;  %v1254_v57 = vand.u32 2147483647, %v7270_v19  ;;  %v1258_v61 = vand.u32 2147483647, %v7273_v3  ;;  %v7333_v14 = vld [vmem:[%s6695_s1 + $0x110] sm:$0xff] }
 0x1fa   : > { %v7292_v51 = vmul.f32 %v2398_v22, %v2398_v22  ;;  %5085 = vlog2.f32 %v2146_v36  ;;  %v3146_v11 = vadd.f32 %v7243_v63, %v3019_v24  ;;  %v3293_v13 = vmul.f32 %v7278_v55, %v7278_v55  ;;  %v7310_v63 = vld [vmem:[%s6695_s1 + $0x118] sm:$0xff] }
 0x1fb   : > { %v3576_v23 = vmul.f32 0.6931472, %v5070_v10  ;;  %v4536_v54 = vpack.c.bf16 %v2399_v28, %v2395_v1  ;;  %v1382_v39 = vsub.f32 0.0, %v1254_v57  ;;  %v1386_v8 = vsub.f32 0.0, %v1258_v61  ;;  %v7338_v57 = vld [vmem:[%s6695_s1 + $0x120] sm:$0xff] }
 0x1fc   : > { %v5072_v46 = vpop.eup %5071  ;;  %v7303_v40 = vmul.f32 %v2402_v41, %v2402_v41  ;;  %v3147_v56 = vadd.f32 %v3146_v11, %v3020_v4  ;;  %v7307_v36 = vmul.f32 %v7285_v16, %v7285_v16  ;;  %v1251_v15 = vand.u32 2147483647, %v7290_v34  ;;  %v737_v11 = vld [vmem:[%s6678_s14 + $0xf0] sm:$0xff] }
 0x1fd   : > { %v5074_v12 = vpop.eup %5073  ;;  %4537 = vmatpush1.bf16.xpose.msra.mxu1 %v4536_v54  ;;  %v1545_v47 = vmul.f32 1.442695, %v1382_v39  ;;  %v1553_v0 = vmul.f32 1.442695, %v1386_v8  ;;  %v3292_v21 = vmul.f32 %v7298_v2, %v7298_v2  ;;  %v7315_v62 = vmul.f32 0.6931472, %v5072_v46 }
 0x1fe   : > { %v1912_v18 = vmul.f32 0.6931472, %v5074_v12  ;;  %v5076_v53 = vpop.eup %5075  ;;  %5087 = vlog2.f32 %v2143_v5  ;;  %v1255_v37 = vand.u32 2147483647, %v7301_v60  ;;  %v1379_v50 = vsub.f32 0.0, %v1251_v15  ;;  %v7330_v5 = vld [vmem:[%s6687_s17 + $0x130] sm:$0xff] }
 0x1ff   : > { %v3574_v22 = vmul.f32 0.6931472, %v5076_v53  ;;  %5089 = vpow2.f32 %v1545_v47  ;;  %v3419_v49 = vadd.f32 %v7254_v38, %v3292_v21  ;;  %v3295_v41 = vmul.f32 %v7310_v63, %v7310_v63  ;;  %v7327_v38 = vld [vmem:[%s6687_s17 + $0x110] sm:$0xff]  ;;  %v7360_v21 = vld [vmem:[%s6687_s17 + $0x168] sm:$0xff] }
 0x200   : > { %v2141_v25 = vadd.f32 %v1912_v18, %v1117_v30  ;;  %v5078_v59 = vpop.eup %5077  ;;  %5091 = vpow2.f32 %v1553_v0  ;;  %v1383_v20 = vsub.f32 0.0, %v1255_v37  ;;  %v1539_v44 = vmul.f32 1.442695, %v1379_v50 }
 0x201   : > { %v7322_v29 = vpop.eup %5079  ;;  %v3804_v35 = vadd.f32 %v7262_v33, %v3574_v22  ;;  %v1920_v48 = vmul.f32 0.6931472, %v5078_v59  ;;  %v3023_v10 = vmul.f32 %v2399_v28, %v2399_v28  ;;  %v3420_v1 = vadd.f32 %v3419_v49, %v3293_v13 }
 0x202   : > { %v2269_v26 = vmul.f32 %v2141_v25, %v7200_v58  ;;  %5093 = vlog2.f32 %v2141_v25  ;;  %v5082_v30 = vpop.eup %5081  ;;  %v1547_v45 = vmul.f32 1.442695, %v1383_v20  ;;  %v1253_v13 = vand.u32 2147483647, %v7327_v38 }
 0x203   : > { %5095 = vpow2.f32 %v1539_v44  ;;  %v5084_v52 = vpop.eup %5083  ;;  %v3805_v33 = vadd.f32 %v3804_v35, %v3576_v23  ;;  %v2145_v58 = vadd.f32 %v1920_v48, %v1121_v17  ;;  %v1764_v24 = vadd.f32 1.0, %v5082_v30  ;;  %v7350_v17 = vld [vmem:[%s6695_s1 + $0x130] sm:$0xff] }
 0x204   : > { %v2397_v4 = vadd.f32 %v2269_v26, %v733_v27  ;;  %v7340_v61 = vpop.eup %5085  ;;  %v1768_v28 = vadd.f32 1.0, %v5084_v52  ;;  %5097 = vpow2.f32 %v1547_v45  ;;  %v1257_v46 = vand.u32 2147483647, %v7330_v5 }
 0x205   : > { %v2273_v23 = vmul.f32 %v2145_v58, %v7216_v43  ;;  %5099 = vlog2.f32 %v2145_v58  ;;  %v3294_v39 = vmul.f32 %v7333_v14, %v7333_v14  ;;  %v3296_v8 = vmul.f32 %v7338_v57, %v7338_v57  ;;  %v7357_v43 = vld [vmem:[%s6687_s17 + $0x148] sm:$0xff] }
 0x206   : > { %v3021_v54 = vmul.f32 %v2397_v4, %v2397_v4  ;;  %5101 = vlog2.f32 %v1764_v24  ;;  %v1381_v12 = vsub.f32 0.0, %v1253_v13  ;;  %v1385_v15 = vsub.f32 0.0, %v1257_v46 }
 0x207   : > { %v2401_v18 = vadd.f32 %v2273_v23, %v737_v11  ;;  %5103 = vlog2.f32 %v1768_v28  ;;  %v3421_v0 = vadd.f32 %v3420_v1, %v3294_v39  ;;  %v3299_v37 = vmul.f32 %v7347_v32, %v7347_v32 }
 0x208   : > { %v3148_v47 = vadd.f32 %v3147_v56, %v3021_v54  ;;  %v5088_v53 = vpop.eup %5087  ;;  %v1543_v50 = vmul.f32 1.442695, %v1381_v12  ;;  %v1551_v22 = vmul.f32 1.442695, %v1385_v15  ;;  %v3298_v25 = vmul.f32 %v7350_v17, %v7350_v17 }
 0x209   : > { %v5090_v49 = vpop.eup %5089  ;;  %v4600_v59 = vpack.c.bf16 %v2401_v18, %v2397_v4  ;;  %v3025_v27 = vmul.f32 %v2401_v18, %v2401_v18  ;;  %v3422_v20 = vadd.f32 %v3421_v0, %v3295_v41  ;;  %v1260_v48 = vand.u32 2147483647, %v7357_v43 }
 0x20a   : > { %v3149_v56 = vadd.f32 %v3148_v47, %v7292_v51  ;;  %v5092_v44 = vpop.eup %5091  ;;  %v1766_v35 = vadd.f32 1.0, %v5090_v49  ;;  %5105 = vpow2.f32 %v1543_v50  ;;  %v1264_v26 = vand.u32 2147483647, %v7360_v21 }
 0x20b   : > { %4601 = vmatpush1.bf16.xpose.msra.mxu0 %v4600_v59  ;;  %v1770_v1 = vadd.f32 1.0, %v5092_v44  ;;  %5107 = vpow2.f32 %v1551_v22  ;;  %v3423_v52 = vadd.f32 %v3422_v20, %v3296_v8  ;;  %v1388_v4 = vsub.f32 0.0, %v1260_v48 }
 0x20c   : > { %v5094_v30 = vpop.eup %5093  ;;  %v3150_v45 = vadd.f32 %v3149_v56, %v3023_v10  ;;  %5109 = vlog2.f32 %v1766_v35  ;;  %v1392_v11 = vsub.f32 0.0, %v1264_v26  ;;  %v3582_v46 = vmul.f32 0.6931472, %v5088_v53  ;;  %v740_v56 = vld [vmem:[%s6678_s14 + $0x108] sm:$0xff] }
 0x20d   : > { %v5096_v58 = vpop.eup %5095  ;;  %v3578_v24 = vmul.f32 0.6931472, %v5094_v30  ;;  %5111 = vlog2.f32 %v1770_v1  ;;  %v3424_v28 = vadd.f32 %v3423_v52, %v7307_v36  ;;  %v1557_v54 = vmul.f32 1.442695, %v1388_v4 }
 0x20e   : > { %v3151_v51 = vadd.f32 %v3150_v45, %v7282_v42  ;;  %v1763_v41 = vadd.f32 1.0, %v5096_v58  ;;  %v5098_v13 = vpop.eup %5097  ;;  %v1565_v39 = vmul.f32 1.442695, %v1392_v11  ;;  %v3584_v47 = vmul.f32 0.6931472, %v7322_v29  ;;  %v7380_v29 = vld [vmem:[%s6687_s17 + $0x158] sm:$0xff] }
 0x20f   : > { %v3806_v23 = vadd.f32 %v3805_v33, %v3578_v24  ;;  %v5100_v10 = vpop.eup %5099  ;;  %v1767_v15 = vadd.f32 1.0, %v5098_v13  ;;  %v3425_v8 = vadd.f32 %v3424_v28, %v3298_v25  ;;  %v1126_v0 = vmax.f32 %v7270_v19, 0.0  ;;  %v7404_v45 = vld [vmem:[%s6695_s1 + $0x148] sm:$0xff] }
 0x210   : > { %v3152_v12 = vadd.f32 %v3151_v51, %v3025_v27  ;;  %5113 = vlog2.f32 %v1763_v41  ;;  %v5102_v18 = vpop.eup %5101  ;;  %v3586_v22 = vmul.f32 0.6931472, %v5100_v10  ;;  %v3588_v19 = vmul.f32 0.6931472, %v7340_v61  ;;  %v7395_v61 = vld [vmem:[%s6687_s17 + $0x178] sm:$0xff] }
 0x211   : > { %v3807_v42 = vadd.f32 %v3806_v23, %v7315_v62  ;;  %5115 = vpow2.f32 %v1557_v54  ;;  %v5104_v36 = vpop.eup %5103  ;;  %v1926_v53 = vmul.f32 0.6931472, %v5102_v18  ;;  %v7377_v50 = vadd.f32 %v3425_v8, %v3299_v37  ;;  %v742_v10 = vld [vmem:[%s6678_s14 + $0x118] sm:$0xff] }
 0x212   : > { %v7375_v33 = vadd.f32 %v3152_v12, %v7303_v40  ;;  %5117 = vlog2.f32 %v1767_v15  ;;  %v1934_v49 = vmul.f32 0.6931472, %v5104_v36  ;;  %v1130_v40 = vmax.f32 %v7273_v3, 0.0 }
 0x213   : > { %v3808_v25 = vadd.f32 %v3807_v42, %v3582_v46  ;;  %5119 = vpow2.f32 %v1565_v39  ;;  %v2148_v62 = vadd.f32 %v1926_v53, %v1124_v9  ;;  %v1123_v59 = vmax.f32 %v7290_v34, 0.0  ;;  %v744_v9 = vld [vmem:[%s6678_s14 + $0x128] sm:$0xff] }
 0x214   : > { %v5106_v27 = vpop.eup %5105  ;;  %v7390_v20 = vadd.f32 %v1934_v49, %v1128_v31  ;;  %v1127_v44 = vmax.f32 %v7301_v60, 0.0  ;;  %v1125_v35 = vmax.f32 %v7327_v38, 0.0  ;;  %v1129_v34 = vmax.f32 %v7330_v5, 0.0 }
 0x215   : > { %v3809_v37 = vadd.f32 %v3808_v25, %v3584_v47  ;;  %v5108_v6 = vpop.eup %5107  ;;  %v2276_v3 = vmul.f32 %v2148_v62, %v7278_v55  ;;  %v1765_v48 = vadd.f32 1.0, %v5106_v27  ;;  %v1262_v26 = vand.u32 2147483647, %v7380_v29  ;;  %v7408_v55 = vld [vmem:[%s6695_s1 + $0x168] sm:$0xff]  ;;  %v746_v47 = vld [vmem:[%s6678_s14 + $0x138] sm:$0xff]  ;;  %v7437_v27 = vld [vmem:[%s6687_s17 + $0x160] sm:$0xff] }
 0x216   : > { %v5110_v30 = vpop.eup %5109  ;;  %v2280_v31 = vmul.f32 %v7390_v20, %v7285_v16  ;;  %v1769_v60 = vadd.f32 1.0, %v5108_v6  ;;  %v1132_v1 = vmax.f32 %v7357_v43, 0.0  ;;  %v1266_v4 = vand.u32 2147483647, %v7395_v61 }
 0x217   : > { %v3810_v7 = vadd.f32 %v3809_v37, %v3586_v22  ;;  %v5112_v52 = vpop.eup %5111  ;;  %v2404_v58 = vadd.f32 %v2276_v3, %v740_v56  ;;  %v1930_v24 = vmul.f32 0.6931472, %v5110_v30  ;;  %5121 = vlog2.f32 %v1765_v48  ;;  %v743_v3 = vld [vmem:[%s6678_s14 + $0x120] sm:$0xff] }
 0x218   : > { %v7413_v51 = vadd.f32 %v2280_v31, %v744_v9  ;;  %v1938_v16 = vmul.f32 0.6931472, %v5112_v52  ;;  %5123 = vlog2.f32 %v1769_v60  ;;  %v1136_v13 = vmax.f32 %v7360_v21, 0.0  ;;  %v739_v9 = vld [vmem:[%s6678_s14 + $0x100] sm:$0xff] }
 0x219   : > { %v7411_v11 = vadd.f32 %v3810_v7, %v3588_v19  ;;  %v2150_v28 = vadd.f32 %v1930_v24, %v1126_v0  ;;  %v7418_v46 = vmul.f32 %v7404_v45, %v7404_v45  ;;  %v1390_v23 = vsub.f32 0.0, %v1262_v26 }
 0x21a   : > { %v5114_v41 = vpop.eup %5113  ;;  %v4538_v39 = vpack.c.bf16 %v7413_v51, %v2404_v58  ;;  %v7422_v12 = vadd.f32 %v1938_v16, %v1130_v40  ;;  %v7426_v8 = vmul.f32 %v7408_v55, %v7408_v55  ;;  %v1134_v36 = vmax.f32 %v7380_v29, 0.0  ;;  %v7434_v40 = vld [vmem:[%s6687_s17 + $0x140] sm:$0xff] }
 0x21b   : > { %v5116_v54 = vpop.eup %5115  ;;  %v1924_v15 = vmul.f32 0.6931472, %v5114_v41  ;;  %v2278_v42 = vmul.f32 %v2150_v28, %v7310_v63  ;;  %v1394_v53 = vsub.f32 0.0, %v1266_v4  ;;  %5125 = vlog2.f32 %v2148_v62 }
 0x21c   : > { %v5118_v18 = vpop.eup %5117  ;;  %v1772_v0 = vadd.f32 1.0, %v5116_v54  ;;  %4539 = vmatprep.subr.bf16.mxu1 %v4538_v39  ;;  %v2282_v25 = vmul.f32 %v7422_v12, %v7347_v32  ;;  %v1561_v56 = vmul.f32 1.442695, %v1390_v23  ;;  %v1263_v26 = vand.u32 2147483647, %v7437_v27  ;;  %v7454_v54 = vld [vmem:[%s6695_s1 + $0x158] sm:$0xff] }
 0x21d   : > { %v5120_v22 = vpop.eup %5119  ;;  %v1932_v49 = vmul.f32 0.6931472, %v5118_v18  ;;  %v2147_v19 = vadd.f32 %v1924_v15, %v1123_v59  ;;  %v2406_v37 = vadd.f32 %v2278_v42, %v742_v10  ;;  %v1569_v32 = vmul.f32 1.442695, %v1394_v53  ;;  %v7457_v39 = vld [vmem:[%s6695_s1 + $0x178] sm:$0xff] }
 0x21e   : > { %v1776_v63 = vadd.f32 1.0, %v5120_v22  ;;  %5127 = vlog2.f32 %v1772_v0  ;;  %v7439_v6 = vadd.f32 %v2282_v25, %v746_v47  ;;  %v1259_v59 = vand.u32 2147483647, %v7434_v40  ;;  %v741_v47 = vld [vmem:[%s6678_s14 + $0x110] sm:$0xff] }
 0x21f   : > { %v2151_v48 = vadd.f32 %v1932_v49, %v1127_v44  ;;  %v2275_v62 = vmul.f32 %v2147_v19, %v7298_v2  ;;  %5129 = vlog2.f32 %v2147_v19  ;;  %v1138_v31 = vmax.f32 %v7395_v61, 0.0  ;;  %v745_v22 = vld [vmem:[%s6678_s14 + $0x130] sm:$0xff] }
 0x220   : > { %5131 = vlog2.f32 %v1776_v63  ;;  %v4602_v30 = vpack.c.bf16 %v7439_v6, %v2406_v37  ;;  %v3028_v2 = vmul.f32 %v2404_v58, %v2404_v58  ;;  %v1387_v52 = vsub.f32 0.0, %v1259_v59  ;;  %v7573_v61 = vld [vmem:[%s6695_s1 + $0x1a8] sm:$0xff] }
 0x221   : > { %5133 = vlog2.f32 %v7390_v20  ;;  %v2279_v7 = vmul.f32 %v2151_v48, %v7338_v57  ;;  %v5122_v44 = vpop.eup %5121  ;;  %v2403_v60 = vadd.f32 %v2275_v62, %v739_v9  ;;  %v7451_v20 = vld [vmem:[%s6695_s1 + $0x140] sm:$0xff]  ;;  %v1391_v41 = vsub.f32 0.0, %v1263_v26 }
 0x222   : > { %5135 = vlog2.f32 %v2150_v28  ;;  %v5124_v24 = vpop.eup %5123  ;;  %4603 = vmatprep.subr.bf16.mxu0 %v4602_v30  ;;  %v1928_v16 = vmul.f32 0.6931472, %v5122_v44  ;;  %v1555_v58 = vmul.f32 1.442695, %v1387_v52  ;;  %v3300_v0 = vmul.f32 %v7451_v20, %v7451_v20 }
 0x223   : > { %v2407_v4 = vadd.f32 %v2279_v7, %v743_v3  ;;  %5137 = vpow2.f32 %v1561_v56  ;;  %v3027_v23 = vmul.f32 %v2403_v60, %v2403_v60  ;;  %v1936_v57 = vmul.f32 0.6931472, %v5124_v24  ;;  %v7482_v3 = vld [vmem:[%s6687_s17 + $0x150] sm:$0xff] }
 0x224   : > { %5139 = vpow2.f32 %v1569_v32  ;;  %v2149_v10 = vadd.f32 %v1928_v16, %v1125_v35  ;;  %v1563_v15 = vmul.f32 1.442695, %v1391_v41  ;;  %v7471_v38 = vmul.f32 %v7454_v54, %v7454_v54  ;;  %v7490_v7 = vld [vmem:[%s6687_s17 + $0x170] sm:$0xff] }
 0x225   : > { %v4540_v28 = vpack.c.bf16 %v2407_v4, %v2403_v60  ;;  %5141 = vlog2.f32 %v2151_v48  ;;  %v3154_v18 = vadd.f32 %v7375_v33, %v3027_v23  ;;  %v2153_v42 = vadd.f32 %v1936_v57, %v1129_v34  ;;  %v5126_v53 = vpop.eup %5125  ;;  %v748_v23 = vld [vmem:[%s6678_s14 + $0x148] sm:$0xff] }
 0x226   : > { %5143 = vpow2.f32 %v1555_v58  ;;  %v2277_v25 = vmul.f32 %v2149_v10, %v7333_v14  ;;  %v7475_v33 = vmul.f32 %v7457_v39, %v7457_v39  ;;  %v3032_v35 = vmul.f32 %v7413_v51, %v7413_v51 }
 0x227   : > { %4541 = vmatpush1.bf16.xpose.msra.mxu1 %v4540_v28  ;;  %5145 = vlog2.f32 %v2149_v10  ;;  %v3030_v34 = vmul.f32 %v2406_v37, %v2406_v37  ;;  %v3155_v49 = vadd.f32 %v3154_v18, %v3028_v2  ;;  %v2281_v19 = vmul.f32 %v2153_v42, %v7350_v17 }
 0x228   : > { %v5128_v5 = vpop.eup %5127  ;;  %v2405_v14 = vadd.f32 %v2277_v25, %v741_v47  ;;  %5147 = vpow2.f32 %v1563_v15  ;;  %v3427_v9 = vadd.f32 %v7377_v50, %v3300_v0  ;;  %v3592_v62 = vmul.f32 0.6931472, %v5126_v53 }
 0x229   : > { %v5130_v63 = vpop.eup %5129  ;;  %v1942_v56 = vmul.f32 0.6931472, %v5128_v5  ;;  %v2409_v59 = vadd.f32 %v2281_v19, %v745_v22  ;;  %5149 = vlog2.f32 %v2153_v42  ;;  %v1261_v60 = vand.u32 2147483647, %v7482_v3  ;;  %v7512_v5 = vld [vmem:[%s6695_s1 + $0x150] sm:$0xff] }
 0x22a   : > { %v5132_v48 = vpop.eup %5131  ;;  %v3590_v32 = vmul.f32 0.6931472, %v5130_v63  ;;  %v3029_v51 = vmul.f32 %v2405_v14, %v2405_v14  ;;  %v3428_v30 = vadd.f32 %v3427_v9, %v7418_v46  ;;  %5151 = vlog2.f32 %v7422_v12  ;;  %v752_v12 = vld [vmem:[%s6678_s14 + $0x168] sm:$0xff] }
 0x22b   : > { %v5134_v26 = vpop.eup %5133  ;;  %v1950_v37 = vmul.f32 0.6931472, %v5132_v48  ;;  %v7486_v17 = vadd.f32 %v1942_v56, %v1132_v1  ;;  %v4604_v2 = vpack.c.bf16 %v2409_v59, %v2405_v14  ;;  %v3031_v24 = vmul.f32 %v2407_v4, %v2407_v4  ;;  %v7516_v56 = vld [vmem:[%s6695_s1 + $0x160] sm:$0xff] }
 0x22c   : > { %v5136_v50 = vpop.eup %5135  ;;  %v3812_v44 = vadd.f32 %v7411_v11, %v3590_v32  ;;  %v3156_v16 = vadd.f32 %v3155_v49, %v3029_v51  ;;  %v1131_v11 = vmax.f32 %v7434_v40, 0.0  ;;  %v1265_v58 = vand.u32 2147483647, %v7490_v7  ;;  %v7521_v51 = vld [vmem:[%s6687_s17 + $0x188] sm:$0xff] }
 0x22d   : > { %v5138_v52 = vpop.eup %5137  ;;  %v7497_v43 = vadd.f32 %v1950_v37, %v1136_v13  ;;  %v2284_v1 = vmul.f32 %v7486_v17, %v7404_v45  ;;  %4605 = vmatpush1.bf16.xpose.msra.mxu0 %v4604_v2  ;;  %v3034_v21 = vmul.f32 %v7439_v6, %v7439_v6  ;;  %v3033_v13 = vmul.f32 %v2409_v59, %v2409_v59  ;;  %v7524_v37 = vld [vmem:[%s6687_s17 + $0x1a8] sm:$0xff] }
 0x22e   : > { %v5140_v46 = vpop.eup %5139  ;;  %v3813_v41 = vadd.f32 %v3812_v44, %v3592_v62  ;;  %v1774_v57 = vadd.f32 1.0, %v5138_v52  ;;  %v3157_v28 = vadd.f32 %v3156_v16, %v3030_v34  ;;  %v1389_v18 = vsub.f32 0.0, %v1261_v60 }
 0x22f   : > { %v5142_v4 = vpop.eup %5141  ;;  %v2288_v45 = vmul.f32 %v7497_v43, %v7408_v55  ;;  %v1778_v15 = vadd.f32 1.0, %v5140_v46  ;;  %v1393_v47 = vsub.f32 0.0, %v1265_v58  ;;  %v2412_v53 = vadd.f32 %v2284_v1, %v748_v23  ;;  %v7532_v1 = vld [vmem:[%s6695_s1 + $0x170] sm:$0xff] }
 0x230   : > { %v5144_v10 = vpop.eup %5143  ;;  %5153 = vlog2.f32 %v1774_v57  ;;  %v3158_v0 = vadd.f32 %v3157_v28, %v3031_v24  ;;  %v3596_v6 = vmul.f32 0.6931472, %v5136_v50  ;;  %v1559_v55 = vmul.f32 1.442695, %v1389_v18  ;;  %v7539_v57 = vld [vmem:[%s6687_s17 + $0x198] sm:$0xff] }
 0x231   : > { %v5146_v42 = vpop.eup %5145  ;;  %v7509_v22 = vadd.f32 %v2288_v45, %v752_v12  ;;  %v1771_v25 = vadd.f32 1.0, %v5144_v10  ;;  %5155 = vlog2.f32 %v1778_v15  ;;  %v3598_v19 = vmul.f32 0.6931472, %v5142_v4 }
 0x232   : > { %v3594_v34 = vmul.f32 0.6931472, %v5146_v42  ;;  %v5148_v49 = vpop.eup %5147  ;;  %v3159_v63 = vadd.f32 %v3158_v0, %v3032_v35  ;;  %v1567_v9 = vmul.f32 1.442695, %v1393_v47  ;;  %v3302_v59 = vmul.f32 %v7512_v5, %v7512_v5 }
 0x233   : > { %v4542_v14 = vpack.c.bf16 %v7509_v22, %v2412_v53  ;;  %v5150_v48 = vpop.eup %5149  ;;  %v1775_v32 = vadd.f32 1.0, %v5148_v49  ;;  %5157 = vlog2.f32 %v1771_v25  ;;  %v3600_v50 = vmul.f32 0.6931472, %v5134_v26 }
 0x234   : > { %v3814_v62 = vadd.f32 %v3813_v41, %v3594_v34  ;;  %v3160_v44 = vadd.f32 %v3159_v63, %v3033_v13  ;;  %v1135_v35 = vmax.f32 %v7437_v27, 0.0  ;;  %5159 = vpow2.f32 %v1559_v55  ;;  %v5152_v2 = vpop.eup %5151  ;;  %v7543_v13 = vld [vmem:[%s6687_s17 + $0x1b8] sm:$0xff]  ;;  %v7603_v27 = vld [vmem:[%s6695_s1 + $0x180] sm:$0xff] }
 0x235   : > { %4543 = vmatprep.subr.bf16.mxu1 %v4542_v14  ;;  %5161 = vlog2.f32 %v1775_v32  ;;  %v3304_v52 = vmul.f32 %v7516_v56, %v7516_v56  ;;  %v3429_v24 = vadd.f32 %v3428_v30, %v3302_v59  ;;  %v1268_v26 = vand.u32 2147483647, %v7521_v51  ;;  %v754_v59 = vld [vmem:[%s6678_s14 + $0x178] sm:$0xff] }
 0x236   : > { %v3815_v60 = vadd.f32 %v3814_v62, %v3596_v6  ;;  %v7529_v16 = vadd.f32 %v3160_v44, %v3034_v21  ;;  %5163 = vpow2.f32 %v1567_v9  ;;  %v1272_v46 = vand.u32 2147483647, %v7524_v37 }
 0x237   : > { %v3602_v41 = vmul.f32 0.6931472, %v5150_v48  ;;  %5165 = vlog2.f32 %v7486_v17  ;;  %v3430_v12 = vadd.f32 %v3429_v24, %v7471_v38  ;;  %v3604_v58 = vmul.f32 0.6931472, %v5152_v2 }
 0x238   : > { %v3816_v23 = vadd.f32 %v3815_v60, %v3598_v19  ;;  %v1133_v30 = vmax.f32 %v7482_v3, 0.0  ;;  %v1396_v4 = vsub.f32 0.0, %v1268_v26  ;;  %v1400_v21 = vsub.f32 0.0, %v1272_v46  ;;  %v7570_v26 = vld [vmem:[%s6695_s1 + $0x188] sm:$0xff] }
 0x239   : > { %v1137_v10 = vmax.f32 %v7490_v7, 0.0  ;;  %v3306_v15 = vmul.f32 %v7532_v1, %v7532_v1  ;;  %v3431_v18 = vadd.f32 %v3430_v12, %v3304_v52  ;;  %5167 = vlog2.f32 %v7497_v43  ;;  %v747_v12 = vld [vmem:[%s6678_s14 + $0x140] sm:$0xff] }
 0x23a   : > { %v5154_v28 = vpop.eup %5153  ;;  %v3817_v45 = vadd.f32 %v3816_v23, %v3600_v50  ;;  %v1573_v17 = vmul.f32 1.442695, %v1396_v4  ;;  %v1581_v47 = vmul.f32 1.442695, %v1400_v21  ;;  %v1270_v6 = vand.u32 2147483647, %v7539_v57 }
 0x23b   : > { %v1946_v38 = vmul.f32 0.6931472, %v5154_v28  ;;  %v5156_v42 = vpop.eup %5155  ;;  %v3432_v25 = vadd.f32 %v3431_v18, %v7426_v8  ;;  %v1274_v34 = vand.u32 2147483647, %v7543_v13  ;;  %v7552_v55 = vmul.f32 %v2412_v53, %v2412_v53  ;;  %v750_v53 = vld [vmem:[%s6678_s14 + $0x158] sm:$0xff]  ;;  %v7589_v21 = vld [vmem:[%s6687_s17 + $0x180] sm:$0xff] }
 0x23c   : > { %v3818_v0 = vadd.f32 %v3817_v45, %v3602_v41  ;;  %v1954_v49 = vmul.f32 0.6931472, %v5156_v42  ;;  %5169 = vpow2.f32 %v1573_v17  ;;  %v1398_v9 = vsub.f32 0.0, %v1270_v6  ;;  %v7592_v28 = vld [vmem:[%s6687_s17 + $0x1a0] sm:$0xff] }
 0x23d   : > { %v2158_v19 = vadd.f32 %v1946_v38, %v1134_v36  ;;  %v5158_v43 = vpop.eup %5157  ;;  %v3433_v14 = vadd.f32 %v3432_v25, %v3306_v15  ;;  %5171 = vpow2.f32 %v1581_v47  ;;  %v7560_v48 = vmul.f32 %v7509_v22, %v7509_v22  ;;  %v751_v45 = vld [vmem:[%s6678_s14 + $0x160] sm:$0xff] }
 0x23e   : > { %v7556_v63 = vadd.f32 %v3818_v0, %v3604_v58  ;;  %v5160_v8 = vpop.eup %5159  ;;  %v2162_v62 = vadd.f32 %v1954_v49, %v1138_v31  ;;  %v1940_v36 = vmul.f32 0.6931472, %v5158_v43  ;;  %v1402_v2 = vsub.f32 0.0, %v1274_v34 }
 0x23f   : > { %v2286_v29 = vmul.f32 %v2158_v19, %v7454_v54  ;;  %v5162_v32 = vpop.eup %5161  ;;  %v1773_v50 = vadd.f32 1.0, %v5160_v8  ;;  %v3434_v44 = vadd.f32 %v3433_v14, %v7475_v33  ;;  %v1577_v60 = vmul.f32 1.442695, %v1398_v9 }
 0x240   : > { %v5164_v52 = vpop.eup %5163  ;;  %v2290_v24 = vmul.f32 %v2162_v62, %v7457_v39  ;;  %v1948_v22 = vmul.f32 0.6931472, %v5162_v32  ;;  %v1140_v31 = vmax.f32 %v7521_v51, 0.0  ;;  %v1144_v54 = vmax.f32 %v7524_v37, 0.0 }
 0x241   : > { %v5166_v46 = vpop.eup %5165  ;;  %v7577_v33 = vadd.f32 %v2286_v29, %v750_v53  ;;  %v2155_v41 = vadd.f32 %v1940_v36, %v1131_v11  ;;  %v1777_v39 = vadd.f32 1.0, %v5164_v52  ;;  %5173 = vlog2.f32 %v1773_v50  ;;  %v7617_v53 = vld [vmem:[%s6695_s1 + $0x198] sm:$0xff] }
 0x242   : > { %v7581_v23 = vadd.f32 %v2290_v24, %v754_v59  ;;  %v7586_v58 = vadd.f32 %v1948_v22, %v1135_v35  ;;  %5175 = vpow2.f32 %v1577_v60  ;;  %v1585_v4 = vmul.f32 1.442695, %v1402_v2  ;;  %v7620_v29 = vld [vmem:[%s6695_s1 + $0x1b8] sm:$0xff]  ;;  %v7626_v2 = vld [vmem:[%s6687_s17 + $0x190] sm:$0xff]  ;;  %v7633_v22 = vld [vmem:[%s6695_s1 + $0x190] sm:$0xff] }
 0x243   : > { %v2283_v40 = vmul.f32 %v2155_v41, %v7451_v20  ;;  %5177 = vlog2.f32 %v2155_v41  ;;  %v3309_v11 = vmul.f32 %v7570_v26, %v7570_v26  ;;  %v7600_v15 = vmul.f32 %v7573_v61, %v7573_v61  ;;  %v5168_v35 = vpop.eup %5167  ;;  %v7629_v60 = vld [vmem:[%s6687_s17 + $0x1b0] sm:$0xff] }
 0x244   : > { %v7605_v18 = vmul.f32 0.6931472, %v5166_v46  ;;  %v4606_v38 = vpack.c.bf16 %v7581_v23, %v7577_v33  ;;  %5179 = vlog2.f32 %v2158_v19  ;;  %v2287_v20 = vmul.f32 %v7586_v58, %v7516_v56 }
 0x245   : > { %v2411_v17 = vadd.f32 %v2283_v40, %v747_v12  ;;  %5181 = vlog2.f32 %v1777_v39  ;;  %v1267_v47 = vand.u32 2147483647, %v7589_v21  ;;  %v1271_v42 = vand.u32 2147483647, %v7592_v28  ;;  %v7643_v39 = vld [vmem:[%s6695_s1 + $0x1a0] sm:$0xff] }
 0x246   : > { %v5170_v0 = vpop.eup %5169  ;;  %4607 = vmatprep.subr.bf16.mxu0 %v4606_v38  ;;  %v2415_v25 = vadd.f32 %v2287_v20, %v751_v45  ;;  %v1142_v6 = vmax.f32 %v7539_v57, 0.0  ;;  %5183 = vpow2.f32 %v1585_v4  ;;  %v3308_v34 = vmul.f32 %v7603_v27, %v7603_v27 }
 0x247   : > { %v5172_v49 = vpop.eup %5171  ;;  %v3035_v56 = vmul.f32 %v2411_v17, %v2411_v17  ;;  %v1780_v19 = vadd.f32 1.0, %v5170_v0  ;;  %v1395_v43 = vsub.f32 0.0, %v1267_v47  ;;  %v1399_v14 = vsub.f32 0.0, %v1271_v42 }
 0x248   : > { %5185 = vlog2.f32 %v2162_v62  ;;  %v4544_v9 = vpack.c.bf16 %v2415_v25, %v2411_v17  ;;  %v1784_v8 = vadd.f32 1.0, %v5172_v49  ;;  %v3435_v36 = vadd.f32 %v3434_v44, %v3308_v34  ;;  %v749_v49 = vld [vmem:[%s6678_s14 + $0x150] sm:$0xff] }
 0x249   : > { %v7622_v32 = vmul.f32 0.6931472, %v5168_v35  ;;  %v3162_v59 = vadd.f32 %v7529_v16, %v3035_v56  ;;  %5187 = vlog2.f32 %v1780_v19  ;;  %v1571_v50 = vmul.f32 1.442695, %v1395_v43  ;;  %v7659_v43 = vld [vmem:[%s6687_s17 + $0x1c8] sm:$0xff] }
 0x24a   : > { %4545 = vmatpush1.bf16.xpose.msra.mxu1 %v4544_v9  ;;  %5189 = vlog2.f32 %v1784_v8  ;;  %v1146_v62 = vmax.f32 %v7543_v13, 0.0  ;;  %v1579_v52 = vmul.f32 1.442695, %v1399_v14  ;;  %v3436_v24 = vadd.f32 %v3435_v36, %v3309_v11 }
 0x24b   : > { %v5174_v44 = vpop.eup %5173  ;;  %v3163_v46 = vadd.f32 %v3162_v59, %v7552_v55  ;;  %v3311_v16 = vmul.f32 %v7617_v53, %v7617_v53  ;;  %v7640_v41 = vmul.f32 %v7620_v29, %v7620_v29  ;;  %5191 = vpow2.f32 %v1571_v50 }
 0x24c   : > { %v5176_v12 = vpop.eup %5175  ;;  %v1944_v4 = vmul.f32 0.6931472, %v5174_v44  ;;  %5193 = vpow2.f32 %v1579_v52  ;;  %v1269_v45 = vand.u32 2147483647, %v7626_v2  ;;  %v1273_v40 = vand.u32 2147483647, %v7629_v60 }
 0x24d   : > { %v5178_v11 = vpop.eup %5177  ;;  %v3038_v55 = vmul.f32 %v7577_v33, %v7577_v33  ;;  %v1782_v35 = vadd.f32 1.0, %v5176_v12  ;;  %v1139_v38 = vmax.f32 %v7589_v21, 0.0  ;;  %v3310_v20 = vmul.f32 %v7633_v22, %v7633_v22 }
 0x24e   : > { %v5180_v17 = vpop.eup %5179  ;;  %v3606_v47 = vmul.f32 0.6931472, %v5178_v11  ;;  %5195 = vlog2.f32 %v7586_v58  ;;  %v2157_v42 = vadd.f32 %v1944_v4, %v1133_v30  ;;  %v1397_v0 = vsub.f32 0.0, %v1269_v45  ;;  %v7664_v30 = vld [vmem:[%s6695_s1 + $0x1b0] sm:$0xff]  ;;  %v753_v45 = vld [vmem:[%s6678_s14 + $0x170] sm:$0xff] }
 0x24f   : > { %v5182_v34 = vpop.eup %5181  ;;  %5197 = vlog2.f32 %v1782_v35  ;;  %v3312_v33 = vmul.f32 %v7643_v39, %v7643_v39  ;;  %v1401_v56 = vsub.f32 0.0, %v1273_v40  ;;  %v3437_v19 = vadd.f32 %v3436_v24, %v3310_v20 }
 0x250   : > { %v5184_v14 = vpop.eup %5183  ;;  %v3820_v9 = vadd.f32 %v7556_v63, %v3606_v47  ;;  %v1952_v58 = vmul.f32 0.6931472, %v5182_v34  ;;  %v2285_v3 = vmul.f32 %v2157_v42, %v7512_v5  ;;  %5199 = vlog2.f32 %v2157_v42  ;;  %v7672_v63 = vld [vmem:[%s6687_s17 + $0x1e8] sm:$0xff] }
 0x251   : > { %v3039_v8 = vmul.f32 %v2415_v25, %v2415_v25  ;;  %v1786_v36 = vadd.f32 1.0, %v5184_v14  ;;  %v1575_v59 = vmul.f32 1.442695, %v1397_v0  ;;  %v3438_v50 = vadd.f32 %v3437_v19, %v3311_v16  ;;  %v756_v19 = vld [vmem:[%s6678_s14 + $0x188] sm:$0xff] }
 0x252   : > { %v7666_v52 = vpop.eup %5185  ;;  %v3821_v24 = vadd.f32 %v3820_v9, %v7605_v18  ;;  %v2161_v44 = vadd.f32 %v1952_v58, %v1137_v10  ;;  %v2413_v12 = vadd.f32 %v2285_v3, %v749_v49  ;;  %v1276_v4 = vand.u32 2147483647, %v7659_v43 }
 0x253   : > { %v5188_v5 = vpop.eup %5187  ;;  %5201 = vlog2.f32 %v1786_v36  ;;  %v1583_v40 = vmul.f32 1.442695, %v1401_v56  ;;  %v3314_v25 = vmul.f32 %v7664_v30, %v7664_v30  ;;  %v3439_v16 = vadd.f32 %v3438_v50, %v3312_v33  ;;  %v760_v36 = vld [vmem:[%s6678_s14 + $0x1a8] sm:$0xff] }
 0x254   : > { %v5190_v11 = vpop.eup %5189  ;;  %v2289_v18 = vmul.f32 %v2161_v44, %v7532_v1  ;;  %v3037_v35 = vmul.f32 %v2413_v12, %v2413_v12  ;;  %5203 = vlog2.f32 %v2161_v44  ;;  %v1958_v7 = vmul.f32 0.6931472, %v5188_v5 }
 0x255   : > { %v5192_v10 = vpop.eup %5191  ;;  %v1966_v20 = vmul.f32 0.6931472, %v5190_v11  ;;  %5205 = vpow2.f32 %v1575_v59  ;;  %v3440_v47 = vadd.f32 %v3439_v16, %v7600_v15  ;;  %v1280_v42 = vand.u32 2147483647, %v7672_v63 }
 0x256   : > { %v5194_v0 = vpop.eup %5193  ;;  %v2417_v34 = vadd.f32 %v2289_v18, %v753_v45  ;;  %v3164_v49 = vadd.f32 %v3163_v46, %v3037_v35  ;;  %v2164_v33 = vadd.f32 %v1958_v7, %v1140_v31  ;;  %v1404_v56 = vsub.f32 0.0, %v1276_v4 }
 0x257   : > { %v7686_v1 = vadd.f32 %v1966_v20, %v1144_v54  ;;  %v1779_v14 = vadd.f32 1.0, %v5192_v10  ;;  %5207 = vpow2.f32 %v1583_v40  ;;  %v3441_v9 = vadd.f32 %v3440_v47, %v3314_v25 }
 0x258   : > { %v5196_v58 = vpop.eup %5195  ;;  %v4608_v3 = vpack.c.bf16 %v2417_v34, %v2413_v12  ;;  %v3165_v15 = vadd.f32 %v3164_v49, %v3038_v55  ;;  %v2292_v59 = vmul.f32 %v2164_v33, %v7570_v26  ;;  %v1783_v50 = vadd.f32 1.0, %v5194_v0  ;;  %v7713_v49 = vld [vmem:[%s6687_s17 + $0x1f8] sm:$0xff] }
 0x259   : > { %v5198_v46 = vpop.eup %5197  ;;  %v3612_v44 = vmul.f32 0.6931472, %v5180_v17  ;;  %v3041_v51 = vmul.f32 %v2417_v34, %v2417_v34  ;;  %v2296_v31 = vmul.f32 %v7686_v1, %v7573_v61  ;;  %v7693_v37 = vadd.f32 %v3441_v9, %v7640_v41  ;;  %v7710_v34 = vld [vmem:[%s6687_s17 + $0x1d8] sm:$0xff] }
 0x25a   : > { %v5200_v54 = vpop.eup %5199  ;;  %4609 = vmatpush1.bf16.xpose.msra.mxu0 %v4608_v3  ;;  %v3166_v4 = vadd.f32 %v3165_v15, %v3039_v8  ;;  %v2420_v5 = vadd.f32 %v2292_v59, %v756_v19  ;;  %v1962_v45 = vmul.f32 0.6931472, %v5198_v46  ;;  %v1408_v12 = vsub.f32 0.0, %v1280_v42  ;;  %v762_v9 = vld [vmem:[%s6678_s14 + $0x1b8] sm:$0xff] }
 0x25b   : > { %v3610_v55 = vmul.f32 0.6931472, %v5200_v54  ;;  %v2424_v40 = vadd.f32 %v2296_v31, %v760_v36  ;;  %5209 = vlog2.f32 %v1779_v14  ;;  %v1589_v26 = vmul.f32 1.442695, %v1404_v56  ;;  %v758_v14 = vld [vmem:[%s6678_s14 + $0x198] sm:$0xff] }
 0x25c   : > { %v3042_v17 = vmul.f32 %v7581_v23, %v7581_v23  ;;  %v3167_v25 = vadd.f32 %v3166_v4, %v7560_v48  ;;  %v2166_v61 = vadd.f32 %v1962_v45, %v1142_v6  ;;  %5211 = vlog2.f32 %v1783_v50 }
 0x25d   : > { %v5202_v41 = vpop.eup %5201  ;;  %v3614_v16 = vmul.f32 0.6931472, %v5196_v58  ;;  %v3822_v11 = vadd.f32 %v3821_v24, %v3610_v55  ;;  %v4546_v8 = vpack.c.bf16 %v2424_v40, %v2420_v5  ;;  %5213 = vpow2.f32 %v1589_v26  ;;  %v7718_v58 = vld [vmem:[%s6695_s1 + $0x1c8] sm:$0xff]  ;;  %v7742_v26 = vld [vmem:[%s6687_s17 + $0x1c0] sm:$0xff] }
 0x25e   : > { %v5204_v18 = vpop.eup %5203  ;;  %v3168_v35 = vadd.f32 %v3167_v25, %v3041_v51  ;;  %v1970_v7 = vmul.f32 0.6931472, %v5202_v41  ;;  %v1143_v10 = vmax.f32 %v7592_v28, 0.0  ;;  %v1141_v23 = vmax.f32 %v7626_v2, 0.0 }
 0x25f   : > { %v5206_v48 = vpop.eup %5205  ;;  %v3620_v57 = vmul.f32 0.6931472, %v7666_v52  ;;  %v3823_v6 = vadd.f32 %v3822_v11, %v3612_v44  ;;  %4547 = vmatprep.subr.bf16.mxu1 %v4546_v8  ;;  %v1145_v24 = vmax.f32 %v7629_v60, 0.0  ;;  %v1597_v20 = vmul.f32 1.442695, %v1408_v12 }
 0x260   : > { %v7704_v47 = vadd.f32 %v3168_v35, %v3042_v17  ;;  %v2170_v42 = vadd.f32 %v1970_v7, %v1146_v62  ;;  %v2294_v28 = vmul.f32 %v2166_v61, %v7617_v53  ;;  %v1781_v0 = vadd.f32 1.0, %v5206_v48  ;;  %v755_v35 = vld [vmem:[%s6678_s14 + $0x180] sm:$0xff] }
 0x261   : > { %v5208_v56 = vpop.eup %5207  ;;  %v3618_v52 = vmul.f32 0.6931472, %v5204_v18  ;;  %v3824_v19 = vadd.f32 %v3823_v6, %v3614_v16  ;;  %v1148_v3 = vmax.f32 %v7659_v43, 0.0  ;;  %5215 = vpow2.f32 %v1597_v20  ;;  %v7747_v16 = vld [vmem:[%s6687_s17 + $0x1e0] sm:$0xff]  ;;  %v7757_v18 = vld [vmem:[%s6695_s1 + $0x1c0] sm:$0xff] }
 0x262   : > { %5217 = vlog2.f32 %v2164_v33  ;;  %v2298_v13 = vmul.f32 %v2170_v42, %v7620_v29  ;;  %v1785_v53 = vadd.f32 1.0, %v5208_v56  ;;  %v1152_v62 = vmax.f32 %v7672_v63, 0.0 }
 0x263   : > { %v3825_v15 = vadd.f32 %v3824_v19, %v7622_v32  ;;  %5219 = vlog2.f32 %v1781_v0  ;;  %v1278_v36 = vand.u32 2147483647, %v7710_v34  ;;  %v1282_v59 = vand.u32 2147483647, %v7713_v49  ;;  %v7734_v32 = vld [vmem:[%s6695_s1 + $0x1e8] sm:$0xff] }
 0x264   : > { %v2422_v50 = vadd.f32 %v2294_v28, %v758_v14  ;;  %v7726_v46 = vadd.f32 %v2298_v13, %v762_v9  ;;  %5221 = vlog2.f32 %v1785_v53  ;;  %v7730_v33 = vmul.f32 %v7718_v58, %v7718_v58 }
 0x265   : > { %v5210_v29 = vpop.eup %5209  ;;  %v3826_v44 = vadd.f32 %v3825_v15, %v3618_v52  ;;  %5223 = vlog2.f32 %v7686_v1  ;;  %v1406_v51 = vsub.f32 0.0, %v1278_v36  ;;  %v1410_v31 = vsub.f32 0.0, %v1282_v59  ;;  %v7771_v36 = vld [vmem:[%s6695_s1 + $0x1d8] sm:$0xff] }
 0x266   : > { %v5212_v54 = vpop.eup %5211  ;;  %v7736_v4 = vmul.f32 %v2420_v5, %v2420_v5  ;;  %v7738_v45 = vmul.f32 %v2424_v40, %v2424_v40  ;;  %v4610_v12 = vpack.c.bf16 %v7726_v46, %v2422_v50  ;;  %v1956_v55 = vmul.f32 0.6931472, %v5210_v29  ;;  %v7774_v29 = vld [vmem:[%s6687_s17 + $0x1d0] sm:$0xff] }
 0x267   : > { %v5214_v17 = vpop.eup %5213  ;;  %v7744_v25 = vadd.f32 %v3826_v44, %v3620_v57  ;;  %5225 = vlog2.f32 %v2166_v61  ;;  %v1964_v1 = vmul.f32 0.6931472, %v5212_v54  ;;  %v1593_v41 = vmul.f32 1.442695, %v1406_v51  ;;  %v759_v57 = vld [vmem:[%s6678_s14 + $0x1a0] sm:$0xff] }
 0x268   : > { %4611 = vmatprep.subr.bf16.mxu0 %v4610_v12  ;;  %v2163_v5 = vadd.f32 %v1956_v55, %v1139_v38  ;;  %v1788_v40 = vadd.f32 1.0, %v5214_v17  ;;  %v7753_v11 = vmul.f32 %v7734_v32, %v7734_v32  ;;  %v1150_v8 = vmax.f32 %v7710_v34, 0.0  ;;  %v7781_v17 = vld [vmem:[%s6687_s17 + $0x1f0] sm:$0xff] }
 0x269   : > { %v2167_v7 = vadd.f32 %v1964_v1, %v1143_v10  ;;  %5227 = vpow2.f32 %v1593_v41  ;;  %v1601_v61 = vmul.f32 1.442695, %v1410_v31  ;;  %v1275_v48 = vand.u32 2147483647, %v7742_v26  ;;  %v757_v41 = vld [vmem:[%s6678_s14 + $0x190] sm:$0xff] }
 0x26a   : > { %v2291_v6 = vmul.f32 %v2163_v5, %v7603_v27  ;;  %5229 = vlog2.f32 %v2163_v5  ;;  %v1154_v21 = vmax.f32 %v7713_v49, 0.0  ;;  %v1279_v38 = vand.u32 2147483647, %v7747_v16 }
 0x26b   : > { %v5216_v20 = vpop.eup %5215  ;;  %5231 = vlog2.f32 %v2170_v42  ;;  %v2295_v28 = vmul.f32 %v2167_v7, %v7643_v39  ;;  %v1403_v0 = vsub.f32 0.0, %v1275_v48  ;;  %v3316_v10 = vmul.f32 %v7757_v18, %v7757_v18 }
 0x26c   : > { %v5218_v56 = vpop.eup %5217  ;;  %v2419_v52 = vadd.f32 %v2291_v6, %v755_v35  ;;  %v1792_v19 = vadd.f32 1.0, %v5216_v20  ;;  %5233 = vlog2.f32 %v1788_v40  ;;  %v1407_v27 = vsub.f32 0.0, %v1279_v38  ;;  %v7791_v40 = vld [vmem:[%s6695_s1 + $0x1d0] sm:$0xff] }
 0x26d   : > { %v5220_v14 = vpop.eup %5219  ;;  %v7768_v9 = vmul.f32 %v2422_v50, %v2422_v50  ;;  %v2423_v13 = vadd.f32 %v2295_v28, %v759_v57  ;;  %5235 = vpow2.f32 %v1601_v61  ;;  %v1587_v53 = vmul.f32 1.442695, %v1403_v0 }
 0x26e   : > { %v5222_v42 = vpop.eup %5221  ;;  %v3043_v39 = vmul.f32 %v2419_v52, %v2419_v52  ;;  %v1960_v15 = vmul.f32 0.6931472, %v5220_v14  ;;  %5237 = vlog2.f32 %v1792_v19  ;;  %v1595_v59 = vmul.f32 1.442695, %v1407_v27 }
 0x26f   : > { %v5224_v44 = vpop.eup %5223  ;;  %v3624_v51 = vmul.f32 0.6931472, %v5218_v56  ;;  %v4548_v31 = vpack.c.bf16 %v2423_v13, %v2419_v52  ;;  %v1968_v50 = vmul.f32 0.6931472, %v5222_v42  ;;  %5239 = vpow2.f32 %v1587_v53 }
 0x270   : > { %v3170_v54 = vadd.f32 %v7704_v47, %v3043_v39  ;;  %v2165_v12 = vadd.f32 %v1960_v15, %v1141_v23  ;;  %5241 = vpow2.f32 %v1595_v59  ;;  %v3443_v55 = vadd.f32 %v7693_v37, %v3316_v10  ;;  %v761_v23 = vld [vmem:[%s6678_s14 + $0x1b0] sm:$0xff]  ;;  %v7817_v39 = vld [vmem:[%s6695_s1 + $0x1f0] sm:$0xff] }
 0x271   : > { %v7783_v1 = vpop.eup %5225  ;;  %4549 = vmatpush1.bf16.xpose.msra.mxu1 %v4548_v31  ;;  %5243 = vlog2.f32 %v2167_v7  ;;  %v2169_v5 = vadd.f32 %v1968_v50, %v1145_v24  ;;  %v3319_v47 = vmul.f32 %v7771_v36, %v7771_v36  ;;  %v1277_v2 = vand.u32 2147483647, %v7774_v29  ;;  %v7802_v24 = vld [vmem:[%s6695_s1 + $0x1e0] sm:$0xff] }
 0x272   : > { %v3171_v37 = vadd.f32 %v3170_v54, %v7736_v4  ;;  %v2293_v35 = vmul.f32 %v2165_v12, %v7633_v22  ;;  %5245 = vlog2.f32 %v2165_v12  ;;  %v3444_v61 = vadd.f32 %v3443_v55, %v7730_v33 }
 0x273   : > { %v5228_v7 = vpop.eup %5227  ;;  %v7798_v48 = vmul.f32 0.6931472, %v5224_v44  ;;  %v2297_v60 = vmul.f32 %v2169_v5, %v7664_v30  ;;  %v1281_v57 = vand.u32 2147483647, %v7781_v17  ;;  %v1405_v6 = vsub.f32 0.0, %v1277_v2 }
 0x274   : > { %v5230_v38 = vpop.eup %5229  ;;  %v7807_v4 = vmul.f32 %v7726_v46, %v7726_v46  ;;  %v2421_v20 = vadd.f32 %v2293_v35, %v757_v41  ;;  %v1790_v22 = vadd.f32 1.0, %v5228_v7  ;;  %v3318_v33 = vmul.f32 %v7791_v40, %v7791_v40 }
 0x275   : > { %v7811_v28 = vpop.eup %5231  ;;  %v3622_v0 = vmul.f32 0.6931472, %v5230_v38  ;;  %v2425_v30 = vadd.f32 %v2297_v60, %v761_v23  ;;  %5247 = vlog2.f32 %v2169_v5  ;;  %v1591_v10 = vmul.f32 1.442695, %v1405_v6  ;;  %v7823_v23 = vld [vmem:[%s6695_s1 + $0x1f8] sm:$0xff]  ;;  %v764_v60 = vld [vmem:[%s6678_s14 + $0x1c8] sm:$0xff] }
 0x276   : > { %v5234_v56 = vpop.eup %5233  ;;  %v3045_v52 = vmul.f32 %v2421_v20, %v2421_v20  ;;  %5249 = vlog2.f32 %v1790_v22  ;;  %v3320_v19 = vmul.f32 %v7802_v24, %v7802_v24  ;;  %v3445_v46 = vadd.f32 %v3444_v61, %v3318_v33 }
 0x277   : > { %v5236_v27 = vpop.eup %5235  ;;  %v3828_v14 = vadd.f32 %v7744_v25, %v3622_v0  ;;  %v4612_v53 = vpack.c.bf16 %v2425_v30, %v2421_v20  ;;  %v1974_v42 = vmul.f32 0.6931472, %v5234_v56  ;;  %v1409_v15 = vsub.f32 0.0, %v1281_v57  ;;  %v768_v57 = vld [vmem:[%s6678_s14 + $0x1e8] sm:$0xff] }
 0x278   : > { %v5238_v59 = vpop.eup %5237  ;;  %v3047_v44 = vmul.f32 %v2423_v13, %v2423_v13  ;;  %v3172_v31 = vadd.f32 %v3171_v37, %v3045_v52  ;;  %v1794_v50 = vadd.f32 1.0, %v5236_v27  ;;  %5251 = vpow2.f32 %v1591_v10 }
 0x279   : > { %v5240_v54 = vpop.eup %5239  ;;  %v3829_v12 = vadd.f32 %v3828_v14, %v3624_v51  ;;  %4613 = vmatpush1.bf16.xpose.msra.mxu0 %v4612_v53  ;;  %v1982_v55 = vmul.f32 0.6931472, %v5238_v59  ;;  %v2172_v41 = vadd.f32 %v1974_v42, %v1148_v3  ;;  %v3446_v25 = vadd.f32 %v3445_v46, %v3319_v47 }
 0x27a   : > { %v5242_v5 = vpop.eup %5241  ;;  %v3173_v2 = vadd.f32 %v3172_v31, %v7768_v9  ;;  %5253 = vlog2.f32 %v1794_v50  ;;  %v1787_v13 = vadd.f32 1.0, %v5240_v54  ;;  %v3322_v37 = vmul.f32 %v7817_v39, %v7817_v39 }
 0x27b   : > { %v5244_v35 = vpop.eup %5243  ;;  %v2176_v51 = vadd.f32 %v1982_v55, %v1152_v62  ;;  %v2300_v43 = vmul.f32 %v2172_v41, %v7718_v58  ;;  %v1791_v3 = vadd.f32 1.0, %v5242_v5  ;;  %v1599_v47 = vmul.f32 1.442695, %v1409_v15  ;;  %v7837_v62 = vld [vmem:[%s6687_s17 + $0x208] sm:$0xff] }
 0x27c   : > { %v5246_v61 = vpop.eup %5245  ;;  %v3049_v7 = vmul.f32 %v2425_v30, %v2425_v30  ;;  %v3174_v9 = vadd.f32 %v3173_v2, %v3047_v44  ;;  %5255 = vlog2.f32 %v1787_v13  ;;  %v3447_v6 = vadd.f32 %v3446_v25, %v3320_v19  ;;  %v7840_v58 = vld [vmem:[%s6687_s17 + $0x228] sm:$0xff]  ;;  %v7860_v25 = vld [vmem:[%s6687_s17 + $0x218] sm:$0xff] }
 0x27d   : > { %v3628_v38 = vmul.f32 0.6931472, %v7783_v1  ;;  %v3626_v20 = vmul.f32 0.6931472, %v5246_v61  ;;  %v2304_v22 = vmul.f32 %v2176_v51, %v7734_v32  ;;  %v3323_v63 = vmul.f32 %v7823_v23, %v7823_v23 }
 0x27e   : > { %v3630_v33 = vmul.f32 0.6931472, %v5244_v35  ;;  %v3175_v0 = vadd.f32 %v3174_v9, %v7738_v45  ;;  %5257 = vlog2.f32 %v1791_v3  ;;  %v3448_v30 = vadd.f32 %v3447_v6, %v7753_v11 }
 0x27f   : > { %v5248_v10 = vpop.eup %5247  ;;  %v3830_v56 = vadd.f32 %v3829_v12, %v3626_v20  ;;  %v7844_v52 = vadd.f32 %v2300_v43, %v764_v60  ;;  %v7846_v1 = vadd.f32 %v2304_v22, %v768_v57  ;;  %5259 = vpow2.f32 %v1599_v47  ;;  %v7867_v43 = vld [vmem:[%s6687_s17 + $0x238] sm:$0xff] }
 0x280   : > { %v5250_v32 = vpop.eup %5249  ;;  %v3176_v19 = vadd.f32 %v3175_v0, %v3049_v7  ;;  %v3449_v46 = vadd.f32 %v3448_v30, %v3322_v37  ;;  %v1284_v27 = vand.u32 2147483647, %v7837_v62  ;;  %v1288_v14 = vand.u32 2147483647, %v7840_v58  ;;  %v770_v7 = vld [vmem:[%s6678_s14 + $0x1f8] sm:$0xff]  ;;  %v763_v30 = vld [vmem:[%s6678_s14 + $0x1c0] sm:$0xff] }
 0x281   : > { %v3831_v53 = vadd.f32 %v3830_v56, %v3628_v38  ;;  %v4550_v45 = vpack.c.bf16 %v7846_v1, %v7844_v52  ;;  %5261 = vlog2.f32 %v2172_v41  ;;  %v1978_v11 = vmul.f32 0.6931472, %v5250_v32 }
 0x282   : > { %v5252_v42 = vpop.eup %5251  ;;  %v7853_v15 = vadd.f32 %v3176_v19, %v7807_v4  ;;  %v7855_v59 = vadd.f32 %v3449_v46, %v3323_v63  ;;  %v1412_v44 = vsub.f32 0.0, %v1284_v27  ;;  %v1416_v31 = vsub.f32 0.0, %v1288_v14  ;;  %v7893_v46 = vld [vmem:[%s6695_s1 + $0x228] sm:$0xff]  ;;  %v7897_v14 = vld [vmem:[%s6687_s17 + $0x200] sm:$0xff] }
 0x283   : > { %v3634_v50 = vmul.f32 0.6931472, %v5248_v10  ;;  %v3832_v54 = vadd.f32 %v3831_v53, %v3630_v33  ;;  %4551 = vmatprep.subr.bf16.mxu1 %v4550_v45  ;;  %v2174_v12 = vadd.f32 %v1978_v11, %v1150_v8  ;;  %v1789_v55 = vadd.f32 1.0, %v5252_v42  ;;  %v7889_v10 = vld [vmem:[%s6695_s1 + $0x208] sm:$0xff]  ;;  %v7900_v53 = vld [vmem:[%s6687_s17 + $0x220] sm:$0xff] }
 0x284   : > { %v5254_v41 = vpop.eup %5253  ;;  %v1147_v5 = vmax.f32 %v7742_v26, 0.0  ;;  %v1151_v4 = vmax.f32 %v7747_v16, 0.0  ;;  %v1605_v2 = vmul.f32 1.442695, %v1412_v44  ;;  %v3636_v13 = vmul.f32 0.6931472, %v7811_v28 }
 0x285   : > { %v3833_v37 = vadd.f32 %v3832_v54, %v7798_v48  ;;  %5263 = vlog2.f32 %v2176_v51  ;;  %v1986_v35 = vmul.f32 0.6931472, %v5254_v41  ;;  %v1149_v8 = vmax.f32 %v7774_v29, 0.0  ;;  %v766_v51 = vld [vmem:[%s6678_s14 + $0x1d8] sm:$0xff]  ;;  %v767_v42 = vld [vmem:[%s6678_s14 + $0x1e0] sm:$0xff] }
 0x286   : > { %v5256_v34 = vpop.eup %5255  ;;  %5265 = vlog2.f32 %v1789_v55  ;;  %v1613_v3 = vmul.f32 1.442695, %v1416_v31  ;;  %v1286_v26 = vand.u32 2147483647, %v7860_v25  ;;  %v2302_v28 = vmul.f32 %v2174_v12, %v7771_v36 }
 0x287   : > { %v3834_v47 = vadd.f32 %v3833_v37, %v3634_v50  ;;  %v7873_v16 = vadd.f32 %v1986_v35, %v1154_v21  ;;  %v1972_v61 = vmul.f32 0.6931472, %v5256_v34  ;;  %v1153_v9 = vmax.f32 %v7781_v17, 0.0  ;;  %v7923_v37 = vld [vmem:[%s6695_s1 + $0x218] sm:$0xff] }
 0x288   : > { %v5258_v48 = vpop.eup %5257  ;;  %5267 = vpow2.f32 %v1605_v2  ;;  %v1290_v60 = vand.u32 2147483647, %v7867_v43  ;;  %v1414_v57 = vsub.f32 0.0, %v1286_v26  ;;  %v1156_v21 = vmax.f32 %v7837_v62, 0.0 }
 0x289   : > { %v5260_v6 = vpop.eup %5259  ;;  %v7880_v38 = vadd.f32 %v3834_v47, %v3636_v13  ;;  %v2306_v49 = vmul.f32 %v7873_v16, %v7823_v23  ;;  %5269 = vlog2.f32 %v2174_v12  ;;  %v1980_v36 = vmul.f32 0.6931472, %v5258_v48  ;;  %v7914_v12 = vld [vmem:[%s6695_s1 + $0x200] sm:$0xff] }
 0x28a   : > { %v2171_v20 = vadd.f32 %v1972_v61, %v1147_v5  ;;  %v1793_v22 = vadd.f32 1.0, %v5260_v6  ;;  %5271 = vpow2.f32 %v1613_v3  ;;  %v2430_v33 = vadd.f32 %v2302_v28, %v766_v51  ;;  %v7937_v6 = vld [vmem:[%s6687_s17 + $0x230] sm:$0xff] }
 0x28b   : > { %v5262_v63 = vpop.eup %5261  ;;  %v7885_v0 = vadd.f32 %v2306_v49, %v770_v7  ;;  %v1418_v56 = vsub.f32 0.0, %v1290_v60  ;;  %v1609_v23 = vmul.f32 1.442695, %v1414_v57  ;;  %v2175_v32 = vadd.f32 %v1980_v36, %v1151_v4  ;;  %v7934_v57 = vld [vmem:[%s6687_s17 + $0x210] sm:$0xff] }
 0x28c   : > { %v2299_v19 = vmul.f32 %v2171_v20, %v7757_v18  ;;  %5273 = vlog2.f32 %v2171_v20  ;;  %v1160_v27 = vmax.f32 %v7840_v58, 0.0  ;;  %v3052_v45 = vmul.f32 %v7844_v52, %v7844_v52  ;;  %v765_v20 = vld [vmem:[%s6678_s14 + $0x1d0] sm:$0xff] }
 0x28d   : > { %v4614_v11 = vpack.c.bf16 %v7885_v0, %v2430_v33  ;;  %5275 = vlog2.f32 %v1793_v22  ;;  %v1617_v44 = vmul.f32 1.442695, %v1418_v56  ;;  %v7908_v18 = vmul.f32 %v7846_v1, %v7846_v1 }
 0x28e   : > { %v2303_v31 = vmul.f32 %v2175_v32, %v7802_v24  ;;  %v2427_v50 = vadd.f32 %v2299_v19, %v763_v30  ;;  %v3325_v54 = vmul.f32 %v7889_v10, %v7889_v10  ;;  %v7918_v52 = vmul.f32 %v7893_v46, %v7893_v46 }
 0x28f   : > { %v5264_v55 = vpop.eup %5263  ;;  %4615 = vmatprep.subr.bf16.mxu0 %v4614_v11  ;;  %5277 = vpow2.f32 %v1609_v23  ;;  %v1283_v41 = vand.u32 2147483647, %v7897_v14  ;;  %v1287_v1 = vand.u32 2147483647, %v7900_v53  ;;  %v3640_v24 = vmul.f32 0.6931472, %v5262_v63 }
 0x290   : > { %v5266_v5 = vpop.eup %5265  ;;  %v2431_v4 = vadd.f32 %v2303_v31, %v767_v42  ;;  %v3051_v2 = vmul.f32 %v2427_v50, %v2427_v50  ;;  %5279 = vpow2.f32 %v1617_v44  ;;  %v3324_v3 = vmul.f32 %v7914_v12, %v7914_v12 }
 0x291   : > { %v1976_v13 = vmul.f32 0.6931472, %v5266_v5  ;;  %v1411_v35 = vsub.f32 0.0, %v1283_v41  ;;  %v1415_v34 = vsub.f32 0.0, %v1287_v1  ;;  %v7927_v47 = vmul.f32 0.6931472, %v5264_v55 }
 0x292   : > { %v5268_v26 = vpop.eup %5267  ;;  %v4552_v28 = vpack.c.bf16 %v2431_v4, %v2427_v50  ;;  %v3178_v61 = vadd.f32 %v7853_v15, %v3051_v2  ;;  %5281 = vlog2.f32 %v2175_v32  ;;  %v3054_v51 = vmul.f32 %v2430_v33, %v2430_v33  ;;  %v7944_v33 = vld [vmem:[%s6695_s1 + $0x210] sm:$0xff] }
 0x293   : > { %v5270_v48 = vpop.eup %5269  ;;  %5283 = vlog2.f32 %v7873_v16  ;;  %v2173_v7 = vadd.f32 %v1976_v13, %v1149_v8  ;;  %v1796_v60 = vadd.f32 1.0, %v5268_v26  ;;  %v3327_v15 = vmul.f32 %v7923_v37, %v7923_v37  ;;  %v769_v26 = vld [vmem:[%s6678_s14 + $0x1f0] sm:$0xff] }
 0x294   : > { %v5272_v49 = vpop.eup %5271  ;;  %4553 = vmatpush1.bf16.xpose.msra.mxu1 %v4552_v28  ;;  %v3179_v36 = vadd.f32 %v3178_v61, %v3052_v45  ;;  %v1603_v22 = vmul.f32 1.442695, %v1411_v35  ;;  %v3451_v63 = vadd.f32 %v7855_v59, %v3324_v3  ;;  %v1611_v16 = vmul.f32 1.442695, %v1415_v34  ;;  %v7959_v35 = vld [vmem:[%s6695_s1 + $0x220] sm:$0xff] }
 0x295   : > { %v2301_v29 = vmul.f32 %v2173_v7, %v7791_v40  ;;  %5285 = vlog2.f32 %v2173_v7  ;;  %v1800_v8 = vadd.f32 1.0, %v5272_v49  ;;  %v1285_v23 = vand.u32 2147483647, %v7934_v57  ;;  %v7962_v34 = vld [vmem:[%s6687_s17 + $0x248] sm:$0xff] }
 0x296   : > { %v5274_v30 = vpop.eup %5273  ;;  %5287 = vlog2.f32 %v1796_v60  ;;  %v3452_v56 = vadd.f32 %v3451_v63, %v3325_v54  ;;  %v1289_v32 = vand.u32 2147483647, %v7937_v6  ;;  %v3326_v59 = vmul.f32 %v7944_v33, %v7944_v33  ;;  %v7966_v7 = vld [vmem:[%s6687_s17 + $0x268] sm:$0xff] }
 0x297   : > { %v5276_v19 = vpop.eup %5275  ;;  %v3638_v45 = vmul.f32 0.6931472, %v5274_v30  ;;  %v2429_v11 = vadd.f32 %v2301_v29, %v765_v20  ;;  %5289 = vlog2.f32 %v1800_v8  ;;  %v1413_v42 = vsub.f32 0.0, %v1285_v23  ;;  %v7974_v23 = vld [vmem:[%s6695_s1 + $0x230] sm:$0xff] }
 0x298   : > { %v1984_v40 = vmul.f32 0.6931472, %v5276_v19  ;;  %5291 = vpow2.f32 %v1603_v22  ;;  %v1417_v44 = vsub.f32 0.0, %v1289_v32  ;;  %v7953_v50 = vmul.f32 %v7885_v0, %v7885_v0 }
 0x299   : > { %v5278_v31 = vpop.eup %5277  ;;  %v3836_v54 = vadd.f32 %v7880_v38, %v3638_v45  ;;  %v3053_v55 = vmul.f32 %v2429_v11, %v2429_v11  ;;  %5293 = vpow2.f32 %v1611_v16  ;;  %v3644_v1 = vmul.f32 0.6931472, %v5270_v48 }
 0x29a   : > { %v5280_v41 = vpop.eup %5279  ;;  %v3055_v5 = vmul.f32 %v2431_v4, %v2431_v4  ;;  %v2177_v2 = vadd.f32 %v1984_v40, %v1153_v9  ;;  %v1798_v13 = vadd.f32 1.0, %v5278_v31  ;;  %v1607_v61 = vmul.f32 1.442695, %v1413_v42 }
 0x29b   : > { %v3837_v3 = vadd.f32 %v3836_v54, %v3640_v24  ;;  %v3180_v0 = vadd.f32 %v3179_v36, %v3053_v55  ;;  %v1802_v28 = vadd.f32 1.0, %v5280_v41  ;;  %v1615_v4 = vmul.f32 1.442695, %v1417_v44 }
 0x29c   : > { %v5282_v38 = vpop.eup %5281  ;;  %v2305_v60 = vmul.f32 %v2177_v2, %v7817_v39  ;;  %5295 = vlog2.f32 %v2177_v2  ;;  %v3453_v48 = vadd.f32 %v3452_v56, %v3326_v59  ;;  %v3328_v49 = vmul.f32 %v7959_v35, %v7959_v35 }
 0x29d   : > { %v5284_v17 = vpop.eup %5283  ;;  %v3181_v9 = vadd.f32 %v3180_v0, %v3054_v51  ;;  %5297 = vlog2.f32 %v1798_v13  ;;  %v1292_v24 = vand.u32 2147483647, %v7962_v34  ;;  %v1296_v22 = vand.u32 2147483647, %v7966_v7  ;;  %v772_v13 = vld [vmem:[%s6678_s14 + $0x208] sm:$0xff] }
 0x29e   : > { %v2433_v36 = vadd.f32 %v2305_v60, %v769_v26  ;;  %5299 = vlog2.f32 %v1802_v28  ;;  %v3454_v20 = vadd.f32 %v3453_v48, %v3327_v15  ;;  %v3646_v29 = vmul.f32 0.6931472, %v5282_v38  ;;  %v776_v28 = vld [vmem:[%s6678_s14 + $0x228] sm:$0xff] }
 0x29f   : > { %v5286_v63 = vpop.eup %5285  ;;  %v3182_v39 = vadd.f32 %v3181_v9, %v3055_v5  ;;  %5301 = vpow2.f32 %v1607_v61  ;;  %v1420_v8 = vsub.f32 0.0, %v1292_v24  ;;  %v3330_v15 = vmul.f32 %v7974_v23, %v7974_v23 }
 0x2a0   : > { %v5288_v16 = vpop.eup %5287  ;;  %v4616_v30 = vpack.c.bf16 %v2433_v36, %v2429_v11  ;;  %v3057_v51 = vmul.f32 %v2433_v36, %v2433_v36  ;;  %v3642_v56 = vmul.f32 0.6931472, %v5286_v63  ;;  %5303 = vpow2.f32 %v1615_v4  ;;  %v8000_v36 = vld [vmem:[%s6687_s17 + $0x258] sm:$0xff] }
 0x2a1   : > { %v5290_v32 = vpop.eup %5289  ;;  %v3183_v19 = vadd.f32 %v3182_v39, %v7908_v18  ;;  %v1990_v45 = vmul.f32 0.6931472, %v5288_v16  ;;  %v3455_v59 = vadd.f32 %v3454_v20, %v3328_v49  ;;  %v1424_v11 = vsub.f32 0.0, %v1296_v22  ;;  %v1034_v49 = vld [vmem:[%s6695_s1 + $0x238] sm:$0xff]  ;;  %v8006_v22 = vld [vmem:[%s6687_s17 + $0x278] sm:$0xff] }
 0x2a2   : > { %v5292_v40 = vpop.eup %5291  ;;  %4617 = vmatpush1.bf16.xpose.msra.mxu0 %v4616_v30  ;;  %v3838_v42 = vadd.f32 %v3837_v3, %v3642_v56  ;;  %v1998_v44 = vmul.f32 0.6931472, %v5290_v32  ;;  %v1621_v31 = vmul.f32 1.442695, %v1420_v8  ;;  %v1158_v62 = vmax.f32 %v7860_v25, 0.0  ;;  %v774_v16 = vld [vmem:[%s6678_s14 + $0x218] sm:$0xff] }
 0x2a3   : > { %v5294_v54 = vpop.eup %5293  ;;  %v3184_v55 = vadd.f32 %v3183_v19, %v3057_v51  ;;  %v2180_v41 = vadd.f32 %v1990_v45, %v1156_v21  ;;  %v1795_v5 = vadd.f32 1.0, %v5292_v40  ;;  %v3456_v18 = vadd.f32 %v3455_v59, %v7918_v52 }
 0x2a4   : > { %v3839_v2 = vadd.f32 %v3838_v42, %v3644_v1  ;;  %v2184_v26 = vadd.f32 %v1998_v44, %v1160_v27  ;;  %v1799_v0 = vadd.f32 1.0, %v5294_v54  ;;  %5305 = vpow2.f32 %v1621_v31  ;;  %v8023_v42 = vld [vmem:[%s6695_s1 + $0x248] sm:$0xff] }
 0x2a5   : > { %v7986_v3 = vadd.f32 %v3184_v55, %v7953_v50  ;;  %v2308_v61 = vmul.f32 %v2180_v41, %v7889_v10  ;;  %v7991_v21 = vadd.f32 %v3456_v18, %v3330_v15  ;;  %v1162_v58 = vmax.f32 %v7867_v43, 0.0  ;;  %v8031_v18 = vld [vmem:[%s6687_s17 + $0x240] sm:$0xff] }
 0x2a6   : > { %v5296_v38 = vpop.eup %5295  ;;  %v3840_v52 = vadd.f32 %v3839_v2, %v3646_v29  ;;  %v2312_v1 = vmul.f32 %v2184_v26, %v7893_v46  ;;  %v1629_v27 = vmul.f32 1.442695, %v1424_v11  ;;  %v3652_v4 = vmul.f32 0.6931472, %v5284_v17  ;;  %v8034_v2 = vld [vmem:[%s6695_s1 + $0x268] sm:$0xff] }
 0x2a7   : > { %v5298_v60 = vpop.eup %5297  ;;  %v3650_v50 = vmul.f32 0.6931472, %v5296_v38  ;;  %v2436_v48 = vadd.f32 %v2308_v61, %v772_v13  ;;  %5307 = vlog2.f32 %v1795_v5  ;;  %v8002_v20 = vmul.f32 %v1034_v49, %v1034_v49  ;;  %v8042_v61 = vld [vmem:[%s6687_s17 + $0x260] sm:$0xff] }
 0x2a8   : > { %v5300_v10 = vpop.eup %5299  ;;  %v3841_v9 = vadd.f32 %v3840_v52, %v7927_v47  ;;  %v7996_v25 = vadd.f32 %v2312_v1, %v776_v28  ;;  %v1994_v24 = vmul.f32 0.6931472, %v5298_v60  ;;  %5309 = vlog2.f32 %v1799_v0  ;;  %v8052_v1 = vld [vmem:[%s6695_s1 + $0x240] sm:$0xff] }
 0x2a9   : > { %v5302_v46 = vpop.eup %5301  ;;  %v2002_v43 = vmul.f32 0.6931472, %v5300_v10  ;;  %v1155_v17 = vmax.f32 %v7897_v14, 0.0  ;;  %5311 = vpow2.f32 %v1629_v27  ;;  %v1159_v8 = vmax.f32 %v7900_v53, 0.0  ;;  %v778_v14 = vld [vmem:[%s6678_s14 + $0x238] sm:$0xff] }
 0x2aa   : > { %v5304_v63 = vpop.eup %5303  ;;  %v3842_v47 = vadd.f32 %v3841_v9, %v3650_v50  ;;  %v4554_v29 = vpack.c.bf16 %v7996_v25, %v2436_v48  ;;  %v2182_v39 = vadd.f32 %v1994_v24, %v1158_v62  ;;  %v1797_v51 = vadd.f32 1.0, %v5302_v46 }
 0x2ab   : > { %v8011_v30 = vadd.f32 %v2002_v43, %v1162_v58  ;;  %v1801_v56 = vadd.f32 1.0, %v5304_v63  ;;  %v1294_v32 = vand.u32 2147483647, %v8000_v36  ;;  %v1157_v15 = vmax.f32 %v7934_v57, 0.0  ;;  %v771_v63 = vld [vmem:[%s6678_s14 + $0x200] sm:$0xff] }
 0x2ac   : > { %v8014_v19 = vadd.f32 %v3842_v47, %v3652_v4  ;;  %4555 = vmatprep.subr.bf16.mxu1 %v4554_v29  ;;  %v2310_v45 = vmul.f32 %v2182_v39, %v7923_v37  ;;  %v1298_v59 = vand.u32 2147483647, %v8006_v22  ;;  %5313 = vlog2.f32 %v2180_v41 }
 0x2ad   : > { %v2314_v53 = vmul.f32 %v8011_v30, %v1034_v49  ;;  %v1161_v40 = vmax.f32 %v7937_v6, 0.0  ;;  %v1422_v44 = vsub.f32 0.0, %v1294_v32  ;;  %5315 = vlog2.f32 %v1797_v51  ;;  %v8071_v32 = vld [vmem:[%s6695_s1 + $0x258] sm:$0xff] }
 0x2ae   : > { %v5306_v11 = vpop.eup %5305  ;;  %v8025_v31 = vadd.f32 %v2310_v45, %v774_v16  ;;  %v1164_v37 = vmax.f32 %v7962_v34, 0.0  ;;  %v1426_v54 = vsub.f32 0.0, %v1298_v59  ;;  %5317 = vlog2.f32 %v1801_v56  ;;  %v775_v56 = vld [vmem:[%s6678_s14 + $0x220] sm:$0xff]  ;;  %v8074_v45 = vld [vmem:[%s6687_s17 + $0x250] sm:$0xff] }
 0x2af   : > { %v8028_v55 = vadd.f32 %v2314_v53, %v778_v14  ;;  %v1804_v41 = vadd.f32 1.0, %v5306_v11  ;;  %v1625_v5 = vmul.f32 1.442695, %v1422_v44  ;;  %5319 = vlog2.f32 %v2184_v26  ;;  %v8079_v59 = vld [vmem:[%s6695_s1 + $0x278] sm:$0xff] }
 0x2b0   : > { %v1168_v13 = vmax.f32 %v7966_v7, 0.0  ;;  %v8039_v0 = vmul.f32 %v8023_v42, %v8023_v42  ;;  %v1633_v28 = vmul.f32 1.442695, %v1426_v54  ;;  %v8048_v52 = vmul.f32 %v8034_v2, %v8034_v2 }
 0x2b1   : > { %v5308_v62 = vpop.eup %5307  ;;  %v4618_v38 = vpack.c.bf16 %v8028_v55, %v8025_v31  ;;  %5321 = vlog2.f32 %v1804_v41  ;;  %v1166_v26 = vmax.f32 %v8000_v36, 0.0  ;;  %v8054_v27 = vmul.f32 %v2436_v48, %v2436_v48 }
 0x2b2   : > { %v5310_v58 = vpop.eup %5309  ;;  %v1988_v60 = vmul.f32 0.6931472, %v5308_v62  ;;  %5323 = vpow2.f32 %v1625_v5  ;;  %v1291_v4 = vand.u32 2147483647, %v8031_v18  ;;  %v1170_v9 = vmax.f32 %v8006_v22, 0.0 }
 0x2b3   : > { %v5312_v50 = vpop.eup %5311  ;;  %4619 = vmatprep.subr.bf16.mxu0 %v4618_v38  ;;  %v1996_v10 = vmul.f32 0.6931472, %v5310_v58  ;;  %5325 = vpow2.f32 %v1633_v28  ;;  %v1295_v49 = vand.u32 2147483647, %v8042_v61  ;;  %v3332_v48 = vmul.f32 %v8052_v1, %v8052_v1 }
 0x2b4   : > { %v2179_v24 = vadd.f32 %v1988_v60, %v1155_v17  ;;  %v1808_v46 = vadd.f32 1.0, %v5312_v50  ;;  %v1419_v43 = vsub.f32 0.0, %v1291_v4  ;;  %5327 = vlog2.f32 %v2182_v39 }
 0x2b5   : > { %v2183_v47 = vadd.f32 %v1996_v10, %v1159_v8  ;;  %v1423_v29 = vsub.f32 0.0, %v1295_v49  ;;  %v3458_v16 = vadd.f32 %v7991_v21, %v8002_v20  ;;  %v8066_v51 = vmul.f32 %v7996_v25, %v7996_v25  ;;  %v8086_v20 = vld [vmem:[%s6687_s17 + $0x270] sm:$0xff] }
 0x2b6   : > { %v2307_v17 = vmul.f32 %v2179_v24, %v7914_v12  ;;  %5329 = vlog2.f32 %v2179_v24  ;;  %v1619_v14 = vmul.f32 1.442695, %v1419_v43  ;;  %v5314_v39 = vpop.eup %5313  ;;  %v8083_v21 = vmul.f32 %v8071_v32, %v8071_v32  ;;  %v773_v24 = vld [vmem:[%s6678_s14 + $0x210] sm:$0xff] }
 0x2b7   : > { %5331 = vlog2.f32 %v8011_v30  ;;  %v2311_v8 = vmul.f32 %v2183_v47, %v7959_v35  ;;  %v1627_v25 = vmul.f32 1.442695, %v1423_v29  ;;  %v5316_v12 = vpop.eup %5315  ;;  %v8090_v44 = vmul.f32 %v8079_v59, %v8079_v59 }
 0x2b8   : > { %v2435_v53 = vadd.f32 %v2307_v17, %v771_v63  ;;  %5333 = vlog2.f32 %v1808_v46  ;;  %v8092_v11 = vadd.f32 %v3458_v16, %v3332_v48  ;;  %v5318_v30 = vpop.eup %5317  ;;  %v1992_v54 = vmul.f32 0.6931472, %v5316_v12  ;;  %v777_v16 = vld [vmem:[%s6678_s14 + $0x230] sm:$0xff] }
 0x2b9   : > { %v2439_v35 = vadd.f32 %v2311_v8, %v775_v56  ;;  %5335 = vpow2.f32 %v1619_v14  ;;  %v1293_v41 = vand.u32 2147483647, %v8074_v45  ;;  %v5320_v5 = vpop.eup %5319  ;;  %v2000_v62 = vmul.f32 0.6931472, %v5318_v30 }
 0x2ba   : > { %v3059_v28 = vmul.f32 %v2435_v53, %v2435_v53  ;;  %5337 = vpow2.f32 %v1627_v25  ;;  %v1297_v38 = vand.u32 2147483647, %v8086_v20  ;;  %v2181_v4 = vadd.f32 %v1992_v54, %v1157_v15 }
 0x2bb   : > { %v5322_v58 = vpop.eup %5321  ;;  %v4556_v60 = vpack.c.bf16 %v2439_v35, %v2435_v53  ;;  %5339 = vlog2.f32 %v2183_v47  ;;  %v1421_v50 = vsub.f32 0.0, %v1293_v41  ;;  %v2185_v46 = vadd.f32 %v2000_v62, %v1161_v40 }
 0x2bc   : > { %v5324_v10 = vpop.eup %5323  ;;  %v3186_v49 = vadd.f32 %v7986_v3, %v3059_v28  ;;  %v2006_v43 = vmul.f32 0.6931472, %v5322_v58  ;;  %v1425_v48 = vsub.f32 0.0, %v1297_v38  ;;  %v3656_v29 = vmul.f32 0.6931472, %v5314_v39  ;;  %v8126_v58 = vld [vmem:[%s6695_s1 + $0x260] sm:$0xff] }
 0x2bd   : > { %v5326_v63 = vpop.eup %5325  ;;  %4557 = vmatpush1.bf16.xpose.msra.mxu1 %v4556_v60  ;;  %v2309_v56 = vmul.f32 %v2181_v4, %v7944_v33  ;;  %5341 = vlog2.f32 %v2181_v4  ;;  %v1806_v47 = vadd.f32 1.0, %v5324_v10  ;;  %v3062_v57 = vmul.f32 %v8025_v31, %v8025_v31  ;;  %v8134_v10 = vld [vmem:[%s6687_s17 + $0x288] sm:$0xff] }
 0x2be   : > { %v3187_v15 = vadd.f32 %v3186_v49, %v8054_v27  ;;  %v2313_v3 = vmul.f32 %v2185_v46, %v7974_v23  ;;  %v2188_v6 = vadd.f32 %v2006_v43, %v1164_v37  ;;  %v5328_v40 = vpop.eup %5327  ;;  %v1810_v14 = vadd.f32 1.0, %v5326_v63  ;;  %v8119_v27 = vld [vmem:[%s6695_s1 + $0x250] sm:$0xff] }
 0x2bf   : > { %v2437_v17 = vadd.f32 %v2309_v56, %v773_v24  ;;  %5343 = vlog2.f32 %v1806_v47  ;;  %v1623_v39 = vmul.f32 1.442695, %v1421_v50  ;;  %v8110_v33 = vmul.f32 0.6931472, %v5320_v5  ;;  %v784_v56 = vld [vmem:[%s6678_s14 + $0x268] sm:$0xff] }
 0x2c0   : > { %v5330_v8 = vpop.eup %5329  ;;  %v2441_v25 = vadd.f32 %v2313_v3, %v777_v16  ;;  %5345 = vlog2.f32 %v2185_v46  ;;  %v1631_v12 = vmul.f32 1.442695, %v1425_v48  ;;  %v8116_v23 = vmul.f32 %v8028_v55, %v8028_v55  ;;  %v8141_v48 = vld [vmem:[%s6687_s17 + $0x2a8] sm:$0xff] }
 0x2c1   : > { %v8112_v31 = vpop.eup %5331  ;;  %v3654_v34 = vmul.f32 0.6931472, %v5330_v8  ;;  %v3061_v37 = vmul.f32 %v2437_v17, %v2437_v17  ;;  %5347 = vlog2.f32 %v1810_v14  ;;  %v3063_v30 = vmul.f32 %v2439_v35, %v2439_v35  ;;  %v780_v35 = vld [vmem:[%s6678_s14 + $0x248] sm:$0xff] }
 0x2c2   : > { %v5334_v53 = vpop.eup %5333  ;;  %v4620_v54 = vpack.c.bf16 %v2441_v25, %v2437_v17  ;;  %v2316_v41 = vmul.f32 %v2188_v6, %v8023_v42  ;;  %v3334_v5 = vmul.f32 %v8119_v27, %v8119_v27  ;;  %5349 = vpow2.f32 %v1623_v39 }
 0x2c3   : > { %v5336_v28 = vpop.eup %5335  ;;  %v3844_v62 = vadd.f32 %v8014_v19, %v3654_v34  ;;  %v3188_v55 = vadd.f32 %v3187_v15, %v3061_v37  ;;  %v2014_v38 = vmul.f32 0.6931472, %v5334_v53  ;;  %v3336_v42 = vmul.f32 %v8126_v58, %v8126_v58  ;;  %v8153_v34 = vld [vmem:[%s6695_s1 + $0x270] sm:$0xff] }
 0x2c4   : > { %v5338_v60 = vpop.eup %5337  ;;  %4621 = vmatpush1.bf16.xpose.msra.mxu0 %v4620_v54  ;;  %v1803_v4 = vadd.f32 1.0, %v5336_v28  ;;  %5351 = vpow2.f32 %v1631_v12  ;;  %v3460_v50 = vadd.f32 %v8092_v11, %v8039_v0  ;;  %v3660_v63 = vmul.f32 0.6931472, %v5328_v40 }
 0x2c5   : > { %v5340_v19 = vpop.eup %5339  ;;  %v3845_v49 = vadd.f32 %v3844_v62, %v3656_v29  ;;  %v3189_v24 = vadd.f32 %v3188_v55, %v3062_v57  ;;  %v8138_v46 = vadd.f32 %v2014_v38, %v1168_v13  ;;  %v1807_v43 = vadd.f32 1.0, %v5338_v60  ;;  %v782_v38 = vld [vmem:[%s6678_s14 + $0x258] sm:$0xff] }
 0x2c6   : > { %v3065_v16 = vmul.f32 %v2441_v25, %v2441_v25  ;;  %5353 = vlog2.f32 %v1803_v4  ;;  %v3461_v47 = vadd.f32 %v3460_v50, %v3334_v5  ;;  %v2444_v11 = vadd.f32 %v2316_v41, %v780_v35 }
 0x2c7   : > { %v5342_v15 = vpop.eup %5341  ;;  %v3190_v3 = vadd.f32 %v3189_v24, %v3063_v30  ;;  %v2320_v0 = vmul.f32 %v8138_v46, %v8034_v2  ;;  %v1300_v29 = vand.u32 2147483647, %v8134_v10  ;;  %5355 = vlog2.f32 %v1807_v43 }
 0x2c8   : > { %v3658_v7 = vmul.f32 0.6931472, %v5342_v15  ;;  %v3462_v13 = vadd.f32 %v3461_v47, %v8083_v21  ;;  %v1304_v57 = vand.u32 2147483647, %v8141_v48  ;;  %5357 = vlog2.f32 %v2188_v6 }
 0x2c9   : > { %v5344_v40 = vpop.eup %5343  ;;  %v3191_v17 = vadd.f32 %v3190_v3, %v8066_v51  ;;  %v8150_v14 = vadd.f32 %v2320_v0, %v784_v56  ;;  %v1428_v39 = vsub.f32 0.0, %v1300_v29  ;;  %v3662_v25 = vmul.f32 0.6931472, %v5340_v19  ;;  %v8183_v0 = vld [vmem:[%s6687_s17 + $0x298] sm:$0xff] }
 0x2ca   : > { %v5346_v8 = vpop.eup %5345  ;;  %v3846_v2 = vadd.f32 %v3845_v49, %v3658_v7  ;;  %v2010_v12 = vmul.f32 0.6931472, %v5344_v40  ;;  %v3463_v37 = vadd.f32 %v3462_v13, %v3336_v42  ;;  %v3338_v54 = vmul.f32 %v8153_v34, %v8153_v34  ;;  %v8187_v13 = vld [vmem:[%s6687_s17 + $0x2b8] sm:$0xff] }
 0x2cb   : > { %v5348_v53 = vpop.eup %5347  ;;  %v3192_v30 = vadd.f32 %v3191_v17, %v3065_v16  ;;  %v4558_v21 = vpack.c.bf16 %v8150_v14, %v2444_v11  ;;  %v1432_v51 = vsub.f32 0.0, %v1304_v57  ;;  %v3668_v55 = vmul.f32 0.6931472, %v8112_v31  ;;  %v779_v57 = vld [vmem:[%s6678_s14 + $0x240] sm:$0xff] }
 0x2cc   : > { %v3847_v41 = vadd.f32 %v3846_v2, %v3660_v63  ;;  %v2018_v6 = vmul.f32 0.6931472, %v5348_v53  ;;  %v2190_v5 = vadd.f32 %v2010_v12, %v1166_v26  ;;  %v3464_v28 = vadd.f32 %v3463_v37, %v8048_v52  ;;  %v5350_v62 = vpop.eup %5349  ;;  %v786_v52 = vld [vmem:[%s6678_s14 + $0x278] sm:$0xff]  ;;  %v8198_v2 = vld [vmem:[%s6687_s17 + $0x280] sm:$0xff] }
 0x2cd   : > { %4559 = vmatprep.subr.bf16.mxu1 %v4558_v21  ;;  %v1163_v60 = vmax.f32 %v8031_v18, 0.0  ;;  %v8165_v35 = vadd.f32 %v3192_v30, %v8116_v23  ;;  %v1637_v4 = vmul.f32 1.442695, %v1428_v39  ;;  %v3666_v50 = vmul.f32 0.6931472, %v5346_v8  ;;  %v8201_v12 = vld [vmem:[%s6687_s17 + $0x2a0] sm:$0xff] }
 0x2ce   : > { %v5352_v42 = vpop.eup %5351  ;;  %v3848_v19 = vadd.f32 %v3847_v41, %v3662_v25  ;;  %v2194_v36 = vadd.f32 %v2018_v6, %v1170_v9  ;;  %v2318_v26 = vmul.f32 %v2190_v5, %v8071_v32  ;;  %v1805_v49 = vadd.f32 1.0, %v5350_v62  ;;  %v783_v30 = vld [vmem:[%s6678_s14 + $0x260] sm:$0xff]  ;;  %v8212_v21 = vld [vmem:[%s6695_s1 + $0x288] sm:$0xff] }
 0x2cf   : > { %v1809_v24 = vadd.f32 1.0, %v5352_v42  ;;  %v8171_v31 = vadd.f32 %v3464_v28, %v3338_v54  ;;  %5359 = vpow2.f32 %v1637_v4  ;;  %v1645_v16 = vmul.f32 1.442695, %v1432_v51 }
 0x2d0   : > { %v5354_v18 = vpop.eup %5353  ;;  %v3849_v23 = vadd.f32 %v3848_v19, %v8110_v33  ;;  %v2322_v43 = vmul.f32 %v2194_v36, %v8079_v59  ;;  %v8175_v63 = vadd.f32 %v2318_v26, %v782_v38  ;;  %v1167_v22 = vmax.f32 %v8042_v61, 0.0 }
 0x2d1   : > { %v2004_v9 = vmul.f32 0.6931472, %v5354_v18  ;;  %v1165_v32 = vmax.f32 %v8074_v45, 0.0  ;;  %5361 = vlog2.f32 %v1805_v49  ;;  %v5356_v56 = vpop.eup %5355  ;;  %v3068_v15 = vmul.f32 %v2444_v11, %v2444_v11  ;;  %v8235_v18 = vld [vmem:[%s6695_s1 + $0x280] sm:$0xff] }
 0x2d2   : > { %v3850_v47 = vadd.f32 %v3849_v23, %v3666_v50  ;;  %v8179_v3 = vadd.f32 %v2322_v43, %v786_v52  ;;  %v1169_v33 = vmax.f32 %v8086_v20, 0.0  ;;  %v5358_v59 = vpop.eup %5357  ;;  %v2012_v29 = vmul.f32 0.6931472, %v5356_v56 }
 0x2d3   : > { %v2187_v7 = vadd.f32 %v2004_v9, %v1163_v60  ;;  %5363 = vlog2.f32 %v1809_v24  ;;  %v1172_v61 = vmax.f32 %v8134_v10, 0.0  ;;  %v1176_v17 = vmax.f32 %v8141_v48, 0.0  ;;  %v8225_v60 = vld [vmem:[%s6695_s1 + $0x2a8] sm:$0xff] }
 0x2d4   : > { %v4622_v11 = vpack.c.bf16 %v8179_v3, %v8175_v63  ;;  %v8192_v40 = vadd.f32 %v3850_v47, %v3668_v55  ;;  %5365 = vpow2.f32 %v1645_v16  ;;  %v2191_v39 = vadd.f32 %v2012_v29, %v1167_v22  ;;  %v8248_v29 = vld [vmem:[%s6687_s17 + $0x290] sm:$0xff] }
 0x2d5   : > { %v2315_v8 = vmul.f32 %v2187_v7, %v8052_v1  ;;  %5367 = vlog2.f32 %v2187_v7  ;;  %v1302_v25 = vand.u32 2147483647, %v8183_v0  ;;  %v8205_v37 = vmul.f32 %v8150_v14, %v8150_v14 }
 0x2d6   : > { %v8207_v53 = vmul.f32 0.6931472, %v5358_v59  ;;  %5369 = vlog2.f32 %v8138_v46  ;;  %4623 = vmatprep.subr.bf16.mxu0 %v4622_v11  ;;  %v1306_v1 = vand.u32 2147483647, %v8187_v13  ;;  %v2319_v54 = vmul.f32 %v2191_v39, %v8126_v58  ;;  %v781_v11 = vld [vmem:[%s6678_s14 + $0x250] sm:$0xff] }
 0x2d7   : > { %v2443_v51 = vadd.f32 %v2315_v8, %v779_v57  ;;  %v8218_v41 = vmul.f32 %v8212_v21, %v8212_v21  ;;  %v1430_v14 = vsub.f32 0.0, %v1302_v25  ;;  %5371 = vlog2.f32 %v2190_v5  ;;  %v785_v8 = vld [vmem:[%s6678_s14 + $0x270] sm:$0xff]  ;;  %v8265_v25 = vld [vmem:[%s6695_s1 + $0x298] sm:$0xff] }
 0x2d8   : > { %v1434_v6 = vsub.f32 0.0, %v1306_v1  ;;  %v1299_v28 = vand.u32 2147483647, %v8198_v2  ;;  %v1303_v46 = vand.u32 2147483647, %v8201_v12  ;;  %5373 = vlog2.f32 %v2194_v36 }
 0x2d9   : > { %v5360_v62 = vpop.eup %5359  ;;  %v8222_v55 = vadd.f32 %v2319_v54, %v783_v30  ;;  %v3067_v38 = vmul.f32 %v2443_v51, %v2443_v51  ;;  %v1641_v58 = vmul.f32 1.442695, %v1430_v14  ;;  %v8229_v42 = vmul.f32 %v8225_v60, %v8225_v60  ;;  %v8274_v14 = vld [vmem:[%s6695_s1 + $0x290] sm:$0xff] }
 0x2da   : > { %v1812_v4 = vadd.f32 1.0, %v5360_v62  ;;  %v1649_v5 = vmul.f32 1.442695, %v1434_v6  ;;  %v1427_v50 = vsub.f32 0.0, %v1299_v28  ;;  %5375 = vlog2.f32 %v2191_v39 }
 0x2db   : > { %v5362_v19 = vpop.eup %5361  ;;  %v4560_v26 = vpack.c.bf16 %v8222_v55, %v2443_v51  ;;  %v3194_v52 = vadd.f32 %v8165_v35, %v3067_v38  ;;  %v1431_v36 = vsub.f32 0.0, %v1303_v46  ;;  %v1174_v24 = vmax.f32 %v8183_v0, 0.0  ;;  %v794_v0 = vld [vmem:[%s6678_s14 + $0x2b8] sm:$0xff] }
 0x2dc   : > { %v2008_v49 = vmul.f32 0.6931472, %v5362_v19  ;;  %5377 = vlog2.f32 %v1812_v4  ;;  %v1635_v23 = vmul.f32 1.442695, %v1427_v50  ;;  %v8239_v16 = vmul.f32 %v8175_v63, %v8175_v63  ;;  %v8251_v63 = vld [vmem:[%s6687_s17 + $0x2b0] sm:$0xff]  ;;  %v8285_v4 = vld [vmem:[%s6687_s17 + $0x2c8] sm:$0xff] }
 0x2dd   : > { %v5364_v43 = vpop.eup %5363  ;;  %4561 = vmatpush1.bf16.xpose.msra.mxu1 %v4560_v26  ;;  %v3195_v22 = vadd.f32 %v3194_v52, %v3068_v15  ;;  %5379 = vpow2.f32 %v1641_v58  ;;  %v3340_v35 = vmul.f32 %v8235_v18, %v8235_v18  ;;  %v3466_v59 = vadd.f32 %v8171_v31, %v8090_v44 }
 0x2de   : > { %v5366_v9 = vpop.eup %5365  ;;  %v2016_v56 = vmul.f32 0.6931472, %v5364_v43  ;;  %v2189_v47 = vadd.f32 %v2008_v49, %v1165_v32  ;;  %5381 = vpow2.f32 %v1649_v5  ;;  %v8255_v7 = vmul.f32 %v8179_v3, %v8179_v3 }
 0x2df   : > { %v5368_v15 = vpop.eup %5367  ;;  %v1816_v57 = vadd.f32 1.0, %v5366_v9  ;;  %5383 = vpow2.f32 %v1635_v23  ;;  %v1643_v45 = vmul.f32 1.442695, %v1431_v36  ;;  %v3467_v3 = vadd.f32 %v3466_v59, %v3340_v35  ;;  %v8293_v35 = vld [vmem:[%s6687_s17 + $0x2e8] sm:$0xff] }
 0x2e0   : > { %v8258_v32 = vpop.eup %5369  ;;  %v3670_v39 = vmul.f32 0.6931472, %v5368_v15  ;;  %v2193_v44 = vadd.f32 %v2016_v56, %v1169_v33  ;;  %v2317_v31 = vmul.f32 %v2189_v47, %v8119_v27  ;;  %5385 = vlog2.f32 %v2189_v47 }
 0x2e1   : > { %5387 = vlog2.f32 %v1816_v57  ;;  %v1301_v30 = vand.u32 2147483647, %v8248_v29  ;;  %v1305_v1 = vand.u32 2147483647, %v8251_v63  ;;  %v5372_v54 = vpop.eup %5371  ;;  %v3343_v27 = vmul.f32 %v8265_v25, %v8265_v25 }
 0x2e2   : > { %v3852_v51 = vadd.f32 %v8192_v40, %v3670_v39  ;;  %v2321_v20 = vmul.f32 %v2193_v44, %v8153_v34  ;;  %v2445_v33 = vadd.f32 %v2317_v31, %v781_v11  ;;  %v8276_v6 = vpop.eup %5373  ;;  %5389 = vlog2.f32 %v2193_v44  ;;  %v8282_v34 = vld [vmem:[%s6695_s1 + $0x2a0] sm:$0xff] }
 0x2e3   : > { %v1429_v28 = vsub.f32 0.0, %v1301_v30  ;;  %v1433_v46 = vsub.f32 0.0, %v1305_v1  ;;  %v3342_v62 = vmul.f32 %v8274_v14, %v8274_v14  ;;  %5391 = vpow2.f32 %v1643_v45  ;;  %v8303_v30 = vld [vmem:[%s6695_s1 + $0x2b0] sm:$0xff] }
 0x2e4   : > { %v2449_v38 = vadd.f32 %v2321_v20, %v785_v8  ;;  %v3069_v58 = vmul.f32 %v2445_v33, %v2445_v33  ;;  %v3853_v40 = vadd.f32 %v3852_v51, %v8207_v53  ;;  %v5376_v5 = vpop.eup %5375  ;;  %v3676_v50 = vmul.f32 0.6931472, %v5372_v54 }
 0x2e5   : > { %v1639_v19 = vmul.f32 1.442695, %v1429_v28  ;;  %v1647_v26 = vmul.f32 1.442695, %v1433_v46  ;;  %v3468_v52 = vadd.f32 %v3467_v3, %v8218_v41  ;;  %v3071_v49 = vmul.f32 %v8222_v55, %v8222_v55 }
 0x2e6   : > { %v5378_v36 = vpop.eup %5377  ;;  %v4624_v23 = vpack.c.bf16 %v2449_v38, %v2445_v33  ;;  %v3196_v43 = vadd.f32 %v3195_v22, %v3069_v58  ;;  %v3344_v53 = vmul.f32 %v8282_v34, %v8282_v34  ;;  %v3073_v56 = vmul.f32 %v2449_v38, %v2449_v38  ;;  %v788_v38 = vld [vmem:[%s6678_s14 + $0x288] sm:$0xff] }
 0x2e7   : > { %v5380_v9 = vpop.eup %5379  ;;  %v2022_v47 = vmul.f32 0.6931472, %v5378_v36  ;;  %5393 = vpow2.f32 %v1639_v19  ;;  %v3469_v59 = vadd.f32 %v3468_v52, %v3342_v62  ;;  %v1308_v55 = vand.u32 2147483647, %v8285_v4 }
 0x2e8   : > { %v5382_v15 = vpop.eup %5381  ;;  %4625 = vmatpush1.bf16.xpose.msra.mxu0 %v4624_v23  ;;  %v3197_v41 = vadd.f32 %v3196_v43, %v8239_v16  ;;  %v1814_v11 = vadd.f32 1.0, %v5380_v9  ;;  %5395 = vpow2.f32 %v1647_v26  ;;  %v1312_v44 = vand.u32 2147483647, %v8293_v35 }
 0x2e9   : > { %v5384_v22 = vpop.eup %5383  ;;  %v8299_v57 = vadd.f32 %v2022_v47, %v1172_v61  ;;  %v1818_v45 = vadd.f32 1.0, %v5382_v15  ;;  %v3470_v39 = vadd.f32 %v3469_v59, %v3343_v27  ;;  %v1436_v16 = vsub.f32 0.0, %v1308_v55 }
 0x2ea   : > { %v5386_v31 = vpop.eup %5385  ;;  %v3198_v8 = vadd.f32 %v3197_v41, %v3071_v49  ;;  %5397 = vlog2.f32 %v1814_v11  ;;  %v1811_v3 = vadd.f32 1.0, %v5384_v22  ;;  %v3346_v10 = vmul.f32 %v8303_v30, %v8303_v30  ;;  %v792_v49 = vld [vmem:[%s6678_s14 + $0x2a8] sm:$0xff]  ;;  %v8333_v41 = vld [vmem:[%s6687_s17 + $0x2f8] sm:$0xff] }
 0x2eb   : > { %v5388_v1 = vpop.eup %5387  ;;  %v3674_v54 = vmul.f32 0.6931472, %v5386_v31  ;;  %v2324_v51 = vmul.f32 %v8299_v57, %v8212_v21  ;;  %v3471_v61 = vadd.f32 %v3470_v39, %v3344_v53  ;;  %5399 = vlog2.f32 %v1818_v45  ;;  %v1050_v53 = vld [vmem:[%s6695_s1 + $0x2b8] sm:$0xff] }
 0x2ec   : > { %v3199_v20 = vadd.f32 %v3198_v8, %v8205_v37  ;;  %v2030_v33 = vmul.f32 0.6931472, %v5388_v1  ;;  %v1440_v27 = vsub.f32 0.0, %v1312_v44  ;;  %v5390_v28 = vpop.eup %5389  ;;  %v3678_v46 = vmul.f32 0.6931472, %v5376_v5 }
 0x2ed   : > { %v3854_v62 = vadd.f32 %v3853_v40, %v3674_v54  ;;  %5401 = vlog2.f32 %v1811_v3  ;;  %v3472_v58 = vadd.f32 %v3471_v61, %v8229_v42  ;;  %v5392_v19 = vpop.eup %5391  ;;  %v3680_v21 = vmul.f32 0.6931472, %v8258_v32  ;;  %v790_v54 = vld [vmem:[%s6678_s14 + $0x298] sm:$0xff] }
 0x2ee   : > { %v3200_v26 = vadd.f32 %v3199_v20, %v3073_v56  ;;  %v2200_v52 = vadd.f32 %v2030_v33, %v1176_v17  ;;  %v1653_v37 = vmul.f32 1.442695, %v1436_v16  ;;  %v1178_v23 = vmax.f32 %v8187_v13, 0.0  ;;  %v8349_v33 = vld [vmem:[%s6687_s17 + $0x2c0] sm:$0xff] }
 0x2ef   : > { %v3855_v36 = vadd.f32 %v3854_v62, %v3676_v50  ;;  %v1815_v5 = vadd.f32 1.0, %v5392_v19  ;;  %v8317_v40 = vadd.f32 %v3472_v58, %v3346_v10  ;;  %v2452_v42 = vadd.f32 %v2324_v51, %v788_v38  ;;  %v8327_v50 = vld [vmem:[%s6687_s17 + $0x2d8] sm:$0xff] }
 0x2f0   : > { %v2328_v43 = vmul.f32 %v2200_v52, %v8225_v60  ;;  %v8322_v32 = vadd.f32 %v3200_v26, %v8255_v7  ;;  %v1661_v9 = vmul.f32 1.442695, %v1440_v27  ;;  %v3682_v17 = vmul.f32 0.6931472, %v5390_v28  ;;  %v8353_v28 = vld [vmem:[%s6687_s17 + $0x2e0] sm:$0xff] }
 0x2f1   : > { %v5394_v48 = vpop.eup %5393  ;;  %v3856_v56 = vadd.f32 %v3855_v36, %v3678_v46  ;;  %v8324_v47 = vmul.f32 %v1050_v53, %v1050_v53  ;;  %5403 = vlog2.f32 %v1815_v5  ;;  %v1171_v60 = vmax.f32 %v8198_v2, 0.0 }
 0x2f2   : > { %v5396_v13 = vpop.eup %5395  ;;  %v8329_v59 = vadd.f32 %v2328_v43, %v792_v49  ;;  %v1813_v15 = vadd.f32 1.0, %v5394_v48  ;;  %5405 = vpow2.f32 %v1653_v37  ;;  %v3684_v7 = vmul.f32 0.6931472, %v8276_v6  ;;  %v787_v37 = vld [vmem:[%s6678_s14 + $0x280] sm:$0xff]  ;;  %v8365_v43 = vld [vmem:[%s6695_s1 + $0x2c8] sm:$0xff] }
 0x2f3   : > { %v3857_v11 = vadd.f32 %v3856_v56, %v3680_v21  ;;  %v1817_v55 = vadd.f32 1.0, %v5396_v13  ;;  %5407 = vpow2.f32 %v1661_v9  ;;  %v1175_v39 = vmax.f32 %v8201_v12, 0.0 }
 0x2f4   : > { %v5398_v22 = vpop.eup %5397  ;;  %v4562_v45 = vpack.c.bf16 %v8329_v59, %v2452_v42  ;;  %5409 = vlog2.f32 %v1813_v15  ;;  %v1310_v44 = vand.u32 2147483647, %v8327_v50  ;;  %v1314_v8 = vand.u32 2147483647, %v8333_v41 }
 0x2f5   : > { %v3858_v31 = vadd.f32 %v3857_v11, %v3682_v17  ;;  %v2026_v2 = vmul.f32 0.6931472, %v5398_v22  ;;  %5411 = vlog2.f32 %v1817_v55  ;;  %v5400_v3 = vpop.eup %5399  ;;  %v1173_v6 = vmax.f32 %v8248_v29, 0.0  ;;  %v791_v11 = vld [vmem:[%s6678_s14 + $0x2a0] sm:$0xff] }
 0x2f6   : > { %4563 = vmatprep.subr.bf16.mxu1 %v4562_v45  ;;  %5413 = vlog2.f32 %v8299_v57  ;;  %v1177_v16 = vmax.f32 %v8251_v63, 0.0  ;;  %v1438_v1 = vsub.f32 0.0, %v1310_v44  ;;  %v2034_v51 = vmul.f32 0.6931472, %v5400_v3 }
 0x2f7   : > { %v5402_v12 = vpop.eup %5401  ;;  %v2198_v10 = vadd.f32 %v2026_v2, %v1174_v24  ;;  %v8346_v61 = vadd.f32 %v3858_v31, %v3684_v7  ;;  %v1442_v20 = vsub.f32 0.0, %v1314_v8  ;;  %5415 = vlog2.f32 %v2200_v52 }
 0x2f8   : > { %v2020_v27 = vmul.f32 0.6931472, %v5402_v12  ;;  %v1180_v57 = vmax.f32 %v8285_v4, 0.0  ;;  %v1657_v29 = vmul.f32 1.442695, %v1438_v1  ;;  %v2202_v46 = vadd.f32 %v2034_v51, %v1178_v23  ;;  %v789_v51 = vld [vmem:[%s6678_s14 + $0x290] sm:$0xff] }
 0x2f9   : > { %v2326_v62 = vmul.f32 %v2198_v10, %v8265_v25  ;;  %5417 = vlog2.f32 %v2198_v10  ;;  %v1665_v38 = vmul.f32 1.442695, %v1442_v20  ;;  %v1184_v58 = vmax.f32 %v8293_v35, 0.0 }
 0x2fa   : > { %v2195_v24 = vadd.f32 %v2020_v27, %v1171_v60  ;;  %5419 = vpow2.f32 %v1657_v29  ;;  %v1307_v19 = vand.u32 2147483647, %v8349_v33  ;;  %v2330_v26 = vmul.f32 %v2202_v46, %v1050_v53  ;;  %v793_v29 = vld [vmem:[%s6678_s14 + $0x2b0] sm:$0xff] }
 0x2fb   : > { %v5404_v21 = vpop.eup %5403  ;;  %v8359_v52 = vadd.f32 %v2326_v62, %v790_v54  ;;  %5421 = vlog2.f32 %v2202_v46  ;;  %v1311_v36 = vand.u32 2147483647, %v8353_v28  ;;  %v3076_v25 = vmul.f32 %v2452_v42, %v2452_v42  ;;  %v8395_v62 = vld [vmem:[%s6695_s1 + $0x2c0] sm:$0xff] }
 0x2fc   : > { %v5406_v49 = vpop.eup %5405  ;;  %v2028_v23 = vmul.f32 0.6931472, %v5404_v21  ;;  %v2323_v5 = vmul.f32 %v2195_v24, %v8235_v18  ;;  %5423 = vlog2.f32 %v2195_v24  ;;  %v8367_v48 = vadd.f32 %v2330_v26, %v794_v0 }
 0x2fd   : > { %v5408_v9 = vpop.eup %5407  ;;  %v1820_v17 = vadd.f32 1.0, %v5406_v49  ;;  %v8371_v53 = vmul.f32 %v8365_v43, %v8365_v43  ;;  %5425 = vpow2.f32 %v1665_v38  ;;  %v1435_v15 = vsub.f32 0.0, %v1307_v19 }
 0x2fe   : > { %v5410_v56 = vpop.eup %5409  ;;  %v2199_v13 = vadd.f32 %v2028_v23, %v1175_v39  ;;  %v2451_v42 = vadd.f32 %v2323_v5, %v787_v37  ;;  %v1824_v60 = vadd.f32 1.0, %v5408_v9  ;;  %v4626_v18 = vpack.c.bf16 %v8367_v48, %v8359_v52  ;;  %v8378_v39 = vld [vmem:[%s6695_s1 + $0x2e8] sm:$0xff] }
 0x2ff   : > { %v5412_v7 = vpop.eup %5411  ;;  %v2024_v55 = vmul.f32 0.6931472, %v5410_v56  ;;  %5427 = vlog2.f32 %v1820_v17  ;;  %v1439_v22 = vsub.f32 0.0, %v1311_v36  ;;  %v8382_v3 = vmul.f32 %v8378_v39, %v8378_v39 }
 0x300   : > { %v5414_v45 = vpop.eup %5413  ;;  %v2327_v44 = vmul.f32 %v2199_v13, %v8282_v34  ;;  %v3075_v31 = vmul.f32 %v2451_v42, %v2451_v42  ;;  %5429 = vlog2.f32 %v2199_v13  ;;  %v2032_v2 = vmul.f32 0.6931472, %v5412_v7  ;;  %4627 = vmatprep.subr.bf16.mxu0 %v4626_v18 }
 0x301   : > { %v2197_v8 = vadd.f32 %v2024_v55, %v1173_v6  ;;  %5431 = vlog2.f32 %v1824_v60  ;;  %v1182_v1 = vmax.f32 %v8327_v50, 0.0  ;;  %v8385_v12 = vpop.eup %5415  ;;  %v1651_v20 = vmul.f32 1.442695, %v1435_v15  ;;  %v8416_v15 = vld [vmem:[%s6695_s1 + $0x2d8] sm:$0xff] }
 0x302   : > { %v2455_v54 = vadd.f32 %v2327_v44, %v791_v11  ;;  %v3202_v34 = vadd.f32 %v8322_v32, %v3075_v31  ;;  %v2201_v10 = vadd.f32 %v2032_v2, %v1177_v16  ;;  %v1186_v46 = vmax.f32 %v8333_v41, 0.0 }
 0x303   : > { %v5418_v27 = vpop.eup %5417  ;;  %v2325_v6 = vmul.f32 %v2197_v8, %v8274_v14  ;;  %5433 = vlog2.f32 %v2197_v8  ;;  %v3474_v38 = vadd.f32 %v8317_v40, %v8324_v47  ;;  %v1659_v63 = vmul.f32 1.442695, %v1439_v22  ;;  %v8422_v22 = vld [vmem:[%s6695_s1 + $0x2d0] sm:$0xff] }
 0x304   : > { %v5420_v0 = vpop.eup %5419  ;;  %v4564_v32 = vpack.c.bf16 %v2455_v54, %v2451_v42  ;;  %v2329_v24 = vmul.f32 %v2201_v10, %v8303_v30  ;;  %v3348_v16 = vmul.f32 %v8395_v62, %v8395_v62  ;;  %v3203_v21 = vadd.f32 %v3202_v34, %v3076_v25  ;;  %v8407_v30 = vld [vmem:[%s6687_s17 + $0x2d0] sm:$0xff] }
 0x305   : > { %v8402_v19 = vpop.eup %5421  ;;  %v2453_v14 = vadd.f32 %v2325_v6, %v789_v51  ;;  %5435 = vlog2.f32 %v2201_v10  ;;  %v1822_v26 = vadd.f32 1.0, %v5420_v0  ;;  %v3080_v40 = vmul.f32 %v8329_v59, %v8329_v59  ;;  %v8412_v25 = vld [vmem:[%s6687_s17 + $0x2f0] sm:$0xff] }
 0x306   : > { %v5424_v37 = vpop.eup %5423  ;;  %v3688_v47 = vmul.f32 0.6931472, %v5414_v45  ;;  %4565 = vmatpush1.bf16.xpose.msra.mxu1 %v4564_v32  ;;  %v2457_v36 = vadd.f32 %v2329_v24, %v793_v29  ;;  %5437 = vpow2.f32 %v1651_v20  ;;  %v3078_v23 = vmul.f32 %v8359_v52, %v8359_v52 }
 0x307   : > { %v5426_v49 = vpop.eup %5425  ;;  %v3686_v5 = vmul.f32 0.6931472, %v5424_v37  ;;  %v3077_v9 = vmul.f32 %v2453_v14, %v2453_v14  ;;  %5439 = vlog2.f32 %v1822_v26  ;;  %v3079_v17 = vmul.f32 %v2455_v54, %v2455_v54 }
 0x308   : > { %v4628_v56 = vpack.c.bf16 %v2457_v36, %v2453_v14  ;;  %v1826_v59 = vadd.f32 1.0, %v5426_v49  ;;  %5441 = vpow2.f32 %v1659_v63  ;;  %v3475_v7 = vadd.f32 %v3474_v38, %v3348_v16  ;;  %v796_v38 = vld [vmem:[%s6678_s14 + $0x2c8] sm:$0xff] }
 0x309   : > { %v5428_v13 = vpop.eup %5427  ;;  %v3860_v42 = vadd.f32 %v8346_v61, %v3686_v5  ;;  %v3204_v60 = vadd.f32 %v3203_v21, %v3077_v9  ;;  %v1309_v18 = vand.u32 2147483647, %v8407_v30  ;;  %v3351_v55 = vmul.f32 %v8416_v15, %v8416_v15  ;;  %v800_v14 = vld [vmem:[%s6678_s14 + $0x2e8] sm:$0xff] }
 0x30a   : > { %v5430_v52 = vpop.eup %5429  ;;  %4629 = vmatpush1.bf16.xpose.msra.mxu0 %v4628_v56  ;;  %v2038_v11 = vmul.f32 0.6931472, %v5428_v13  ;;  %5443 = vlog2.f32 %v1826_v59  ;;  %v1313_v45 = vand.u32 2147483647, %v8412_v25  ;;  %v3350_v8 = vmul.f32 %v8422_v22, %v8422_v22 }
 0x30b   : > { %v5432_v44 = vpop.eup %5431  ;;  %v3205_v61 = vadd.f32 %v3204_v60, %v3078_v23  ;;  %v3861_v31 = vadd.f32 %v3860_v42, %v3688_v47  ;;  %v1437_v2 = vsub.f32 0.0, %v1309_v18  ;;  %v3082_v54 = vmul.f32 %v8367_v48, %v8367_v48  ;;  %v8457_v60 = vld [vmem:[%s6687_s17 + $0x308] sm:$0xff] }
 0x30c   : > { %v3692_v34 = vmul.f32 0.6931472, %v5418_v27  ;;  %v2046_v51 = vmul.f32 0.6931472, %v5432_v44  ;;  %v8431_v10 = vadd.f32 %v2038_v11, %v1180_v57  ;;  %v3081_v29 = vmul.f32 %v2457_v36, %v2457_v36  ;;  %v8442_v27 = vld [vmem:[%s6695_s1 + $0x2e0] sm:$0xff] }
 0x30d   : > { %v5434_v20 = vpop.eup %5433  ;;  %v3206_v6 = vadd.f32 %v3205_v61, %v3079_v17  ;;  %v1655_v0 = vmul.f32 1.442695, %v1437_v2  ;;  %v3476_v32 = vadd.f32 %v3475_v7, %v8371_v53  ;;  %v1441_v4 = vsub.f32 0.0, %v1313_v45  ;;  %v798_v2 = vld [vmem:[%s6678_s14 + $0x2d8] sm:$0xff] }
 0x30e   : > { %v3690_v24 = vmul.f32 0.6931472, %v5434_v20  ;;  %v8437_v63 = vadd.f32 %v2046_v51, %v1184_v58  ;;  %v2332_v48 = vmul.f32 %v8431_v10, %v8365_v43  ;;  %v3352_v21 = vmul.f32 %v8442_v27, %v8442_v27 }
 0x30f   : > { %v5436_v57 = vpop.eup %5435  ;;  %v3207_v16 = vadd.f32 %v3206_v6, %v3080_v40  ;;  %5445 = vpow2.f32 %v1655_v0  ;;  %v3477_v26 = vadd.f32 %v3476_v32, %v3350_v8  ;;  %v3694_v37 = vmul.f32 0.6931472, %v5430_v52  ;;  %v1058_v8 = vld [vmem:[%s6695_s1 + $0x2f8] sm:$0xff]  ;;  %v8479_v0 = vld [vmem:[%s6687_s17 + $0x318] sm:$0xff] }
 0x310   : > { %v5438_v53 = vpop.eup %5437  ;;  %v3862_v47 = vadd.f32 %v3861_v31, %v3690_v24  ;;  %v2336_v35 = vmul.f32 %v8437_v63, %v8378_v39  ;;  %v8449_v58 = vadd.f32 %v2332_v48, %v796_v38  ;;  %v3696_v36 = vmul.f32 0.6931472, %v8385_v12  ;;  %v8485_v32 = vld [vmem:[%s6687_s17 + $0x338] sm:$0xff] }
 0x311   : > { %v5440_v43 = vpop.eup %5439  ;;  %v3208_v49 = vadd.f32 %v3207_v16, %v3081_v29  ;;  %v1819_v40 = vadd.f32 1.0, %v5438_v53  ;;  %v3478_v23 = vadd.f32 %v3477_v26, %v3351_v55  ;;  %v1663_v59 = vmul.f32 1.442695, %v1441_v4  ;;  %v8464_v55 = vld [vmem:[%s6687_s17 + $0x328] sm:$0xff] }
 0x312   : > { %v5442_v5 = vpop.eup %5441  ;;  %v3863_v9 = vadd.f32 %v3862_v47, %v3692_v34  ;;  %v8452_v17 = vadd.f32 %v2336_v35, %v800_v14  ;;  %v2042_v56 = vmul.f32 0.6931472, %v5440_v43  ;;  %v3698_v7 = vmul.f32 0.6931472, %v5436_v57  ;;  %v8492_v14 = vld [vmem:[%s6695_s1 + $0x2f0] sm:$0xff]  ;;  %v8501_v47 = vld [vmem:[%s6687_s17 + $0x300] sm:$0xff] }
 0x313   : > { %v1823_v13 = vadd.f32 1.0, %v5442_v5  ;;  %5447 = vlog2.f32 %v1819_v40  ;;  %v8454_v39 = vadd.f32 %v3208_v49, %v3082_v54  ;;  %v3479_v42 = vadd.f32 %v3478_v23, %v3352_v21  ;;  %v8505_v43 = vld [vmem:[%s6687_s17 + $0x320] sm:$0xff] }
 0x314   : > { %v5444_v12 = vpop.eup %5443  ;;  %v3864_v18 = vadd.f32 %v3863_v9, %v3694_v37  ;;  %v4566_v52 = vpack.c.bf16 %v8452_v17, %v8449_v58  ;;  %v2206_v11 = vadd.f32 %v2042_v56, %v1182_v1  ;;  %v3700_v61 = vmul.f32 0.6931472, %v8402_v19 }
 0x315   : > { %v2050_v45 = vmul.f32 0.6931472, %v5444_v12  ;;  %5449 = vlog2.f32 %v1823_v13  ;;  %v3480_v44 = vadd.f32 %v3479_v42, %v8382_v3  ;;  %v1316_v34 = vand.u32 2147483647, %v8457_v60  ;;  %v802_v3 = vld [vmem:[%s6678_s14 + $0x2f8] sm:$0xff]  ;;  %v795_v13 = vld [vmem:[%s6678_s14 + $0x2c0] sm:$0xff] }
 0x316   : > { %v3865_v31 = vadd.f32 %v3864_v18, %v3696_v36  ;;  %4567 = vmatprep.subr.bf16.mxu1 %v4566_v52  ;;  %v2334_v54 = vmul.f32 %v2206_v11, %v8416_v15  ;;  %5451 = vpow2.f32 %v1663_v59  ;;  %v1320_v1 = vand.u32 2147483647, %v8464_v55 }
 0x317   : > { %v2210_v50 = vadd.f32 %v2050_v45, %v1186_v46  ;;  %v1444_v20 = vsub.f32 0.0, %v1316_v34  ;;  %5453 = vlog2.f32 %v8431_v10  ;;  %v3355_v48 = vmul.f32 %v1058_v8, %v1058_v8 }
 0x318   : > { %v3866_v51 = vadd.f32 %v3865_v31, %v3698_v7  ;;  %v8476_v6 = vadd.f32 %v2334_v54, %v798_v2  ;;  %v1448_v38 = vsub.f32 0.0, %v1320_v1  ;;  %v1179_v57 = vmax.f32 %v8349_v33, 0.0 }
 0x319   : > { %v5446_v19 = vpop.eup %5445  ;;  %v2338_v29 = vmul.f32 %v2210_v50, %v1058_v8  ;;  %v1669_v46 = vmul.f32 1.442695, %v1444_v20  ;;  %v1183_v16 = vmax.f32 %v8353_v28, 0.0  ;;  %v1318_v10 = vand.u32 2147483647, %v8479_v0  ;;  %v8525_v20 = vld [vmem:[%s6695_s1 + $0x308] sm:$0xff] }
 0x31a   : > { %v8482_v15 = vadd.f32 %v3866_v51, %v3700_v61  ;;  %v1821_v41 = vadd.f32 1.0, %v5446_v19  ;;  %v1677_v4 = vmul.f32 1.442695, %v1448_v38  ;;  %v3354_v53 = vmul.f32 %v8492_v14, %v8492_v14  ;;  %v799_v61 = vld [vmem:[%s6678_s14 + $0x2e0] sm:$0xff] }
 0x31b   : > { %v8487_v24 = vadd.f32 %v2338_v29, %v802_v3  ;;  %v1322_v37 = vand.u32 2147483647, %v8485_v32  ;;  %v1181_v28 = vmax.f32 %v8407_v30, 0.0  ;;  %v1446_v35 = vsub.f32 0.0, %v1318_v10 }
 0x31c   : > { %5455 = vlog2.f32 %v1821_v41  ;;  %v1185_v49 = vmax.f32 %v8412_v25, 0.0  ;;  %v1188_v40 = vmax.f32 %v8457_v60, 0.0  ;;  %v1315_v30 = vand.u32 2147483647, %v8501_v47  ;;  %v8536_v41 = vld [vmem:[%s6687_s17 + $0x330] sm:$0xff] }
 0x31d   : > { %v5448_v21 = vpop.eup %5447  ;;  %v4630_v26 = vpack.c.bf16 %v8487_v24, %v8476_v6  ;;  %5457 = vpow2.f32 %v1669_v46  ;;  %v1450_v23 = vsub.f32 0.0, %v1322_v37  ;;  %v1673_v56 = vmul.f32 1.442695, %v1446_v35  ;;  %v797_v37 = vld [vmem:[%s6678_s14 + $0x2d0] sm:$0xff] }
 0x31e   : > { %v2036_v33 = vmul.f32 0.6931472, %v5448_v21  ;;  %5459 = vpow2.f32 %v1677_v4  ;;  %v3481_v42 = vadd.f32 %v3480_v44, %v3354_v53  ;;  %v1319_v7 = vand.u32 2147483647, %v8505_v43  ;;  %v8544_v35 = vld [vmem:[%s6695_s1 + $0x328] sm:$0xff] }
 0x31f   : > { %v5450_v36 = vpop.eup %5449  ;;  %5461 = vlog2.f32 %v8437_v63  ;;  %4631 = vmatprep.subr.bf16.mxu0 %v4630_v26  ;;  %v1681_v12 = vmul.f32 1.442695, %v1450_v23  ;;  %v3084_v45 = vmul.f32 %v8449_v58, %v8449_v58  ;;  %v1443_v31 = vsub.f32 0.0, %v1315_v30 }
 0x320   : > { %v2044_v5 = vmul.f32 0.6931472, %v5450_v36  ;;  %v2203_v9 = vadd.f32 %v2036_v33, %v1179_v57  ;;  %v5452_v59 = vpop.eup %5451  ;;  %5463 = vlog2.f32 %v2206_v11  ;;  %v1447_v2 = vsub.f32 0.0, %v1319_v7 }
 0x321   : > { %v1825_v52 = vadd.f32 1.0, %v5452_v59  ;;  %v5454_v11 = vpop.eup %5453  ;;  %v8519_v44 = vmul.f32 %v8452_v17, %v8452_v17  ;;  %v1667_v54 = vmul.f32 1.442695, %v1443_v31  ;;  %v8522_v58 = vadd.f32 %v3481_v42, %v3355_v48  ;;  %v8529_v17 = vld [vmem:[%s6687_s17 + $0x310] sm:$0xff] }
 0x322   : > { %v2207_v63 = vadd.f32 %v2044_v5, %v1183_v16  ;;  %v2331_v18 = vmul.f32 %v2203_v9, %v8395_v62  ;;  %5465 = vlog2.f32 %v2203_v9  ;;  %v1675_v34 = vmul.f32 1.442695, %v1447_v2 }
 0x323   : > { %5467 = vpow2.f32 %v1673_v56  ;;  %v1192_v19 = vmax.f32 %v8464_v55, 0.0  ;;  %v3704_v29 = vmul.f32 0.6931472, %v5454_v11  ;;  %v8533_v38 = vmul.f32 %v8525_v20, %v8525_v20 }
 0x324   : > { %5469 = vlog2.f32 %v2210_v50  ;;  %v2335_v8 = vmul.f32 %v2207_v63, %v8442_v27  ;;  %v2459_v62 = vadd.f32 %v2331_v18, %v795_v13  ;;  %v1317_v26 = vand.u32 2147483647, %v8529_v17 }
 0x325   : > { %5471 = vlog2.f32 %v1825_v52  ;;  %v3086_v53 = vmul.f32 %v8476_v6, %v8476_v6  ;;  %v8550_v23 = vmul.f32 %v8544_v35, %v8544_v35  ;;  %v8553_v6 = vld [vmem:[%s6687_s17 + $0x348] sm:$0xff]  ;;  %v1190_v30 = vmax.f32 %v8479_v0, 0.0 }
 0x326   : > { %v5456_v1 = vpop.eup %5455  ;;  %v2463_v51 = vadd.f32 %v2335_v8, %v799_v61  ;;  %v3083_v3 = vmul.f32 %v2459_v62, %v2459_v62  ;;  %5473 = vpow2.f32 %v1681_v12  ;;  %v1445_v5 = vsub.f32 0.0, %v1317_v26  ;;  %v8571_v61 = vld [vmem:[%s6695_s1 + $0x300] sm:$0xff] }
 0x327   : > { %v5458_v50 = vpop.eup %5457  ;;  %v2040_v27 = vmul.f32 0.6931472, %v5456_v1  ;;  %5475 = vpow2.f32 %v1667_v54  ;;  %v8568_v52 = vmul.f32 %v8487_v24, %v8487_v24  ;;  %v1324_v2 = vand.u32 2147483647, %v8553_v6 }
 0x328   : > { %v5460_v46 = vpop.eup %5459  ;;  %v4568_v48 = vpack.c.bf16 %v2463_v51, %v2459_v62  ;;  %v3210_v4 = vadd.f32 %v8454_v39, %v3083_v3  ;;  %5477 = vlog2.f32 %v2207_v63  ;;  %v1828_v57 = vadd.f32 1.0, %v5458_v50  ;;  %v8562_v63 = vld [vmem:[%s6687_s17 + $0x368] sm:$0xff] }
 0x329   : > { %v5462_v16 = vpop.eup %5461  ;;  %v2205_v10 = vadd.f32 %v2040_v27, %v1181_v28  ;;  %v1832_v21 = vadd.f32 1.0, %v5460_v46  ;;  %5479 = vpow2.f32 %v1675_v34  ;;  %v1321_v39 = vand.u32 2147483647, %v8536_v41 }
 0x32a   : > { %4569 = vmatpush1.bf16.xpose.msra.mxu1 %v4568_v48  ;;  %v3211_v33 = vadd.f32 %v3210_v4, %v3084_v45  ;;  %5481 = vlog2.f32 %v1828_v57  ;;  %v5464_v36 = vpop.eup %5463  ;;  %v8555_v56 = vmul.f32 0.6931472, %v5462_v16  ;;  %v1671_v7 = vmul.f32 1.442695, %v1445_v5  ;;  %v8581_v48 = vld [vmem:[%s6695_s1 + $0x318] sm:$0xff] }
 0x32b   : > { %v2333_v28 = vmul.f32 %v2205_v10, %v8422_v22  ;;  %5483 = vlog2.f32 %v2205_v10  ;;  %v1449_v59 = vsub.f32 0.0, %v1321_v39  ;;  %v1194_v22 = vmax.f32 %v8485_v32, 0.0 }
 0x32c   : > { %v5466_v9 = vpop.eup %5465  ;;  %5485 = vlog2.f32 %v1832_v21  ;;  %v3356_v54 = vmul.f32 %v8571_v61, %v8571_v61  ;;  %v3087_v24 = vmul.f32 %v2463_v51, %v2463_v51  ;;  %v1328_v3 = vand.u32 2147483647, %v8562_v63 }
 0x32d   : > { %v5468_v13 = vpop.eup %5467  ;;  %v3702_v42 = vmul.f32 0.6931472, %v5466_v9  ;;  %v8558_v12 = vadd.f32 %v2333_v28, %v797_v37  ;;  %v1679_v31 = vmul.f32 1.442695, %v1449_v59  ;;  %5487 = vpow2.f32 %v1671_v7  ;;  %v801_v37 = vld [vmem:[%s6678_s14 + $0x2f0] sm:$0xff] }
 0x32e   : > { %v8564_v18 = vpop.eup %5469  ;;  %v1830_v45 = vadd.f32 1.0, %v5468_v13  ;;  %v8587_v16 = vmul.f32 %v8581_v48, %v8581_v48  ;;  %v1452_v10 = vsub.f32 0.0, %v1324_v2  ;;  %v3708_v26 = vmul.f32 0.6931472, %v5464_v36 }
 0x32f   : > { %v5472_v11 = vpop.eup %5471  ;;  %v3868_v8 = vadd.f32 %v8482_v15, %v3702_v42  ;;  %v3085_v62 = vmul.f32 %v8558_v12, %v8558_v12  ;;  %v1456_v25 = vsub.f32 0.0, %v1328_v3 }
 0x330   : > { %v5474_v34 = vpop.eup %5473  ;;  %v2048_v1 = vmul.f32 0.6931472, %v5472_v11  ;;  %5489 = vlog2.f32 %v1830_v45  ;;  %v1685_v13 = vmul.f32 1.442695, %v1452_v10 }
 0x331   : > { %v5476_v50 = vpop.eup %5475  ;;  %v3212_v27 = vadd.f32 %v3211_v33, %v3085_v62  ;;  %v3869_v46 = vadd.f32 %v3868_v8, %v3704_v29  ;;  %v1834_v15 = vadd.f32 1.0, %v5474_v34  ;;  %5491 = vpow2.f32 %v1679_v31  ;;  %v804_v8 = vld [vmem:[%s6678_s14 + $0x308] sm:$0xff]  ;;  %v8598_v62 = vld [vmem:[%s6695_s1 + $0x310] sm:$0xff] }
 0x332   : > { %v5478_v4 = vpop.eup %5477  ;;  %v2209_v57 = vadd.f32 %v2048_v1, %v1185_v49  ;;  %v1827_v51 = vadd.f32 1.0, %v5476_v50  ;;  %v3483_v29 = vadd.f32 %v8522_v58, %v3356_v54  ;;  %v1693_v54 = vmul.f32 1.442695, %v1456_v25  ;;  %v808_v50 = vld [vmem:[%s6678_s14 + $0x328] sm:$0xff] }
 0x333   : > { %v5480_v21 = vpop.eup %5479  ;;  %v3213_v39 = vadd.f32 %v3212_v27, %v3086_v53  ;;  %5493 = vlog2.f32 %v1834_v15  ;;  %v3710_v36 = vmul.f32 0.6931472, %v5478_v4  ;;  %v3358_v60 = vmul.f32 %v8598_v62, %v8598_v62 }
 0x334   : > { %v5482_v33 = vpop.eup %5481  ;;  %v2337_v28 = vmul.f32 %v2209_v57, %v8492_v14  ;;  %5495 = vlog2.f32 %v2209_v57  ;;  %v1831_v5 = vadd.f32 1.0, %v5480_v21  ;;  %v1187_v15 = vmax.f32 %v8501_v47, 0.0  ;;  %v8624_v47 = vld [vmem:[%s6687_s17 + $0x358] sm:$0xff] }
 0x335   : > { %v5484_v49 = vpop.eup %5483  ;;  %v3214_v9 = vadd.f32 %v3213_v39, %v3087_v24  ;;  %v2054_v59 = vmul.f32 0.6931472, %v5482_v33  ;;  %5497 = vlog2.f32 %v1827_v51  ;;  %v3716_v25 = vmul.f32 0.6931472, %v8564_v18 }
 0x336   : > { %v5486_v42 = vpop.eup %5485  ;;  %v2465_v7 = vadd.f32 %v2337_v28, %v801_v37  ;;  %v3706_v53 = vmul.f32 0.6931472, %v5484_v49  ;;  %5499 = vlog2.f32 %v1831_v5  ;;  %v8628_v28 = vld [vmem:[%s6687_s17 + $0x378] sm:$0xff]  ;;  %v1066_v49 = vld [vmem:[%s6695_s1 + $0x338] sm:$0xff] }
 0x337   : > { %v3215_v58 = vadd.f32 %v3214_v9, %v8519_v44  ;;  %v2062_v45 = vmul.f32 0.6931472, %v5486_v42  ;;  %v2212_v14 = vadd.f32 %v2054_v59, %v1188_v40  ;;  %5501 = vpow2.f32 %v1685_v13  ;;  %v5488_v34 = vpop.eup %5487 }
 0x338   : > { %v4632_v31 = vpack.c.bf16 %v2465_v7, %v8558_v12  ;;  %v3089_v2 = vmul.f32 %v2465_v7, %v2465_v7  ;;  %v3870_v11 = vadd.f32 %v3869_v46, %v3706_v53  ;;  %v3484_v40 = vadd.f32 %v3483_v29, %v8533_v38  ;;  %v1063_v38 = vld [vmem:[%s6695_s1 + $0x320] sm:$0xff]  ;;  %v810_v53 = vld [vmem:[%s6678_s14 + $0x338] sm:$0xff] }
 0x339   : > { %v8602_v24 = vadd.f32 %v2062_v45, %v1192_v19  ;;  %v2340_v44 = vmul.f32 %v2212_v14, %v8525_v20  ;;  %v1829_v27 = vadd.f32 1.0, %v5488_v34  ;;  %5503 = vpow2.f32 %v1693_v54 }
 0x33a   : > { %v5490_v12 = vpop.eup %5489  ;;  %4633 = vmatpush1.bf16.xpose.msra.mxu0 %v4632_v31  ;;  %v3216_v1 = vadd.f32 %v3215_v58, %v3089_v2  ;;  %v3871_v3 = vadd.f32 %v3870_v11, %v3708_v26  ;;  %v1191_v26 = vmax.f32 %v8505_v43, 0.0  ;;  %v3360_v37 = vmul.f32 %v1063_v38, %v1063_v38  ;;  %v806_v43 = vld [vmem:[%s6678_s14 + $0x318] sm:$0xff]  ;;  %v803_v31 = vld [vmem:[%s6678_s14 + $0x300] sm:$0xff] }
 0x33b   : > { %v5492_v46 = vpop.eup %5491  ;;  %v2344_v55 = vmul.f32 %v8602_v24, %v8544_v35  ;;  %v8611_v19 = vadd.f32 %v2340_v44, %v804_v8  ;;  %v2058_v20 = vmul.f32 0.6931472, %v5490_v12  ;;  %5505 = vlog2.f32 %v1829_v27  ;;  %v807_v44 = vld [vmem:[%s6678_s14 + $0x320] sm:$0xff]  ;;  %v2532_v12 = vld [vmem:[%s6670_s3 + $0x8] sm:$0xff] }
 0x33c   : > { %v3872_v4 = vadd.f32 %v3871_v3, %v3710_v36  ;;  %v8616_v57 = vadd.f32 %v3216_v1, %v8568_v52  ;;  %v1833_v51 = vadd.f32 1.0, %v5492_v46  ;;  %v3485_v33 = vadd.f32 %v3484_v40, %v3358_v60  ;;  %v2534_v1 = vld [vmem:[%s6670_s3 + $0x18] sm:$0xff]  ;;  %2659 = vmatprep.mubr.f32.mxu1 %v2532_v12 }
 0x33d   : > { %v5494_v10 = vpop.eup %5493  ;;  %v8618_v21 = vadd.f32 %v2344_v55, %v808_v50  ;;  %v2214_v35 = vadd.f32 %v2058_v20, %v1190_v30  ;;  %v1189_v42 = vmax.f32 %v8529_v17, 0.0  ;;  %v1326_v36 = vand.u32 2147483647, %v8624_v47  ;;  %2820 = vmatprep.mubr.f32.mxu0 %v2534_v1  ;;  %v8691_v1 = vld [vmem:[%s6687_s17 + $0x370] sm:$0xff] }
 0x33e   : > { %v5496_v39 = vpop.eup %5495  ;;  %v3873_v29 = vadd.f32 %v3872_v4, %v8555_v56  ;;  %v2066_v52 = vmul.f32 0.6931472, %v5494_v10  ;;  %5507 = vlog2.f32 %v1833_v51  ;;  %v3486_v17 = vadd.f32 %v3485_v33, %v8587_v16  ;;  %v1065_v33 = vld [vmem:[%s6695_s1 + $0x330] sm:$0xff] }
 0x33f   : > { %v5498_v5 = vpop.eup %5497  ;;  %v3714_v0 = vmul.f32 0.6931472, %v5496_v39  ;;  %v4570_v30 = vpack.c.bf16 %v8618_v21, %v8611_v19  ;;  %v2342_v9 = vmul.f32 %v2214_v35, %v8581_v48  ;;  %5509 = vlog2.f32 %v2212_v14 }
 0x340   : > { %v5500_v59 = vpop.eup %5499  ;;  %v8638_v56 = vadd.f32 %v2066_v52, %v1194_v22  ;;  %v2052_v13 = vmul.f32 0.6931472, %v5498_v5  ;;  %v1330_v48 = vand.u32 2147483647, %v8628_v28  ;;  %v1454_v54 = vsub.f32 0.0, %v1326_v36  ;;  %v805_v52 = vld [vmem:[%s6678_s14 + $0x310] sm:$0xff] }
 0x341   : > { %v5502_v18 = vpop.eup %5501  ;;  %v3874_v7 = vadd.f32 %v3873_v29, %v3714_v0  ;;  %4571 = vmatprep.subr.bf16.mxu1 %v4570_v30  ;;  %v2060_v58 = vmul.f32 0.6931472, %v5500_v59  ;;  %v8645_v22 = vadd.f32 %v2342_v9, %v806_v43  ;;  %v1193_v40 = vmax.f32 %v8536_v41, 0.0  ;;  %v8673_v30 = vld [vmem:[%s6687_s17 + $0x360] sm:$0xff]  ;;  %v809_v43 = vld [vmem:[%s6678_s14 + $0x330] sm:$0xff] }
 0x342   : > { %v2346_v32 = vmul.f32 %v8638_v56, %v1066_v49  ;;  %v2211_v45 = vadd.f32 %v2052_v13, %v1187_v15  ;;  %v1836_v8 = vadd.f32 1.0, %v5502_v18  ;;  %v1458_v50 = vsub.f32 0.0, %v1330_v48 }
 0x343   : > { %v2215_v2 = vadd.f32 %v2060_v58, %v1191_v26  ;;  %v8649_v11 = vadd.f32 %v3874_v7, %v3716_v25  ;;  %v5504_v14 = vpop.eup %5503  ;;  %v1689_v41 = vmul.f32 1.442695, %v1454_v54  ;;  %v3092_v4 = vmul.f32 %v8611_v19, %v8611_v19 }
 0x344   : > { %v8651_v34 = vadd.f32 %v2346_v32, %v810_v53  ;;  %v2339_v60 = vmul.f32 %v2211_v45, %v8571_v61  ;;  %5511 = vlog2.f32 %v2211_v45  ;;  %v1840_v3 = vadd.f32 1.0, %v5504_v14 }
 0x345   : > { %5513 = vlog2.f32 %v8602_v24  ;;  %v2343_v16 = vmul.f32 %v2215_v2, %v1063_v38  ;;  %v5506_v27 = vpop.eup %5505  ;;  %v3487_v61 = vadd.f32 %v3486_v17, %v3360_v37  ;;  %v1697_v51 = vmul.f32 1.442695, %v1458_v50  ;;  %v8664_v37 = vld [vmem:[%s6687_s17 + $0x340] sm:$0xff] }
 0x346   : > { %v4634_v46 = vpack.c.bf16 %v8651_v34, %v8645_v22  ;;  %5515 = vlog2.f32 %v2214_v35  ;;  %v2467_v55 = vadd.f32 %v2339_v60, %v803_v31  ;;  %v2056_v15 = vmul.f32 0.6931472, %v5506_v27  ;;  %v1068_v27 = vld [vmem:[%s6695_s1 + $0x348] sm:$0xff] }
 0x347   : > { %v2471_v20 = vadd.f32 %v2343_v16, %v807_v44  ;;  %5517 = vlog2.f32 %v1836_v8  ;;  %v8666_v39 = vmul.f32 %v1066_v49, %v1066_v49  ;;  %v3362_v0 = vmul.f32 %v1065_v33, %v1065_v33  ;;  %v8686_v44 = vld [vmem:[%s6687_s17 + $0x350] sm:$0xff] }
 0x348   : > { %v5508_v24 = vpop.eup %5507  ;;  %4635 = vmatprep.subr.bf16.mxu0 %v4634_v46  ;;  %v3091_v38 = vmul.f32 %v2467_v55, %v2467_v55  ;;  %5519 = vlog2.f32 %v1840_v3  ;;  %v2213_v26 = vadd.f32 %v2056_v15, %v1189_v42  ;;  %v3488_v59 = vadd.f32 %v3487_v61, %v8550_v23 }
 0x349   : > { %v4572_v10 = vpack.c.bf16 %v2471_v20, %v2467_v55  ;;  %5521 = vlog2.f32 %v2215_v2  ;;  %v2064_v35 = vmul.f32 0.6931472, %v5508_v24  ;;  %v5510_v19 = vpop.eup %5509  ;;  %v1323_v49 = vand.u32 2147483647, %v8664_v37 }
 0x34a   : > { %v3218_v29 = vadd.f32 %v8616_v57, %v3091_v38  ;;  %5523 = vpow2.f32 %v1689_v41  ;;  %v2341_v25 = vmul.f32 %v2213_v26, %v8598_v62  ;;  %v1196_v42 = vmax.f32 %v8553_v6, 0.0 }
 0x34b   : > { %4573 = vmatpush1.bf16.xpose.msra.mxu1 %v4572_v10  ;;  %v2217_v5 = vadd.f32 %v2064_v35, %v1193_v40  ;;  %5525 = vlog2.f32 %v2213_v26  ;;  %v1200_v36 = vmax.f32 %v8562_v63, 0.0  ;;  %v3720_v7 = vmul.f32 0.6931472, %v5510_v19 }
 0x34c   : > { %v3219_v9 = vadd.f32 %v3218_v29, %v3092_v4  ;;  %5527 = vpow2.f32 %v1697_v51  ;;  %v2469_v13 = vadd.f32 %v2341_v25, %v805_v52  ;;  %v3094_v62 = vmul.f32 %v8645_v22, %v8645_v22  ;;  %v812_v4 = vld [vmem:[%s6678_s14 + $0x348] sm:$0xff] }
 0x34d   : > { %v2345_v57 = vmul.f32 %v2217_v5, %v1065_v33  ;;  %v1327_v53 = vand.u32 2147483647, %v8673_v30  ;;  %v1451_v58 = vsub.f32 0.0, %v1323_v49  ;;  %5529 = vlog2.f32 %v2217_v5  ;;  %v816_v52 = vld [vmem:[%s6678_s14 + $0x368] sm:$0xff] }
 0x34e   : > { %v5512_v18 = vpop.eup %5511  ;;  %v3093_v45 = vmul.f32 %v2469_v13, %v2469_v13  ;;  %5531 = vlog2.f32 %v8638_v56  ;;  %v3489_v6 = vadd.f32 %v3488_v59, %v3362_v0  ;;  %v3095_v8 = vmul.f32 %v2471_v20, %v2471_v20  ;;  %v8695_v20 = vld [vmem:[%s6695_s1 + $0x368] sm:$0xff] }
 0x34f   : > { %v5514_v48 = vpop.eup %5513  ;;  %v3718_v23 = vmul.f32 0.6931472, %v5512_v18  ;;  %v2473_v32 = vadd.f32 %v2345_v57, %v809_v43  ;;  %v1455_v63 = vsub.f32 0.0, %v1327_v53  ;;  %v1683_v31 = vmul.f32 1.442695, %v1451_v58 }
 0x350   : > { %v5516_v17 = vpop.eup %5515  ;;  %v3220_v14 = vadd.f32 %v3219_v9, %v3093_v45  ;;  %v3096_v40 = vmul.f32 %v8618_v21, %v8618_v21  ;;  %v3728_v3 = vmul.f32 0.6931472, %v5514_v48  ;;  %v1325_v21 = vand.u32 2147483647, %v8686_v44  ;;  %v8721_v48 = vld [vmem:[%s6687_s17 + $0x388] sm:$0xff] }
 0x351   : > { %v5518_v2 = vpop.eup %5517  ;;  %v3876_v22 = vadd.f32 %v8649_v11, %v3718_v23  ;;  %v4636_v54 = vpack.c.bf16 %v2473_v32, %v2469_v13  ;;  %5533 = vpow2.f32 %v1683_v31  ;;  %v1691_v56 = vmul.f32 1.442695, %v1455_v63 }
 0x352   : > { %v5520_v60 = vpop.eup %5519  ;;  %v2070_v12 = vmul.f32 0.6931472, %v5518_v2  ;;  %v3221_v50 = vadd.f32 %v3220_v14, %v3094_v62  ;;  %v3097_v61 = vmul.f32 %v2473_v32, %v2473_v32  ;;  %v1329_v10 = vand.u32 2147483647, %v8691_v1 }
 0x353   : > { %v5522_v16 = vpop.eup %5521  ;;  %4637 = vmatpush1.bf16.xpose.msra.mxu0 %v4636_v54  ;;  %v3877_v11 = vadd.f32 %v3876_v22, %v3720_v7  ;;  %v2078_v46 = vmul.f32 0.6931472, %v5520_v60  ;;  %5535 = vpow2.f32 %v1691_v56  ;;  %v3724_v26 = vmul.f32 0.6931472, %v5516_v17  ;;  %v8728_v17 = vld [vmem:[%s6687_s17 + $0x3a8] sm:$0xff] }
 0x354   : > { %v5524_v55 = vpop.eup %5523  ;;  %v8697_v15 = vadd.f32 %v2070_v12, %v1196_v42  ;;  %v3222_v24 = vadd.f32 %v3221_v50, %v3095_v8  ;;  %v1453_v19 = vsub.f32 0.0, %v1325_v21  ;;  %v3098_v5 = vmul.f32 %v8651_v34, %v8651_v34 }
 0x355   : > { %v5526_v41 = vpop.eup %5525  ;;  %v8701_v38 = vadd.f32 %v2078_v46, %v1200_v36  ;;  %v1838_v51 = vadd.f32 1.0, %v5524_v55  ;;  %v3726_v9 = vmul.f32 0.6931472, %v5522_v16  ;;  %v8715_v36 = vld [vmem:[%s6695_s1 + $0x340] sm:$0xff]  ;;  %v1457_v34 = vsub.f32 0.0, %v1329_v10  ;;  %v8736_v46 = vld [vmem:[%s6687_s17 + $0x3b8] sm:$0xff] }
 0x356   : > { %v5528_v35 = vpop.eup %5527  ;;  %v3722_v29 = vmul.f32 0.6931472, %v5526_v41  ;;  %v2348_v33 = vmul.f32 %v8697_v15, %v1068_v27  ;;  %v3223_v25 = vadd.f32 %v3222_v24, %v3096_v40  ;;  %v3364_v62 = vmul.f32 %v8715_v36, %v8715_v36 }
 0x357   : > { %v2352_v0 = vmul.f32 %v8701_v38, %v8695_v20  ;;  %v1842_v43 = vadd.f32 1.0, %v5528_v35  ;;  %5537 = vlog2.f32 %v1838_v51  ;;  %v5530_v57 = vpop.eup %5529  ;;  %v3490_v53 = vadd.f32 %v3489_v6, %v8666_v39 }
 0x358   : > { %v3878_v59 = vadd.f32 %v3877_v11, %v3722_v29  ;;  %v8710_v49 = vadd.f32 %v2348_v33, %v812_v4  ;;  %v3224_v13 = vadd.f32 %v3223_v25, %v3097_v61  ;;  %v5532_v18 = vpop.eup %5531  ;;  %v1687_v58 = vmul.f32 1.442695, %v1453_v19  ;;  %v8733_v11 = vld [vmem:[%s6687_s17 + $0x398] sm:$0xff]  ;;  %v1070_v29 = vld [vmem:[%s6695_s1 + $0x358] sm:$0xff] }
 0x359   : > { %v8712_v42 = vadd.f32 %v2352_v0, %v816_v52  ;;  %5539 = vlog2.f32 %v1842_v43  ;;  %v1695_v45 = vmul.f32 1.442695, %v1457_v34  ;;  %v3730_v31 = vmul.f32 0.6931472, %v5530_v57  ;;  %v8741_v61 = vld [vmem:[%s6695_s1 + $0x350] sm:$0xff]  ;;  %v1074_v33 = vld [vmem:[%s6695_s1 + $0x378] sm:$0xff] }
 0x35a   : > { %v3879_v7 = vadd.f32 %v3878_v59, %v3724_v26  ;;  %v8725_v32 = vadd.f32 %v3224_v13, %v3098_v5  ;;  %5541 = vpow2.f32 %v1687_v58  ;;  %v3365_v8 = vmul.f32 %v1068_v27, %v1068_v27  ;;  %v8763_v34 = vld [vmem:[%s6687_s17 + $0x380] sm:$0xff] }
 0x35b   : > { %v4574_v23 = vpack.c.bf16 %v8712_v42, %v8710_v49  ;;  %v5534_v63 = vpop.eup %5533  ;;  %5543 = vpow2.f32 %v1695_v45  ;;  %v1332_v6 = vand.u32 2147483647, %v8721_v48  ;;  %v3732_v54 = vmul.f32 0.6931472, %v5532_v18  ;;  %v8766_v18 = vld [vmem:[%s6687_s17 + $0x3a0] sm:$0xff] }
 0x35c   : > { %v3880_v2 = vadd.f32 %v3879_v7, %v3726_v9  ;;  %v1835_v39 = vadd.f32 1.0, %v5534_v63  ;;  %v3491_v60 = vadd.f32 %v3490_v53, %v3364_v62  ;;  %v1336_v40 = vand.u32 2147483647, %v8728_v17  ;;  %v814_v9 = vld [vmem:[%s6678_s14 + $0x358] sm:$0xff] }
 0x35d   : > { %4575 = vmatprep.subr.bf16.mxu1 %v4574_v23  ;;  %v5536_v22 = vpop.eup %5535  ;;  %v1460_v56 = vsub.f32 0.0, %v1332_v6  ;;  %v1198_v27 = vmax.f32 %v8624_v47, 0.0  ;;  %v1202_v55 = vmax.f32 %v8628_v28, 0.0  ;;  %v3366_v24 = vmul.f32 %v8741_v61, %v8741_v61  ;;  %v818_v62 = vld [vmem:[%s6678_s14 + $0x378] sm:$0xff] }
 0x35e   : > { %v3881_v14 = vadd.f32 %v3880_v2, %v3728_v3  ;;  %v1839_v12 = vadd.f32 1.0, %v5536_v22  ;;  %5545 = vlog2.f32 %v1835_v39  ;;  %v1464_v50 = vsub.f32 0.0, %v1336_v40 }
 0x35f   : > { %v1701_v3 = vmul.f32 1.442695, %v1460_v56  ;;  %v3492_v4 = vadd.f32 %v3491_v60, %v3365_v8  ;;  %v1334_v47 = vand.u32 2147483647, %v8733_v11  ;;  %v1338_v28 = vand.u32 2147483647, %v8736_v46 }
 0x360   : > { %v3882_v16 = vadd.f32 %v3881_v14, %v3730_v31  ;;  %5547 = vlog2.f32 %v1839_v12  ;;  %v1709_v51 = vmul.f32 1.442695, %v1464_v50  ;;  %v8751_v26 = vmul.f32 %v8695_v20, %v8695_v20 }
 0x361   : > { %v5538_v21 = vpop.eup %5537  ;;  %5549 = vpow2.f32 %v1701_v3  ;;  %v3367_v5 = vmul.f32 %v1070_v29, %v1070_v29  ;;  %v1462_v25 = vsub.f32 0.0, %v1334_v47  ;;  %v1466_v0 = vsub.f32 0.0, %v1338_v28  ;;  %v815_v47 = vld [vmem:[%s6678_s14 + $0x360] sm:$0xff] }
 0x362   : > { %v8743_v41 = vadd.f32 %v3882_v16, %v3732_v54  ;;  %v2074_v35 = vmul.f32 0.6931472, %v5538_v21  ;;  %5551 = vpow2.f32 %v1709_v51  ;;  %v8758_v57 = vmul.f32 %v1074_v33, %v1074_v33 }
 0x363   : > { %v5540_v10 = vpop.eup %5539  ;;  %v1195_v13 = vmax.f32 %v8664_v37, 0.0  ;;  %v1199_v20 = vmax.f32 %v8673_v30, 0.0  ;;  %v3493_v23 = vadd.f32 %v3492_v4, %v3366_v24  ;;  %v1705_v45 = vmul.f32 1.442695, %v1462_v25  ;;  %v1071_v30 = vld [vmem:[%s6695_s1 + $0x360] sm:$0xff]  ;;  %v1073_v25 = vld [vmem:[%s6695_s1 + $0x370] sm:$0xff] }
 0x364   : > { %v2082_v52 = vmul.f32 0.6931472, %v5540_v10  ;;  %v2222_v19 = vadd.f32 %v2074_v35, %v1198_v27  ;;  %v5542_v43 = vpop.eup %5541  ;;  %5553 = vlog2.f32 %v8697_v15  ;;  %v1713_v2 = vmul.f32 1.442695, %v1466_v0  ;;  %v8786_v35 = vld [vmem:[%s6687_s17 + $0x390] sm:$0xff] }
 0x365   : > { %v5544_v7 = vpop.eup %5543  ;;  %v1837_v58 = vadd.f32 1.0, %v5542_v43  ;;  %v1331_v39 = vand.u32 2147483647, %v8763_v34  ;;  %v1335_v6 = vand.u32 2147483647, %v8766_v18  ;;  %v3368_v14 = vmul.f32 %v1071_v30, %v1071_v30 }
 0x366   : > { %v8756_v59 = vadd.f32 %v2082_v52, %v1202_v55  ;;  %v2350_v53 = vmul.f32 %v2222_v19, %v1070_v29  ;;  %v1841_v31 = vadd.f32 1.0, %v5544_v7  ;;  %v3494_v60 = vadd.f32 %v3493_v23, %v3367_v5  ;;  %v811_v55 = vld [vmem:[%s6678_s14 + $0x340] sm:$0xff]  ;;  %v8790_v52 = vld [vmem:[%s6687_s17 + $0x3b0] sm:$0xff] }
 0x367   : > { %5555 = vlog2.f32 %v1837_v58  ;;  %v1459_v40 = vsub.f32 0.0, %v1331_v39  ;;  %v1463_v12 = vsub.f32 0.0, %v1335_v6  ;;  %v1197_v3 = vmax.f32 %v8686_v44, 0.0 }
 0x368   : > { %v2354_v63 = vmul.f32 %v8756_v59, %v1074_v33  ;;  %v5546_v37 = vpop.eup %5545  ;;  %v8771_v8 = vadd.f32 %v2350_v53, %v814_v9  ;;  %5557 = vlog2.f32 %v1841_v31  ;;  %v1201_v21 = vmax.f32 %v8691_v1, 0.0 }
 0x369   : > { %v2068_v54 = vmul.f32 0.6931472, %v5546_v37  ;;  %5559 = vpow2.f32 %v1705_v45  ;;  %v1699_v24 = vmul.f32 1.442695, %v1459_v40  ;;  %v3495_v28 = vadd.f32 %v3494_v60, %v3368_v14  ;;  %v8810_v40 = vld [vmem:[%s6695_s1 + $0x380] sm:$0xff] }
 0x36a   : > { %v8776_v22 = vadd.f32 %v2354_v63, %v818_v62  ;;  %v5548_v15 = vpop.eup %5547  ;;  %5561 = vlog2.f32 %v8701_v38  ;;  %v1707_v44 = vmul.f32 1.442695, %v1463_v12  ;;  %v3100_v1 = vmul.f32 %v8710_v49, %v8710_v49 }
 0x36b   : > { %v2076_v16 = vmul.f32 0.6931472, %v5548_v15  ;;  %v2219_v50 = vadd.f32 %v2068_v54, %v1195_v13  ;;  %v5550_v27 = vpop.eup %5549  ;;  %5563 = vpow2.f32 %v1713_v2  ;;  %v3370_v0 = vmul.f32 %v1073_v25, %v1073_v25 }
 0x36c   : > { %v4638_v56 = vpack.c.bf16 %v8776_v22, %v8771_v8  ;;  %v5552_v4 = vpop.eup %5551  ;;  %v1844_v10 = vadd.f32 1.0, %v5550_v27  ;;  %v1333_v43 = vand.u32 2147483647, %v8786_v35  ;;  %v1337_v7 = vand.u32 2147483647, %v8790_v52  ;;  %v8817_v27 = vld [vmem:[%s6687_s17 + $0x3c8] sm:$0xff] }
 0x36d   : > { %v2223_v38 = vadd.f32 %v2076_v16, %v1199_v20  ;;  %v2347_v51 = vmul.f32 %v2219_v50, %v8715_v36  ;;  %5565 = vlog2.f32 %v2219_v50  ;;  %v1848_v29 = vadd.f32 1.0, %v5552_v4 }
 0x36e   : > { %4639 = vmatprep.subr.bf16.mxu0 %v4638_v56  ;;  %5567 = vpow2.f32 %v1699_v24  ;;  %v8797_v36 = vmul.f32 %v8712_v42, %v8712_v42  ;;  %v5554_v9 = vpop.eup %5553  ;;  %v3496_v49 = vadd.f32 %v3495_v28, %v8751_v26  ;;  %v1461_v53 = vsub.f32 0.0, %v1333_v43 }
 0x36f   : > { %5569 = vlog2.f32 %v2222_v19  ;;  %v2351_v33 = vmul.f32 %v2223_v38, %v1071_v30  ;;  %v2475_v5 = vadd.f32 %v2347_v51, %v811_v55  ;;  %v1204_v19 = vmax.f32 %v8721_v48, 0.0 }
 0x370   : > { %5571 = vlog2.f32 %v1844_v10  ;;  %v1208_v2 = vmax.f32 %v8728_v17, 0.0  ;;  %v1703_v26 = vmul.f32 1.442695, %v1461_v53  ;;  %v1465_v6 = vsub.f32 0.0, %v1337_v7  ;;  %v817_v17 = vld [vmem:[%s6678_s14 + $0x370] sm:$0xff] }
 0x371   : > { %v2479_v13 = vadd.f32 %v2351_v33, %v815_v47  ;;  %v3099_v20 = vmul.f32 %v2475_v5, %v2475_v5  ;;  %5573 = vlog2.f32 %v1848_v29  ;;  %v5556_v62 = vpop.eup %5555  ;;  %v3736_v14 = vmul.f32 0.6931472, %v5554_v9  ;;  %v1076_v9 = vld [vmem:[%s6695_s1 + $0x388] sm:$0xff] }
 0x372   : > { %5575 = vpow2.f32 %v1707_v44  ;;  %v5558_v58 = vpop.eup %5557  ;;  %v2072_v45 = vmul.f32 0.6931472, %v5556_v62  ;;  %v3497_v60 = vadd.f32 %v3496_v49, %v3370_v0  ;;  %v3372_v50 = vmul.f32 %v8810_v40, %v8810_v40  ;;  %v8834_v49 = vld [vmem:[%s6695_s1 + $0x3a8] sm:$0xff] }
 0x373   : > { %5577 = vlog2.f32 %v8756_v59  ;;  %v4576_v42 = vpack.c.bf16 %v2479_v13, %v2475_v5  ;;  %v3226_v23 = vadd.f32 %v8725_v32, %v3099_v20  ;;  %v5560_v63 = vpop.eup %5559  ;;  %v2080_v31 = vmul.f32 0.6931472, %v5558_v58  ;;  %v813_v32 = vld [vmem:[%s6678_s14 + $0x350] sm:$0xff]  ;;  %v8827_v5 = vld [vmem:[%s6687_s17 + $0x3e8] sm:$0xff] }
 0x374   : > { %5579 = vlog2.f32 %v2223_v38  ;;  %v8806_v37 = vpop.eup %5561  ;;  %v2221_v30 = vadd.f32 %v2072_v45, %v1197_v3  ;;  %v1846_v59 = vadd.f32 1.0, %v5560_v63  ;;  %v3102_v3 = vmul.f32 %v8771_v8, %v8771_v8 }
 0x375   : > { %4577 = vmatpush1.bf16.xpose.msra.mxu1 %v4576_v42  ;;  %v3227_v39 = vadd.f32 %v3226_v23, %v3100_v1  ;;  %v5564_v54 = vpop.eup %5563  ;;  %v2225_v15 = vadd.f32 %v2080_v31, %v1201_v21  ;;  %5581 = vpow2.f32 %v1703_v26  ;;  %v1340_v29 = vand.u32 2147483647, %v8817_v27  ;;  %v824_v26 = vld [vmem:[%s6678_s14 + $0x3a8] sm:$0xff] }
 0x376   : > { %v2349_v56 = vmul.f32 %v2221_v30, %v8741_v61  ;;  %5583 = vlog2.f32 %v2221_v30  ;;  %v1850_v16 = vadd.f32 1.0, %v5564_v54  ;;  %v1711_v61 = vmul.f32 1.442695, %v1465_v6 }
 0x377   : > { %v5566_v12 = vpop.eup %5565  ;;  %v2353_v24 = vmul.f32 %v2225_v15, %v1073_v25  ;;  %5585 = vlog2.f32 %v2225_v15  ;;  %v3498_v33 = vadd.f32 %v3497_v60, %v8758_v57  ;;  %v3103_v0 = vmul.f32 %v2479_v13, %v2479_v13  ;;  %v820_v13 = vld [vmem:[%s6678_s14 + $0x388] sm:$0xff]  ;;  %v8854_v60 = vld [vmem:[%s6695_s1 + $0x390] sm:$0xff] }
 0x378   : > { %v5568_v55 = vpop.eup %5567  ;;  %v3734_v21 = vmul.f32 0.6931472, %v5566_v12  ;;  %v2477_v38 = vadd.f32 %v2349_v56, %v813_v32  ;;  %5587 = vlog2.f32 %v1846_v59  ;;  %v3373_v23 = vmul.f32 %v1076_v9, %v1076_v9 }
 0x379   : > { %v5570_v4 = vpop.eup %5569  ;;  %v1843_v51 = vadd.f32 1.0, %v5568_v55  ;;  %v8822_v28 = vadd.f32 %v2353_v24, %v817_v17  ;;  %5589 = vlog2.f32 %v1850_v16  ;;  %v1344_v45 = vand.u32 2147483647, %v8827_v5 }
 0x37a   : > { %v5572_v10 = vpop.eup %5571  ;;  %v3884_v47 = vadd.f32 %v8743_v41, %v3734_v21  ;;  %v3101_v44 = vmul.f32 %v2477_v38, %v2477_v38  ;;  %v1468_v63 = vsub.f32 0.0, %v1340_v29  ;;  %v1206_v48 = vmax.f32 %v8733_v11, 0.0 }
 0x37b   : > { %v5574_v8 = vpop.eup %5573  ;;  %v2086_v1 = vmul.f32 0.6931472, %v5572_v10  ;;  %5591 = vlog2.f32 %v1843_v51  ;;  %v4640_v43 = vpack.c.bf16 %v8822_v28, %v2477_v38  ;;  %v1210_v6 = vmax.f32 %v8736_v46, 0.0  ;;  %v1078_v10 = vld [vmem:[%s6695_s1 + $0x398] sm:$0xff] }
 0x37c   : > { %v5576_v25 = vpop.eup %5575  ;;  %v3885_v41 = vadd.f32 %v3884_v47, %v3736_v14  ;;  %v2094_v20 = vmul.f32 0.6931472, %v5574_v8  ;;  %v3228_v62 = vadd.f32 %v3227_v39, %v3101_v44  ;;  %5593 = vpow2.f32 %v1711_v61  ;;  %v8868_v44 = vld [vmem:[%s6695_s1 + $0x3b8] sm:$0xff] }
 0x37d   : > { %v8831_v7 = vpop.eup %5577  ;;  %v8838_v53 = vadd.f32 %v2086_v1, %v1204_v19  ;;  %v1847_v57 = vadd.f32 1.0, %v5576_v25  ;;  %4641 = vmatpush1.bf16.xpose.msra.mxu0 %v4640_v43  ;;  %v3499_v19 = vadd.f32 %v3498_v33, %v3372_v50  ;;  %v1472_v54 = vsub.f32 0.0, %v1344_v45  ;;  %v8873_v25 = vld [vmem:[%s6687_s17 + $0x3d8] sm:$0xff] }
 0x37e   : > { %v5580_v58 = vpop.eup %5579  ;;  %v8841_v42 = vadd.f32 %v2094_v20, %v1208_v2  ;;  %v3229_v31 = vadd.f32 %v3228_v62, %v3102_v3  ;;  %v1203_v2 = vmax.f32 %v8763_v34, 0.0  ;;  %v3740_v11 = vmul.f32 0.6931472, %v5570_v4  ;;  %v822_v43 = vld [vmem:[%s6678_s14 + $0x398] sm:$0xff] }
 0x37f   : > { %v2356_v30 = vmul.f32 %v8838_v53, %v1076_v9  ;;  %v5582_v39 = vpop.eup %5581  ;;  %5595 = vlog2.f32 %v1847_v57  ;;  %v1717_v50 = vmul.f32 1.442695, %v1468_v63  ;;  %v3374_v34 = vmul.f32 %v8854_v60, %v8854_v60  ;;  %v826_v57 = vld [vmem:[%s6678_s14 + $0x3b8] sm:$0xff] }
 0x380   : > { %v2360_v59 = vmul.f32 %v8841_v42, %v8834_v49  ;;  %v5584_v14 = vpop.eup %5583  ;;  %v3230_v32 = vadd.f32 %v3229_v31, %v3103_v0  ;;  %v1845_v12 = vadd.f32 1.0, %v5582_v39  ;;  %v3500_v3 = vadd.f32 %v3499_v19, %v3373_v23  ;;  %v8881_v23 = vld [vmem:[%s6687_s17 + $0x3f8] sm:$0xff]  ;;  %v1079_v19 = vld [vmem:[%s6695_s1 + $0x3a0] sm:$0xff] }
 0x381   : > { %v8851_v15 = vadd.f32 %v2356_v30, %v820_v13  ;;  %v5586_v17 = vpop.eup %5585  ;;  %v3738_v56 = vmul.f32 0.6931472, %v5584_v14  ;;  %v3742_v24 = vmul.f32 0.6931472, %v5580_v58  ;;  %v3744_v29 = vmul.f32 0.6931472, %v8806_v37 }
 0x382   : > { %v8856_v16 = vadd.f32 %v2360_v59, %v824_v26  ;;  %v5588_v55 = vpop.eup %5587  ;;  %v8859_v46 = vadd.f32 %v3230_v32, %v8797_v36  ;;  %5597 = vlog2.f32 %v1845_v12  ;;  %v1725_v36 = vmul.f32 1.442695, %v1472_v54 }
 0x383   : > { %v5590_v21 = vpop.eup %5589  ;;  %v3886_v38 = vadd.f32 %v3885_v41, %v3738_v56  ;;  %v2090_v51 = vmul.f32 0.6931472, %v5588_v55  ;;  %5599 = vpow2.f32 %v1717_v50  ;;  %v3375_v9 = vmul.f32 %v1078_v10, %v1078_v10  ;;  %v819_v50 = vld [vmem:[%s6678_s14 + $0x380] sm:$0xff] }
 0x384   : > { %v4578_v4 = vpack.c.bf16 %v8856_v16, %v8851_v15  ;;  %v2098_v47 = vmul.f32 0.6931472, %v5590_v21  ;;  %v3501_v20 = vadd.f32 %v3500_v3, %v3374_v34  ;;  %5601 = vpow2.f32 %v1725_v36  ;;  %v8916_v36 = vld [vmem:[%s6687_s17 + $0x3e0] sm:$0xff] }
 0x385   : > { %v5592_v61 = vpop.eup %5591  ;;  %v3887_v8 = vadd.f32 %v3886_v38, %v3740_v11  ;;  %v8870_v1 = vadd.f32 %v2090_v51, %v1206_v48  ;;  %v3746_v62 = vmul.f32 0.6931472, %v5586_v17  ;;  %v1342_v31 = vand.u32 2147483647, %v8873_v25 }
 0x386   : > { %4579 = vmatprep.subr.bf16.mxu1 %v4578_v4  ;;  %v2084_v33 = vmul.f32 0.6931472, %v5592_v61  ;;  %v5594_v0 = vpop.eup %5593  ;;  %v8876_v41 = vadd.f32 %v2098_v47, %v1210_v6  ;;  %v3748_v26 = vmul.f32 0.6931472, %v8831_v7  ;;  %v1207_v39 = vmax.f32 %v8766_v18, 0.0 }
 0x387   : > { %v3888_v37 = vadd.f32 %v3887_v8, %v3742_v24  ;;  %v2358_v58 = vmul.f32 %v8870_v1, %v1078_v10  ;;  %v1849_v63 = vadd.f32 1.0, %v5594_v0  ;;  %v3502_v54 = vadd.f32 %v3501_v20, %v3375_v9  ;;  %v1081_v8 = vld [vmem:[%s6695_s1 + $0x3b0] sm:$0xff] }
 0x388   : > { %v2227_v13 = vadd.f32 %v2084_v33, %v1203_v2  ;;  %v2362_v45 = vmul.f32 %v8876_v41, %v8868_v44  ;;  %v3376_v2 = vmul.f32 %v1079_v19, %v1079_v19  ;;  %v1346_v14 = vand.u32 2147483647, %v8881_v23 }
 0x389   : > { %v3889_v30 = vadd.f32 %v3888_v37, %v3744_v29  ;;  %v8887_v48 = vadd.f32 %v2358_v58, %v822_v43  ;;  %v5596_v59 = vpop.eup %5595  ;;  %v3105_v32 = vmul.f32 %v8822_v28, %v8822_v28  ;;  %v3377_v18 = vmul.f32 %v8834_v49, %v8834_v49  ;;  %v823_v49 = vld [vmem:[%s6678_s14 + $0x3a0] sm:$0xff] }
 0x38a   : > { %v8891_v6 = vadd.f32 %v2362_v45, %v826_v57  ;;  %v2092_v7 = vmul.f32 0.6931472, %v5596_v59  ;;  %v2355_v17 = vmul.f32 %v2227_v13, %v8810_v40  ;;  %5603 = vlog2.f32 %v1849_v63  ;;  %v8909_v40 = vld [vmem:[%s6687_s17 + $0x3c0] sm:$0xff] }
 0x38b   : > { %v3890_v12 = vadd.f32 %v3889_v30, %v3746_v62  ;;  %v1470_v55 = vsub.f32 0.0, %v1342_v31  ;;  %v3106_v34 = vmul.f32 %v8776_v22, %v8776_v22  ;;  %5605 = vlog2.f32 %v2227_v13  ;;  %v8930_v30 = vld [vmem:[%s6687_s17 + $0x3d0] sm:$0xff] }
 0x38c   : > { %v5598_v11 = vpop.eup %5597  ;;  %v4642_v56 = vpack.c.bf16 %v8891_v6, %v8887_v48  ;;  %v8904_v28 = vadd.f32 %v2092_v7, %v1207_v39  ;;  %v1205_v24 = vmax.f32 %v8786_v35, 0.0  ;;  %v3503_v38 = vadd.f32 %v3502_v54, %v3376_v2  ;;  %v8941_v7 = vld [vmem:[%s6695_s1 + $0x3c0] sm:$0xff] }
 0x38d   : > { %v8906_v3 = vadd.f32 %v3890_v12, %v3748_v26  ;;  %v5600_v21 = vpop.eup %5599  ;;  %v1474_v4 = vsub.f32 0.0, %v1346_v14  ;;  %v1721_v51 = vmul.f32 1.442695, %v1470_v55  ;;  %v3232_v61 = vadd.f32 %v8859_v46, %v3105_v32  ;;  %v821_v12 = vld [vmem:[%s6678_s14 + $0x390] sm:$0xff] }
 0x38e   : > { %4643 = vmatprep.subr.bf16.mxu0 %v4642_v56  ;;  %v2359_v22 = vmul.f32 %v8904_v28, %v1079_v19  ;;  %v2483_v10 = vadd.f32 %v2355_v17, %v819_v50  ;;  %v2088_v47 = vmul.f32 0.6931472, %v5598_v11  ;;  %v5602_v29 = vpop.eup %5601  ;;  %v1852_v33 = vadd.f32 1.0, %v5600_v21  ;;  %v8933_v19 = vld [vmem:[%s6687_s17 + $0x3f0] sm:$0xff]  ;;  %s9517_s17 = scalar_lea.vmem [#allocation11], %s6685_s21 }
 0x38f   : > { %5607 = vpow2.f32 %v1721_v51  ;;  %v1339_v0 = vand.u32 2147483647, %v8909_v40  ;;  %v3378_v43 = vmul.f32 %v1081_v8, %v1081_v8  ;;  %v1729_v9 = vmul.f32 1.442695, %v1474_v4  ;;  %v1084_v55 = vld [vmem:[%s6695_s1 + $0x3c8] sm:$0xff] }
 0x390   : > { %5609 = vlog2.f32 %v8838_v53  ;;  %v8921_v35 = vadd.f32 %v2359_v22, %v823_v49  ;;  %v3504_v20 = vadd.f32 %v3503_v38, %v3377_v18  ;;  %v1856_v46 = vadd.f32 1.0, %v5602_v29 }
 0x391   : > { %5611 = vlog2.f32 %v1852_v33  ;;  %v1343_v62 = vand.u32 2147483647, %v8916_v36  ;;  %v3233_v57 = vadd.f32 %v3232_v61, %v3106_v34  ;;  %v2229_v58 = vadd.f32 %v2088_v47, %v1205_v24 }
 0x392   : > { %v4580_v37 = vpack.c.bf16 %v8921_v35, %v2483_v10  ;;  %v3107_v13 = vmul.f32 %v2483_v10, %v2483_v10  ;;  %5613 = vlog2.f32 %v1856_v46  ;;  %v1467_v45 = vsub.f32 0.0, %v1339_v0 }
 0x393   : > { %v1471_v63 = vsub.f32 0.0, %v1343_v62  ;;  %v3379_v53 = vmul.f32 %v8868_v44, %v8868_v44  ;;  %v1209_v31 = vmax.f32 %v8790_v52, 0.0  ;;  %v1212_v26 = vmax.f32 %v8817_v27, 0.0 }
 0x394   : > { %4581 = vmatpush1.bf16.xpose.msra.mxu1 %v4580_v37  ;;  %5615 = vpow2.f32 %v1729_v9  ;;  %v5604_v39 = vpop.eup %5603  ;;  %v3505_v59 = vadd.f32 %v3504_v20, %v3378_v43  ;;  %v1715_v2 = vmul.f32 1.442695, %v1467_v45  ;;  %v3108_v44 = vmul.f32 %v8851_v15, %v8851_v15  ;;  %v1088_v45 = vld [vmem:[%s6695_s1 + $0x3e8] sm:$0xff] }
 0x395   : > { %5617 = vlog2.f32 %v2229_v58  ;;  %v1723_v54 = vmul.f32 1.442695, %v1471_v63  ;;  %v5606_v14 = vpop.eup %5605  ;;  %v2096_v52 = vmul.f32 0.6931472, %v5604_v39  ;;  %v2357_v27 = vmul.f32 %v2229_v58, %v8854_v60  ;;  %v825_v60 = vld [vmem:[%s6678_s14 + $0x3b0] sm:$0xff] }
 0x396   : > { %5619 = vlog2.f32 %v8870_v1  ;;  %v3234_v32 = vadd.f32 %v3233_v57, %v3107_v13  ;;  %v1341_v17 = vand.u32 2147483647, %v8930_v30  ;;  %v1345_v11 = vand.u32 2147483647, %v8933_v19  ;;  %v8962_v57 = vld [vmem:[%s6695_s1 + $0x3d0] sm:$0xff]  ;;  %v828_v13 = vld [vmem:[%s6678_s14 + $0x3c8] sm:$0xff] }
 0x397   : > { %5621 = vpow2.f32 %v1715_v2  ;;  %v8945_v18 = vadd.f32 %v2096_v52, %v1209_v31  ;;  %v1216_v15 = vmax.f32 %v8827_v5, 0.0  ;;  %v3380_v1 = vmul.f32 %v8941_v7, %v8941_v7  ;;  %v1086_v2 = vld [vmem:[%s6695_s1 + $0x3d8] sm:$0xff] }
 0x398   : > { %5623 = vpow2.f32 %v1723_v54  ;;  %v3750_v50 = vmul.f32 0.6931472, %v5606_v14  ;;  %v3506_v34 = vadd.f32 %v3505_v59, %v3379_v53  ;;  %v1469_v21 = vsub.f32 0.0, %v1341_v17  ;;  %v8977_v54 = vld [vmem:[%s9517_s17] sm:$0x3] }
 0x399   : > { %v5608_v56 = vpop.eup %5607  ;;  %v1473_v49 = vsub.f32 0.0, %v1345_v11  ;;  %v2361_v38 = vmul.f32 %v8945_v18, %v1081_v8  ;;  %v2485_v4 = vadd.f32 %v2357_v27, %v821_v12  ;;  %v3381_v51 = vmul.f32 %v1084_v55, %v1084_v55  ;;  %v8984_v11 = vld [vmem:[%s6695_s1 + $0x3e0] sm:$0xff] }
 0x39a   : > { %v5610_v24 = vpop.eup %5609  ;;  %v1854_v61 = vadd.f32 1.0, %v5608_v56  ;;  %5625 = vlog2.f32 %v8841_v42  ;;  %v3235_v5 = vadd.f32 %v3234_v32, %v3108_v44  ;;  %v1719_v10 = vmul.f32 1.442695, %v1469_v21  ;;  %v832_v44 = vld [vmem:[%s6678_s14 + $0x3e8] sm:$0xff] }
 0x39b   : > { %v5612_v22 = vpop.eup %5611  ;;  %v1727_v47 = vmul.f32 1.442695, %v1473_v49  ;;  %v8954_v29 = vadd.f32 %v2361_v38, %v825_v60  ;;  %v3109_v33 = vmul.f32 %v2485_v4, %v2485_v4  ;;  %v3752_v9 = vmul.f32 0.6931472, %v5610_v24 }
 0x39c   : > { %v2102_v0 = vmul.f32 0.6931472, %v5612_v22  ;;  %5627 = vlog2.f32 %v1854_v61  ;;  %v5614_v43 = vpop.eup %5613  ;;  %v3892_v8 = vadd.f32 %v8906_v3, %v3750_v50  ;;  %v3507_v20 = vadd.f32 %v3506_v34, %v3380_v1 }
 0x39d   : > { %5629 = vpow2.f32 %v1719_v10  ;;  %v4644_v42 = vpack.c.bf16 %v8954_v29, %v2485_v4  ;;  %v2110_v62 = vmul.f32 0.6931472, %v5614_v43  ;;  %v1214_v3 = vmax.f32 %v8873_v25, 0.0  ;;  %v8997_v10 = vld [vmem:[%s6695_s1 + $0x3f0] sm:$0xff] }
 0x39e   : > { %v5616_v46 = vpop.eup %5615  ;;  %5631 = vlog2.f32 %v8904_v28  ;;  %v8959_v37 = vadd.f32 %v2102_v0, %v1212_v26  ;;  %v3382_v28 = vmul.f32 %v8962_v57, %v8962_v57  ;;  %v3110_v31 = vmul.f32 %v8887_v48, %v8887_v48 }
 0x39f   : > { %v5618_v58 = vpop.eup %5617  ;;  %v1858_v63 = vadd.f32 1.0, %v5616_v46  ;;  %5633 = vpow2.f32 %v1727_v47  ;;  %4645 = vmatpush1.bf16.xpose.msra.mxu0 %v4644_v42  ;;  %v3236_v26 = vadd.f32 %v3235_v5, %v3109_v33  ;;  %v8971_v39 = vadd.f32 %v2110_v62, %v1216_v15 }
 0x3a0   : > { %v5620_v53 = vpop.eup %5619  ;;  %v2364_v59 = vmul.f32 %v8959_v37, %v1084_v55  ;;  %v3893_v14 = vadd.f32 %v3892_v8, %v3752_v9  ;;  %v3383_v52 = vmul.f32 %v1086_v2, %v1086_v2  ;;  %v3508_v27 = vadd.f32 %v3507_v20, %v3381_v51 }
 0x3a1   : > { %v5622_v25 = vpop.eup %5621  ;;  %5635 = vlog2.f32 %v1858_v63  ;;  %v3754_v12 = vmul.f32 0.6931472, %v5618_v58  ;;  %v2368_v48 = vmul.f32 %v8971_v39, %v1088_v45  ;;  %v3384_v56 = vmul.f32 %v8984_v11, %v8984_v11 }
 0x3a2   : > { %v5624_v32 = vpop.eup %5623  ;;  %v8981_v17 = vadd.f32 %v2364_v59, %v828_v13  ;;  %v1851_v15 = vadd.f32 1.0, %v5622_v25  ;;  %v3509_v50 = vadd.f32 %v3508_v27, %v3382_v28  ;;  %v2985_v60 = vand.u32 2147483647, %v8977_v54 }
 0x3a3   : > { %v1855_v1 = vadd.f32 1.0, %v5624_v32  ;;  %v3111_v55 = vmul.f32 %v8921_v35, %v8921_v35  ;;  %v3237_v34 = vadd.f32 %v3236_v26, %v3110_v31  ;;  %v8991_v21 = vadd.f32 %v2368_v48, %v832_v44 }
 0x3a4   : > { %5637 = vlog2.f32 %v1851_v15  ;;  %v5626_v49 = vpop.eup %5625  ;;  %v3385_v24 = vmul.f32 %v1088_v45, %v1088_v45  ;;  %v3510_v38 = vadd.f32 %v3509_v50, %v3383_v52  ;;  %v2986_v4 = vsub.f32 0.0, %v2985_v60  ;;  %v834_v15 = vld [vmem:[%s6678_s14 + $0x3f8] sm:$0xff] }
 0x3a5   : > { %5639 = vlog2.f32 %v1855_v1  ;;  %v3756_v61 = vmul.f32 0.6931472, %v5620_v53  ;;  %v3894_v22 = vadd.f32 %v3893_v14, %v3754_v12  ;;  %v4582_v5 = vpack.c.bf16 %v8991_v21, %v8981_v17  ;;  %v830_v14 = vld [vmem:[%s6678_s14 + $0x3d8] sm:$0xff] }
 0x3a6   : > { %v5628_v51 = vpop.eup %5627  ;;  %5641 = vlog2.f32 %v8945_v18  ;;  %v3386_v33 = vmul.f32 %v8997_v10, %v8997_v10  ;;  %v3511_v0 = vadd.f32 %v3510_v38, %v3384_v56  ;;  %v2987_v43 = vmul.f32 1.442695, %v2986_v4  ;;  %v1090_v18 = vld [vmem:[%s6695_s1 + $0x3f8] sm:$0xff]  ;;  %s9520_s1 = sld [smem:[#allocation31_spill]] }
 0x3a7   : > { %v5630_v35 = vpop.eup %5629  ;;  %v2106_v47 = vmul.f32 0.6931472, %v5628_v51  ;;  %v3112_v8 = vmul.f32 %v8856_v16, %v8856_v16  ;;  %v3238_v20 = vadd.f32 %v3237_v34, %v3111_v55  ;;  %4583 = vmatprep.subr.bf16.mxu1 %v4582_v5  ;;  %v3387_v58 = vmul.f32 %v1090_v18, %v1090_v18  ;;  %v827_v34 = vld [vmem:[%s6678_s14 + $0x3c0] sm:$0xff] }
 0x3a8   : > { %v5632_v9 = vpop.eup %5631  ;;  %v1853_v46 = vadd.f32 1.0, %v5630_v35  ;;  %v3512_v13 = vadd.f32 %v3511_v0, %v3385_v24  ;;  %5643 = vpow2.f32 %v2987_v43  ;;  %v1218_v45 = vmax.f32 %v8881_v23, 0.0  ;;  %v831_v4 = vld [vmem:[%s6678_s14 + $0x3e0] sm:$0xff] }
 0x3a9   : > { %v5634_v42 = vpop.eup %5633  ;;  %v2238_v62 = vadd.f32 %v2106_v47, %v1214_v3  ;;  %v3758_v53 = vmul.f32 0.6931472, %v5632_v9  ;;  %v3895_v31 = vadd.f32 %v3894_v22, %v3756_v61  ;;  %v3113_v3 = vmul.f32 %v8954_v29, %v8954_v29 }
 0x3aa   : > { %v1857_v63 = vadd.f32 1.0, %v5634_v42  ;;  %5645 = vlog2.f32 %v1853_v46  ;;  %v3513_v16 = vadd.f32 %v3512_v13, %v3386_v33  ;;  %v3239_v25 = vadd.f32 %v3238_v20, %v3112_v8  ;;  %v829_v13 = vld [vmem:[%s6678_s14 + $0x3d0] sm:$0xff] }
 0x3ab   : > { %v5636_v28 = vpop.eup %5635  ;;  %5647 = vlog2.f32 %v8876_v41  ;;  %v2366_v59 = vmul.f32 %v2238_v62, %v1086_v2  ;;  %v1211_v44 = vmax.f32 %v8909_v40, 0.0  ;;  %v1215_v41 = vmax.f32 %v8916_v36, 0.0 }
 0x3ac   : > { %v2114_v26 = vmul.f32 0.6931472, %v5636_v28  ;;  %5649 = vlog2.f32 %v1857_v63  ;;  %v3514_v23 = vadd.f32 %v3513_v16, %v3387_v58  ;;  %v3760_v12 = vmul.f32 0.6931472, %v5626_v49  ;;  %p4506_p4 = scmp.ne.s32.totalorder %s9520_s1, 1 }
 0x3ad   : > { %v3896_v48 = vadd.f32 %v3895_v31, %v3758_v53  ;;  %v2494_v56 = vadd.f32 %v2366_v59, %v830_v14  ;;  %v3114_v40 = vmul.f32 %v8891_v6, %v8891_v6  ;;  %v3240_v60 = vadd.f32 %v3239_v25, %v3113_v3 }
 0x3ae   : > { %v5638_v52 = vpop.eup %5637  ;;  %v9010_v27 = vadd.f32 %v2114_v26, %v1218_v45  ;;  %3515 = vadd.xlane.f32.xlu0 %v3514_v23  ;;  %5651 = vlog2.f32 %v8959_v37  ;;  %v1213_v61 = vmax.f32 %v8930_v30, 0.0  ;;  %v1217_v43 = vmax.f32 %v8933_v19, 0.0 }
 0x3af   : > { %v5640_v32 = vpop.eup %5639  ;;  %v2100_v2 = vmul.f32 0.6931472, %v5638_v52  ;;  %v3897_v38 = vadd.f32 %v3896_v48, %v3760_v12  ;;  %v3241_v0 = vadd.f32 %v3240_v60, %v3114_v40  ;;  %v3920_v28 = vlaneseq  ;;  %v2536_v48 = vld [vmem:[%s6670_s3 + $0x28] sm:$0xff]  ;;  %v2535_v60 = vld [vmem:[%s6670_s3 + $0x20] sm:$0xff] }
 0x3b0   : > { %v5642_v1 = vpop.eup %5641  ;;  %v2370_v29 = vmul.f32 %v9010_v27, %v1090_v18  ;;  %v2108_v50 = vmul.f32 0.6931472, %v5640_v32  ;;  %v3118_v3 = vmul.f32 %v2494_v56, %v2494_v56  ;;  %v2984_v52 = vmax.f32 %v8977_v54, 0.0 }
 0x3b1   : > { %v2235_v36 = vadd.f32 %v2100_v2, %v1211_v44  ;;  %v3762_v5 = vmul.f32 0.6931472, %v5642_v1  ;;  %v2531_v44 = vld [vmem:[%s6670_s3] sm:$0xff]  ;;  %v3120_v54 = vmul.f32 %v8991_v21, %v8991_v21 }
 0x3b2   : > { %v9018_v55 = vadd.f32 %v2370_v29, %v834_v15  ;;  %v2239_v49 = vadd.f32 %v2108_v50, %v1215_v41  ;;  %v5644_v24 = vpop.eup %5643  ;;  %v3921_v41 = vshrl.u32 %v3920_v28, 7  ;;  %v2543_v28 = vld [vmem:[%s6670_s3 + $0x60] sm:$0xff] }
 0x3b3   : > { %v2363_v51 = vmul.f32 %v2235_v36, %v8941_v7  ;;  %5653 = vlog2.f32 %v2235_v36  ;;  %v2989_v37 = vadd.f32 1.0, %v5644_v24  ;;  %v3116_v7 = vmul.f32 %v8981_v17, %v8981_v17  ;;  %v833_v17 = vld [vmem:[%s6678_s14 + $0x3f0] sm:$0xff]  ;;  %s9518_s14 = scalar_lea.vmem [#allocation14], %s6685_s21  ;;  %v2540_v24 = vld [vmem:[%s6670_s3 + $0x48] sm:$0xff] }
 0x3b4   : > { %v5646_v22 = vpop.eup %5645  ;;  %v4646_v6 = vpack.c.bf16 %v9018_v55, %v2494_v56  ;;  %v2367_v35 = vmul.f32 %v2239_v49, %v8984_v11  ;;  %v3898_v42 = vadd.f32 %v3897_v38, %v3762_v5  ;;  %v9043_v36 = vsub.s32 0, %v3921_v41 }
 0x3b5   : > { %v5648_v47 = vpop.eup %5647  ;;  %v2491_v33 = vadd.f32 %v2363_v51, %v827_v34  ;;  %v2104_v9 = vmul.f32 0.6931472, %v5646_v22  ;;  %5655 = vlog2.f32 %v2989_v37  ;;  %v2533_v37 = vld [vmem:[%s6670_s3 + $0x10] sm:$0xff] }
 0x3b6   : > { %v5650_v8 = vpop.eup %5649  ;;  %4647 = vmatprep.subr.bf16.mxu0 %v4646_v6  ;;  %v2495_v30 = vadd.f32 %v2367_v35, %v831_v4  ;;  %5657 = vlog2.f32 %v2238_v62  ;;  %v3764_v46 = vmul.f32 0.6931472, %v5648_v47 }
 0x3b7   : > { %v3115_v20 = vmul.f32 %v2491_v33, %v2491_v33  ;;  %v2112_v18 = vmul.f32 0.6931472, %v5650_v8  ;;  %v2237_v11 = vadd.f32 %v2104_v9, %v1213_v61  ;;  %5659 = vlog2.f32 %v2239_v49  ;;  %v2981_v61 = vld [vmem:[%s9519_s29] sm:$0x3] }
 0x3b8   : > { %v4584_v58 = vpack.c.bf16 %v2495_v30, %v2491_v33  ;;  %v5652_v53 = vpop.eup %5651  ;;  %v3899_v26 = vadd.f32 %v3898_v42, %v3764_v46  ;;  %v3119_v32 = vmul.f32 %v2495_v30, %v2495_v30  ;;  %v3122_v33 = vmul.f32 %v9018_v55, %v9018_v55  ;;  %v2539_v9 = vld [vmem:[%s6670_s3 + $0x40] sm:$0xff] }
 0x3b9   : > { %v3242_v45 = vadd.f32 %v3241_v0, %v3115_v20  ;;  %v2241_v19 = vadd.f32 %v2112_v18, %v1217_v43  ;;  %v2365_v63 = vmul.f32 %v2237_v11, %v8962_v57  ;;  %5661 = vlog2.f32 %v2237_v11  ;;  %v2538_v43 = vld [vmem:[%s6670_s3 + $0x38] sm:$0xff]  ;;  %v2544_v20 = vld [vmem:[%s6670_s3 + $0x68] sm:$0xff] }
 0x3ba   : > { %4585 = vmatpush1.bf16.xpose.msra.mxu1 %v4584_v58  ;;  %5663 = vlog2.f32 %v8971_v39  ;;  %v3768_v57 = vmul.f32 0.6931472, %v5652_v53  ;;  %v2983_v39 = vld [vmem:[%s9518_s14] sm:$0x3] }
 0x3bb   : > { %v2369_v62 = vmul.f32 %v2241_v19, %v8997_v10  ;;  %v2493_v31 = vadd.f32 %v2365_v63, %v829_v13  ;;  %v3243_v16 = vadd.f32 %v3242_v45, %v3116_v7  ;;  %5665 = vlog2.f32 %v2241_v19  ;;  %v2537_v45 = vld [vmem:[%s6670_s3 + $0x30] sm:$0xff] }
 0x3bc   : > { %5667 = vlog2.f32 %v9010_v27  ;;  %v3944_v2 = vmul.f32 %v2983_v39, %v2983_v39  ;;  %v9045_v27 = vsub.s32 1, %v3921_v41 }
 0x3bd   : > { %v5654_v59 = vpop.eup %5653  ;;  %v2497_v25 = vadd.f32 %v2369_v62, %v833_v17  ;;  %v3117_v14 = vmul.f32 %v2493_v31, %v2493_v31  ;;  %v2542_v17 = vld [vmem:[%s6670_s3 + $0x58] sm:$0xff] }
 0x3be   : > { %v3766_v23 = vmul.f32 0.6931472, %v5654_v59  ;;  %v3949_v21 = vrot.slane %v3944_v2, %v9043_v36  ;;  %v3953_v22 = vrot.slane %v3944_v2, %v9045_v27  ;;  %v2550_v2 = vld [vmem:[%s6670_s3 + $0x98] sm:$0xff] }
 0x3bf   : > { %v4648_v10 = vpack.c.bf16 %v2497_v25, %v2493_v31  ;;  %v3244_v12 = vadd.f32 %v3243_v16, %v3117_v14  ;;  %v5656_v15 = vpop.eup %5655  ;;  %v3121_v4 = vmul.f32 %v2497_v25, %v2497_v25  ;;  %v2548_v31 = vld [vmem:[%s6670_s3 + $0x88] sm:$0xff]  ;;  %v2541_v14 = vld [vmem:[%s6670_s3 + $0x50] sm:$0xff] }
 0x3c0   : > { %v3900_v1 = vadd.f32 %v3899_v26, %v3766_v23  ;;  %v5658_v29 = vpop.eup %5657  ;;  %v2991_v56 = vmul.f32 0.6931472, %v5656_v15  ;;  %v3956_v55 = vsel %vm3930_vm0, %v3949_v21, 0.0  ;;  %v3957_v46 = vsel %vm3930_vm0, %v3953_v22, 0.0  ;;  %v2546_v23 = vld [vmem:[%s6670_s3 + $0x78] sm:$0xff]  ;;  %v2545_v15 = vld [vmem:[%s6670_s3 + $0x70] sm:$0xff] }
 0x3c1   : > { %4649 = vmatpush1.bf16.xpose.msra.mxu0 %v4648_v10  ;;  %2660 = vmatmul.mubr.f32.vlgmr.msra.gmra.mrb[0].mxu1 %v2531_v44  ;;  %v3245_v50 = vadd.f32 %v3244_v12, %v3118_v3  ;;  %v5660_v40 = vpop.eup %5659  ;;  %v3772_v6 = vmul.f32 0.6931472, %v5658_v29  ;;  %v3958_v59 = vadd.f32 %v3957_v46, %v3956_v55  ;;  %v2552_v12 = vld [vmem:[%s6670_s3 + $0xa8] sm:$0xff]  ;;  %v2557_v22 = vld [vmem:[%s6670_s3 + $0xd0] sm:$0xff] }
 0x3c2   : > { %2665 = vmatprep.mubr.f32.mxu1 %v2536_v48  ;;  %v3901_v34 = vadd.f32 %v3900_v1, %v3768_v57  ;;  %v2992_v38 = vadd.f32 %v2991_v56, %v2984_v52  ;;  %v3774_v8 = vmul.f32 0.6931472, %v5660_v40  ;;  %v2547_v52 = vld [vmem:[%s6670_s3 + $0x80] sm:$0xff]  ;;  %v2564_v21 = vld [vmem:[%s6670_s3 + $0x108] sm:$0xff]  ;;  %v2573_v46 = vld [vmem:[%s6670_s3 + $0x150] sm:$0xff] }
 0x3c3   : > { %v5662_v49 = vpop.eup %5661  ;;  %v3246_v51 = vadd.f32 %v3245_v50, %v3119_v32  ;;  %v2551_v1 = vld [vmem:[%s6670_s3 + $0xa0] sm:$0xff]  ;;  %v2580_v55 = vld [vmem:[%s6670_s3 + $0x188] sm:$0xff] }
 0x3c4   : > { %v3770_v5 = vmul.f32 0.6931472, %v5662_v49  ;;  %v5664_v35 = vpop.eup %5663  ;;  %v2993_v47 = vmul.f32 %v2992_v38, %v2983_v39  ;;  %5669 = vlog2.f32 %v2992_v38  ;;  %v2554_v49 = vld [vmem:[%s6670_s3 + $0xb8] sm:$0xff]  ;;  %v2560_v38 = vld [vmem:[%s6670_s3 + $0xe8] sm:$0xff] }
 0x3c5   : > { %2666 = vmatmul.mubr.f32.gmra.mrb[2].mxu1 %v2535_v60  ;;  %v3247_v0 = vadd.f32 %v3246_v51, %v3120_v54  ;;  %v5666_v30 = vpop.eup %5665  ;;  %v3776_v42 = vmul.f32 0.6931472, %v5664_v35  ;;  %v2556_v54 = vld [vmem:[%s6670_s3 + $0xc8] sm:$0xff]  ;;  %v2549_v60 = vld [vmem:[%s6670_s3 + $0x90] sm:$0xff]  ;;  %v2558_v51 = vld [vmem:[%s6670_s3 + $0xd8] sm:$0xff] }
 0x3c6   : > { %2671 = vmatprep.mubr.f32.mxu1 %v2540_v24  ;;  %v3902_v7 = vadd.f32 %v3901_v34, %v3770_v5  ;;  %v9058_v18 = vadd.f32 %v2993_v47, %v2981_v61  ;;  %v5668_v13 = vpop.eup %5667  ;;  %v3778_v53 = vmul.f32 0.6931472, %v5666_v30  ;;  %v2555_v24 = vld [vmem:[%s6670_s3 + $0xc0] sm:$0xff]  ;;  %v2562_v5 = vld [vmem:[%s6670_s3 + $0xf8] sm:$0xff]  ;;  %v2568_v35 = vld [vmem:[%s6670_s3 + $0x128] sm:$0xff] }
 0x3c7   : > { %v3248_v11 = vadd.f32 %v3247_v0, %v3121_v4  ;;  %v3780_v3 = vmul.f32 0.6931472, %v5668_v13  ;;  %v2553_v4 = vld [vmem:[%s6670_s3 + $0xb0] sm:$0xff]  ;;  %v2559_v61 = vld [vmem:[%s6670_s3 + $0xe0] sm:$0xff]  ;;  %v2566_v47 = vld [vmem:[%s6670_s3 + $0x118] sm:$0xff] }
 0x3c8   : > { %2821 = vmatmul.mubr.f32.vlgmr.msra.gmra.mrb[0].mxu0 %v2533_v37  ;;  %v3903_v58 = vadd.f32 %v3902_v7, %v3772_v6  ;;  %v3918_v19 = vmul.f32 %v9058_v18, %v9058_v18  ;;  %v2563_v6 = vld [vmem:[%s6670_s3 + $0x100] sm:$0xff]  ;;  %v2561_v37 = vld [vmem:[%s6670_s3 + $0xf0] sm:$0xff]  ;;  %v2572_v0 = vld [vmem:[%s6670_s3 + $0x148] sm:$0xff] }
 0x3c9   : > { %2826 = vmatprep.mubr.f32.mxu0 %v2538_v43  ;;  %2672 = vmatmul.mubr.f32.gmra.mrb[4].mxu1 %v2539_v9  ;;  %v3249_v63 = vadd.f32 %v3248_v11, %v3122_v33  ;;  %v2567_v33 = vld [vmem:[%s6670_s3 + $0x120] sm:$0xff]  ;;  %v2565_v43 = vld [vmem:[%s6670_s3 + $0x110] sm:$0xff]  ;;  %v2570_v9 = vld [vmem:[%s6670_s3 + $0x138] sm:$0xff] }
 0x3ca   : > { %2677 = vmatprep.mubr.f32.mxu1 %v2544_v20  ;;  %v3904_v62 = vadd.f32 %v3903_v58, %v3774_v8  ;;  %v3923_v16 = vrot.slane %v3918_v19, %v9043_v36  ;;  %v3927_v26 = vrot.slane %v3918_v19, %v9045_v27  ;;  %v2571_v8 = vld [vmem:[%s6670_s3 + $0x140] sm:$0xff]  ;;  %v2576_v7 = vld [vmem:[%s6670_s3 + $0x168] sm:$0xff]  ;;  %v2569_v30 = vld [vmem:[%s6670_s3 + $0x130] sm:$0xff] }
 0x3cb   : > { %3250 = vadd.xlane.f32.xlu0 %v3249_v63  ;;  %v2574_v20 = vld [vmem:[%s6670_s3 + $0x158] sm:$0xff]  ;;  %v2575_v11 = vld [vmem:[%s6670_s3 + $0x160] sm:$0xff]  ;;  %v2584_v13 = vld [vmem:[%s6670_s3 + $0x1a8] sm:$0xff] }
 0x3cc   : > { %2827 = vmatmul.mubr.f32.gmra.mrb[2].mxu0 %v2537_v45  ;;  %v3905_v25 = vadd.f32 %v3904_v62, %v3776_v42  ;;  %v3931_v44 = vsel %vm3930_vm0, %v3923_v16, 0.0  ;;  %v3932_v57 = vsel %vm3930_vm0, %v3927_v26, 0.0  ;;  %v2578_v42 = vld [vmem:[%s6670_s3 + $0x178] sm:$0xff]  ;;  %v2579_v58 = vld [vmem:[%s6670_s3 + $0x180] sm:$0xff]  ;;  %v2577_v45 = vld [vmem:[%s6670_s3 + $0x170] sm:$0xff] }
 0x3cd   : > { %2832 = vmatprep.mubr.f32.mxu0 %v2542_v17  ;;  %2678 = vmatmul.mubr.f32.gmra.mrb[6].mxu1 %v2543_v28  ;;  %v3933_v41 = vadd.f32 %v3932_v57, %v3931_v44  ;;  %v2582_v19 = vld [vmem:[%s6670_s3 + $0x198] sm:$0xff]  ;;  %v2583_v63 = vld [vmem:[%s6670_s3 + $0x1a0] sm:$0xff]  ;;  %v2588_v17 = vld [vmem:[%s6670_s3 + $0x1c8] sm:$0xff] }
 0x3ce   : > { %2683 = vmatprep.mubr.f32.mxu1 %v2548_v31  ;;  %v3906_v32 = vadd.f32 %v3905_v25, %v3778_v53  ;;  %v5670_v10 = vpop.eup %5669  ;;  %v2581_v28 = vld [vmem:[%s6670_s3 + $0x190] sm:$0xff]  ;;  %v2586_v53 = vld [vmem:[%s6670_s3 + $0x1b8] sm:$0xff]  ;;  %v2587_v62 = vld [vmem:[%s6670_s3 + $0x1c0] sm:$0xff] }
 0x3cf   : > { %3959 = vadd.xlane.f32.xlu0 %v3958_v59  ;;  %3934 = vadd.xlane.f32.xlu1 %v3933_v41  ;;  %v3970_v39 = vmul.f32 0.6931472, %v5670_v10  ;;  %v2592_v31 = vld [vmem:[%s6670_s3 + $0x1e8] sm:$0xff]  ;;  %v2585_v16 = vld [vmem:[%s6670_s3 + $0x1b0] sm:$0xff]  ;;  %v2590_v26 = vld [vmem:[%s6670_s3 + $0x1d8] sm:$0xff] }
 0x3d0   : > { %2833 = vmatmul.mubr.f32.gmra.mrb[4].mxu0 %v2541_v14  ;;  %v3907_v48 = vadd.f32 %v3906_v32, %v3780_v3  ;;  %v2591_v59 = vld [vmem:[%s6670_s3 + $0x1e0] sm:$0xff]  ;;  %v2589_v3 = vld [vmem:[%s6670_s3 + $0x1d0] sm:$0xff]  ;;  %v2594_v25 = vld [vmem:[%s6670_s3 + $0x1f8] sm:$0xff] }
 0x3d1   : > { %2838 = vmatprep.mubr.f32.mxu0 %v2546_v23  ;;  %2684 = vmatmul.mubr.f32.gmra.mrb[8].mxu1 %v2547_v52  ;;  %v3975_v29 = vrot.slane %v3970_v39, %v9043_v36  ;;  %v3979_v56 = vrot.slane %v3970_v39, %v9045_v27  ;;  %v2593_v14 = vld [vmem:[%s6670_s3 + $0x1f0] sm:$0xff] }
 0x3d2   : > { %2689 = vmatprep.mubr.f32.mxu1 %v2552_v12 }
 0x3d3   : > { %3908 = vadd.xlane.f32.xlu1 %v3907_v48  ;;  %v3982_v50 = vsel %vm3930_vm0, %v3975_v29, 0.0  ;;  %v3983_v40 = vsel %vm3930_vm0, %v3979_v56, 0.0 }
 0x3d4   : > { %2839 = vmatmul.mubr.f32.gmra.mrb[6].mxu0 %v2545_v15  ;;  %v3984_v34 = vadd.f32 %v3983_v40, %v3982_v50 }
 0x3d5   : > { %2844 = vmatprep.mubr.f32.mxu0 %v2550_v2  ;;  %2690 = vmatmul.mubr.f32.gmra.mrb[10].mxu1 %v2551_v1 }
 0x3d6   : > { %2695 = vmatprep.mubr.f32.mxu1 %v2556_v54 }
 0x3d7   : > { %3985 = vadd.xlane.f32.xlu1 %v3984_v34 }
 0x3d8   : > { %2845 = vmatmul.mubr.f32.gmra.mrb[8].mxu0 %v2549_v60 }
 0x3d9   : > { %2850 = vmatprep.mubr.f32.mxu0 %v2554_v49  ;;  %2696 = vmatmul.mubr.f32.gmra.mrb[12].mxu1 %v2555_v24 }
 0x3da   : > { %2701 = vmatprep.mubr.f32.mxu1 %v2560_v38 }
 0x3dc   : > { %2851 = vmatmul.mubr.f32.gmra.mrb[10].mxu0 %v2553_v4 }
 0x3dd   : > { %2856 = vmatprep.mubr.f32.mxu0 %v2558_v51  ;;  %2702 = vmatmul.mubr.f32.gmra.mrb[14].mxu1 %v2559_v61 }
 0x3de   : > { %2707 = vmatprep.mubr.f32.mxu1 %v2564_v21 }
 0x3e0   : > { %2857 = vmatmul.mubr.f32.gmra.mrb[12].mxu0 %v2557_v22 }
 0x3e1   : > { %2862 = vmatprep.mubr.f32.mxu0 %v2562_v5  ;;  %2708 = vmatmul.mubr.f32.gmra.mrb[16].mxu1 %v2563_v6 }
 0x3e2   : > { %2713 = vmatprep.mubr.f32.mxu1 %v2568_v35 }
 0x3e4   : > { %2863 = vmatmul.mubr.f32.gmra.mrb[14].mxu0 %v2561_v37 }
 0x3e5   : > { %2868 = vmatprep.mubr.f32.mxu0 %v2566_v47  ;;  %2714 = vmatmul.mubr.f32.gmra.mrb[18].mxu1 %v2567_v33 }
 0x3e6   : > { %2719 = vmatprep.mubr.f32.mxu1 %v2572_v0 }
 0x3e8   : > { %2869 = vmatmul.mubr.f32.gmra.mrb[16].mxu0 %v2565_v43 }
 0x3e9   : > { %2874 = vmatprep.mubr.f32.mxu0 %v2570_v9  ;;  %2720 = vmatmul.mubr.f32.gmra.mrb[20].mxu1 %v2571_v8 }
 0x3ea   : > { %2725 = vmatprep.mubr.f32.mxu1 %v2576_v7 }
 0x3ec   : > { %2875 = vmatmul.mubr.f32.gmra.mrb[18].mxu0 %v2569_v30 }
 0x3ed   : > { %2880 = vmatprep.mubr.f32.mxu0 %v2574_v20  ;;  %2726 = vmatmul.mubr.f32.gmra.mrb[22].mxu1 %v2575_v11 }
 0x3ee   : > { %2731 = vmatprep.mubr.f32.mxu1 %v2580_v55 }
 0x3f0   : > { %2881 = vmatmul.mubr.f32.gmra.mrb[20].mxu0 %v2573_v46 }
 0x3f1   : > { %2886 = vmatprep.mubr.f32.mxu0 %v2578_v42  ;;  %2732 = vmatmul.mubr.f32.gmra.mrb[24].mxu1 %v2579_v58 }
 0x3f2   : > { %2737 = vmatprep.mubr.f32.mxu1 %v2584_v13  ;;  %v2499_v13 = vld [vmem:[#allocation2] sm:$0xff] }
 0x3f4   : > { %2887 = vmatmul.mubr.f32.gmra.mrb[22].mxu0 %v2577_v45 }
 0x3f5   : > { %2892 = vmatprep.mubr.f32.mxu0 %v2582_v19  ;;  %2738 = vmatmul.mubr.f32.gmra.mrb[26].mxu1 %v2583_v63  ;;  %v2500_v63 = vld [vmem:[#allocation2 + $0x8] sm:$0xff] }
 0x3f6   : > { %2743 = vmatprep.mubr.f32.mxu1 %v2588_v17 }
 0x3f8   : > { %2893 = vmatmul.mubr.f32.gmra.mrb[24].mxu0 %v2581_v28 }
 0x3f9   : > { %2898 = vmatprep.mubr.f32.mxu0 %v2586_v53  ;;  %2744 = vmatmul.mubr.f32.gmra.mrb[28].mxu1 %v2587_v62 }
 0x3fa   : > { %2749 = vmatprep.mubr.f32.mxu1 %v2592_v31 }
 0x3fc   : > { %2899 = vmatmul.mubr.f32.gmra.mrb[26].mxu0 %v2585_v16 }
 0x3fd   : > { %2904 = vmatprep.mubr.f32.mxu0 %v2590_v26  ;;  %2750 = vmatmul.mubr.f32.gmra.mrb[30].mxu1 %v2591_v59  ;;  %v2501_v26 = vld [vmem:[#allocation2 + $0x10] sm:$0xff] }
 0x400   : > { %2905 = vmatmul.mubr.f32.gmra.mrb[28].mxu0 %v2589_v3 }
 0x401   : > { %2910 = vmatprep.mubr.f32.mxu0 %v2594_v25  ;;  %v2502_v25 = vld [vmem:[#allocation2 + $0x18] sm:$0xff] }
 0x404   : > { %2911 = vmatmul.mubr.f32.gmra.mrb[30].mxu0 %v2593_v14 }
 0x43b   : > { %v3516_v44 = vpop.xlane.xlu0 %3515 }
 0x43c   : > { %v3517_v57 = vrot.slane %v3516_v44, 4 }
 0x43e   : > { %v3518_v23 = vadd.f32 %v3517_v57, %v3516_v44 }
 0x440   : > { %v3519_v52 = vrot.slane %v3518_v23, 2 }
 0x442   : > { %v3520_v48 = vadd.f32 %v3519_v52, %v3518_v23 }
 0x444   : > { %v3521_v50 = vrot.slane %v3520_v48, 1 }
 0x446   : > { %v3522_v51 = vadd.f32 %v3521_v50, %v3520_v48  ;;  %v2504_v48 = vld [vmem:[#allocation2 + $0x28] sm:$0xff] }
 0x458   : > { %v3251_v41 = vpop.xlane.xlu0 %3250 }
 0x459   : > { %v3252_v32 = vrot.slane %v3251_v41, 4 }
 0x45b   : > { %v3253_v10 = vadd.f32 %v3252_v32, %v3251_v41  ;;  %v2503_v32 = vld [vmem:[#allocation2 + $0x20] sm:$0xff] }
 0x45c   : > { %v3960_v12 = vpop.xlane.xlu0 %3959  ;;  %v3935_v39 = vpop.xlane.xlu1 %3934 }
 0x45d   : > { %v3254_v15 = vrot.slane %v3253_v10, 2  ;;  %v3961_v2 = vrot.slane %v3960_v12, 4  ;;  %v3936_v1 = vrot.slane %v3935_v39, 4 }
 0x45f   : > { %v3962_v29 = vadd.f32 %v3961_v2, %v3960_v12  ;;  %v3255_v56 = vadd.f32 %v3254_v15, %v3253_v10  ;;  %v3937_v54 = vadd.f32 %v3936_v1, %v3935_v39 }
 0x460   : > { %v3909_v40 = vpop.xlane.xlu1 %3908 }
 0x461   : > { %v3256_v60 = vrot.slane %v3255_v56, 1  ;;  %v3938_v34 = vrot.slane %v3937_v54, 2  ;;  %v3963_v49 = vrot.slane %v3962_v29, 2  ;;  %v3910_v24 = vrot.slane %v3909_v40, 4 }
 0x463   : > { %v3257_v38 = vadd.f32 %v3256_v60, %v3255_v56  ;;  %v3911_v4 = vadd.f32 %v3910_v24, %v3909_v40  ;;  %v3939_v21 = vadd.f32 %v3938_v34, %v3937_v54  ;;  %v3964_v22 = vadd.f32 %v3963_v49, %v3962_v29  ;;  %v2505_v54 = vld [vmem:[#allocation2 + $0x30] sm:$0xff]  ;;  %v2506_v34 = vld [vmem:[#allocation2 + $0x38] sm:$0xff] }
 0x464   : > { %v3986_v61 = vpop.xlane.xlu1 %3985 }
 0x465   : > { %4682 = vpush %v3257_v38  ;;  %v3912_v5 = vrot.slane %v3911_v4, 2  ;;  %v3987_v6 = vrot.slane %v3986_v61, 4  ;;  %v3940_v47 = vrot.slane %v3939_v21, 1  ;;  %v3965_v43 = vrot.slane %v3964_v22, 1 }
 0x466   : > { %4684 = vpush %v3522_v51 }
 0x467   : > { %v3988_v35 = vadd.f32 %v3987_v6, %v3986_v61  ;;  %v3913_v37 = vadd.f32 %v3912_v5, %v3911_v4  ;;  %v3941_v7 = vadd.f32 %v3940_v47, %v3939_v21  ;;  %v3966_v30 = vadd.f32 %v3965_v43, %v3964_v22  ;;  %v2507_v21 = vld [vmem:[#allocation2 + $0x40] sm:$0xff]  ;;  %v2508_v6 = vld [vmem:[#allocation2 + $0x48] sm:$0xff] }
 0x469   : > { %v3989_v33 = vrot.slane %v3988_v35, 2  ;;  %v3914_v0 = vrot.slane %v3913_v37, 1 }
 0x46b   : > { %v3990_v9 = vadd.f32 %v3989_v33, %v3988_v35  ;;  %v3915_v8 = vadd.f32 %v3914_v0, %v3913_v37 }
 0x46d   : > { %4686 = vpush %v3915_v8  ;;  %v3991_v20 = vrot.slane %v3990_v9, 1  ;;  %v2509_v8 = vld [vmem:[#allocation2 + $0x50] sm:$0xff] }
 0x46e   : > { %4688 = vpush %v3941_v7 }
 0x46f   : > { %4690 = vpush %v3966_v30  ;;  %v3992_v11 = vadd.f32 %v3991_v20, %v3990_v9  ;;  %v2510_v20 = vld [vmem:[#allocation2 + $0x58] sm:$0xff] }
 0x471   : > { %4692 = vpush %v3992_v11 }
 0x494   : > { %v2661_v55 = vpop.f32.mrb[0].mxu1 }
 0x495   : > { %v2663_v46 = vpop.f32.mrb[1].mxu1 }
 0x496   : > { %s9126_s3 = spop %4682 }
 0x497   : > { %s9128_s21 = spop %4684  ;;  %s3259_s15 = smul.f32 -0.5, %s9126_s3 }
 0x498   : > { %v2667_v42 = vpop.f32.mrb[2].mxu1  ;;  %s3524_s22 = smul.f32 -0.5, %s9128_s21 }
 0x499   : > { %v2669_v58 = vpop.f32.mrb[3].mxu1 }
 0x49b   : > { %v2822_v45 = vpop.f32.mrb[0].mxu0 }
 0x49c   : > { %v2823_v19 = vadd.f32 %v2822_v45, %v2661_v55  ;;  %v2824_v17 = vpop.f32.mrb[1].mxu0  ;;  %v2673_v28 = vpop.f32.mrb[4].mxu1  ;;  %v2511_v45 = vld [vmem:[#allocation2 + $0x60] sm:$0xff] }
 0x49d   : > { %v2825_v53 = vadd.f32 %v2824_v17, %v2663_v46  ;;  %v2675_v62 = vpop.f32.mrb[5].mxu1  ;;  %v2512_v17 = vld [vmem:[#allocation2 + $0x68] sm:$0xff] }
 0x49e   : > { %v2917_v31 = vadd.f32 %v2823_v19, %v2499_v13  ;;  %s9130_s2 = spop %4686 }
 0x49f   : > { %v2918_v16 = vadd.f32 %v2825_v53, %v2500_v63  ;;  %v2828_v59 = vpop.f32.mrb[2].mxu0  ;;  %s4689_s19 = spop %4688  ;;  %s3917_s18 = ssub.f32 %s3524_s22, %s9130_s2 }
 0x4a0   : > { %2949 = vst [vmem:[#allocation2] sm:$0xff] %v2917_v31  ;;  %v2829_v3 = vadd.f32 %v2828_v59, %v2667_v42  ;;  %v2830_v14 = vpop.f32.mrb[3].mxu0  ;;  %v2679_v44 = vpop.f32.mrb[6].mxu1  ;;  %s3943_s16 = smul.f32 -0.5, %s4689_s19  ;;  %s4691_s25 = spop %4690  ;;  %v2513_v59 = vld [vmem:[#allocation2 + $0x70] sm:$0xff] }
 0x4a1   : > { %2950 = vst [vmem:[#allocation2 + $0x8] sm:$0xff] %v2918_v16  ;;  %v2831_v57 = vadd.f32 %v2830_v14, %v2669_v58  ;;  %v2681_v23 = vpop.f32.mrb[7].mxu1  ;;  %s3968_s28 = smul.f32 -0.5, %s4691_s25  ;;  %v2514_v14 = vld [vmem:[#allocation2 + $0x78] sm:$0xff] }
 0x4a2   : > { %v2919_v52 = vadd.f32 %v2829_v3, %v2501_v26  ;;  %s9570_s16 = smov (!%p671_p8, %s3943_s16), 0.0  ;;  %s4693_s12 = spop %4692 }
 0x4a3   : > { %v2920_v41 = vadd.f32 %v2831_v57, %v2502_v25  ;;  %v2834_v10 = vpop.f32.mrb[4].mxu0  ;;  %s3996_s20 = sadd.f32 %s9570_s16, %s3259_s15 }
 0x4a4   : > { %2951 = vst [vmem:[#allocation2 + $0x10] sm:$0xff] %v2919_v52  ;;  %v2835_v12 = vadd.f32 %v2834_v10, %v2673_v28  ;;  %v2836_v39 = vpop.f32.mrb[5].mxu0  ;;  %v2685_v15 = vpop.f32.mrb[8].mxu1  ;;  %s3994_s23 = ssub.f32 %s3968_s28, %s4693_s12  ;;  %v2515_v10 = vld [vmem:[#allocation2 + $0x80] sm:$0xff] }
 0x4a5   : > { %2952 = vst [vmem:[#allocation2 + $0x18] sm:$0xff] %v2920_v41  ;;  %v2837_v2 = vadd.f32 %v2836_v39, %v2675_v62  ;;  %v2687_v1 = vpop.f32.mrb[9].mxu1  ;;  %v3999_v40 = vstv %s3996_s20  ;;  %v2516_v39 = vld [vmem:[#allocation2 + $0x88] sm:$0xff] }
 0x4a6   : > { %v2921_v29 = vadd.f32 %v2835_v12, %v2503_v32  ;;  %4000 = vst [vmem:[%s6717_s30] sm:$0xff] %v3999_v40  ;;  %s9572_s23 = smov (!%p671_p8, %s3994_s23), 0.0 }
 0x4a7   : > { %v2922_v56 = vadd.f32 %v2837_v2, %v2504_v48  ;;  %v2840_v50 = vpop.f32.mrb[6].mxu0  ;;  %s3998_s0 = sadd.f32 %s9572_s23, %s3917_s18 }
 0x4a8   : > { %2953 = vst [vmem:[#allocation2 + $0x20] sm:$0xff] %v2921_v29  ;;  %v2841_v60 = vadd.f32 %v2840_v50, %v2679_v44  ;;  %v2842_v49 = vpop.f32.mrb[7].mxu0  ;;  %v2691_v24 = vpop.f32.mrb[10].mxu1  ;;  %v2517_v50 = vld [vmem:[#allocation2 + $0x90] sm:$0xff] }
 0x4a9   : > { %2954 = vst [vmem:[#allocation2 + $0x28] sm:$0xff] %v2922_v56  ;;  %v2843_v38 = vadd.f32 %v2842_v49, %v2681_v23  ;;  %v2693_v4 = vpop.f32.mrb[11].mxu1  ;;  %v4001_v47 = vstv %s3998_s0 }
 0x4aa   : > { %v2923_v51 = vadd.f32 %v2841_v60, %v2505_v54  ;;  %4002 = vst [vmem:[%s6722_s4] sm:$0xff] %v4001_v47 }
 0x4ab   : > { %v2924_v61 = vadd.f32 %v2843_v38, %v2506_v34  ;;  %v2846_v22 = vpop.f32.mrb[8].mxu0  ;;  %v2518_v34 = vld [vmem:[#allocation2 + $0x98] sm:$0xff] }
 0x4ac   : > { %2955 = vst [vmem:[#allocation2 + $0x30] sm:$0xff] %v2923_v51  ;;  %v2847_v5 = vadd.f32 %v2846_v22, %v2685_v15  ;;  %v2848_v35 = vpop.f32.mrb[9].mxu0  ;;  %v2697_v37 = vpop.f32.mrb[12].mxu1 }
 0x4ad   : > { %2956 = vst [vmem:[#allocation2 + $0x38] sm:$0xff] %v2924_v61  ;;  %v2849_v33 = vadd.f32 %v2848_v35, %v2687_v1  ;;  %v2699_v0 = vpop.f32.mrb[13].mxu1 }
 0x4ae   : > { %v2925_v43 = vadd.f32 %v2847_v5, %v2507_v21  ;;  %v2519_v21 = vld [vmem:[#allocation2 + $0xa0] sm:$0xff] }
 0x4af   : > { %v2926_v9 = vadd.f32 %v2849_v33, %v2508_v6  ;;  %v2852_v7 = vpop.f32.mrb[10].mxu0  ;;  %v2520_v6 = vld [vmem:[#allocation2 + $0xa8] sm:$0xff] }
 0x4b0   : > { %2957 = vst [vmem:[#allocation2 + $0x40] sm:$0xff] %v2925_v43  ;;  %v2853_v30 = vadd.f32 %v2852_v7, %v2691_v24  ;;  %v2854_v11 = vpop.f32.mrb[11].mxu0  ;;  %v2703_v55 = vpop.f32.mrb[14].mxu1 }
 0x4b1   : > { %2958 = vst [vmem:[#allocation2 + $0x48] sm:$0xff] %v2926_v9  ;;  %v2855_v46 = vadd.f32 %v2854_v11, %v2693_v4  ;;  %v2705_v42 = vpop.f32.mrb[15].mxu1  ;;  %v2521_v9 = vld [vmem:[#allocation2 + $0xb0] sm:$0xff] }
 0x4b2   : > { %v2927_v58 = vadd.f32 %v2853_v30, %v2509_v8  ;;  %v2522_v30 = vld [vmem:[#allocation2 + $0xb8] sm:$0xff] }
 0x4b3   : > { %v2928_v13 = vadd.f32 %v2855_v46, %v2510_v20  ;;  %v2858_v19 = vpop.f32.mrb[12].mxu0 }
 0x4b4   : > { %2959 = vst [vmem:[#allocation2 + $0x50] sm:$0xff] %v2927_v58  ;;  %v2859_v63 = vadd.f32 %v2858_v19, %v2697_v37  ;;  %v2860_v28 = vpop.f32.mrb[13].mxu0  ;;  %v2709_v53 = vpop.f32.mrb[16].mxu1 }
 0x4b5   : > { %2960 = vst [vmem:[#allocation2 + $0x58] sm:$0xff] %v2928_v13  ;;  %v2861_v62 = vadd.f32 %v2860_v28, %v2699_v0  ;;  %v2711_v31 = vpop.f32.mrb[17].mxu1  ;;  %v2523_v13 = vld [vmem:[#allocation2 + $0xc0] sm:$0xff] }
 0x4b6   : > { %v2929_v16 = vadd.f32 %v2859_v63, %v2511_v45  ;;  %v2524_v63 = vld [vmem:[#allocation2 + $0xc8] sm:$0xff] }
 0x4b7   : > { %v2930_v26 = vadd.f32 %v2861_v62, %v2512_v17  ;;  %v2864_v3 = vpop.f32.mrb[14].mxu0 }
 0x4b8   : > { %2961 = vst [vmem:[#allocation2 + $0x60] sm:$0xff] %v2929_v16  ;;  %v2865_v25 = vadd.f32 %v2864_v3, %v2703_v55  ;;  %v2866_v44 = vpop.f32.mrb[15].mxu0  ;;  %v2715_v57 = vpop.f32.mrb[18].mxu1 }
 0x4b9   : > { %2962 = vst [vmem:[#allocation2 + $0x68] sm:$0xff] %v2930_v26  ;;  %v2867_v23 = vadd.f32 %v2866_v44, %v2705_v42  ;;  %v2717_v52 = vpop.f32.mrb[19].mxu1  ;;  %v2525_v26 = vld [vmem:[#allocation2 + $0xd0] sm:$0xff] }
 0x4ba   : > { %v2931_v41 = vadd.f32 %v2865_v25, %v2513_v59  ;;  %v2526_v25 = vld [vmem:[#allocation2 + $0xd8] sm:$0xff] }
 0x4bb   : > { %v2932_v32 = vadd.f32 %v2867_v23, %v2514_v14  ;;  %v2870_v12 = vpop.f32.mrb[16].mxu0 }
 0x4bc   : > { %2963 = vst [vmem:[#allocation2 + $0x70] sm:$0xff] %v2931_v41  ;;  %v2871_v48 = vadd.f32 %v2870_v12, %v2709_v53  ;;  %v2872_v15 = vpop.f32.mrb[17].mxu0  ;;  %v2721_v2 = vpop.f32.mrb[20].mxu1 }
 0x4bd   : > { %2964 = vst [vmem:[#allocation2 + $0x78] sm:$0xff] %v2932_v32  ;;  %v2873_v1 = vadd.f32 %v2872_v15, %v2711_v31  ;;  %v2723_v29 = vpop.f32.mrb[21].mxu1  ;;  %v2527_v32 = vld [vmem:[#allocation2 + $0xe0] sm:$0xff] }
 0x4be   : > { %v2933_v56 = vadd.f32 %v2871_v48, %v2515_v10  ;;  %v2528_v48 = vld [vmem:[#allocation2 + $0xe8] sm:$0xff] }
 0x4bf   : > { %v2934_v54 = vadd.f32 %v2873_v1, %v2516_v39  ;;  %v2876_v40 = vpop.f32.mrb[18].mxu0 }
 0x4c0   : > { %2965 = vst [vmem:[#allocation2 + $0x80] sm:$0xff] %v2933_v56  ;;  %v2877_v60 = vadd.f32 %v2876_v40, %v2715_v57  ;;  %v2878_v49 = vpop.f32.mrb[19].mxu0  ;;  %v2727_v24 = vpop.f32.mrb[22].mxu1 }
 0x4c1   : > { %2966 = vst [vmem:[#allocation2 + $0x88] sm:$0xff] %v2934_v54  ;;  %v2879_v38 = vadd.f32 %v2878_v49, %v2717_v52  ;;  %v2729_v4 = vpop.f32.mrb[23].mxu1 }
 0x4c2   : > { %v2935_v51 = vadd.f32 %v2877_v60, %v2517_v50  ;;  %v2530_v50 = vld [vmem:[#allocation2 + $0xf8] sm:$0xff] }
 0x4c3   : > { %v2936_v61 = vadd.f32 %v2879_v38, %v2518_v34  ;;  %v2882_v22 = vpop.f32.mrb[20].mxu0  ;;  %v9144_v38 = vrot.slane (!%p4506_p4), %v9058_v18, %v9043_v36 }
 0x4c4   : > { %2967 = vst [vmem:[#allocation2 + $0x90] sm:$0xff] %v2935_v51  ;;  %v2883_v5 = vadd.f32 %v2882_v22, %v2721_v2  ;;  %v2884_v35 = vpop.f32.mrb[21].mxu0  ;;  %v2733_v37 = vpop.f32.mrb[24].mxu1  ;;  %v9148_v51 = vrot.slane (!%p4506_p4), %v9058_v18, %v9045_v27  ;;  %v4011_v22 = vld [vmem:[#allocation2 + $0x20] sm:$0xff] (!%p4506_p4) }
 0x4c5   : > { %2968 = vst [vmem:[#allocation2 + $0x98] sm:$0xff] %v2936_v61  ;;  %v2885_v47 = vadd.f32 %v2884_v35, %v2723_v29  ;;  %v2735_v33 = vpop.f32.mrb[25].mxu1  ;;  %v2529_v29 = vld [vmem:[#allocation2 + $0xf0] sm:$0xff]  ;;  %v4015_v27 = vld [vmem:[#allocation2 + $0x40] sm:$0xff] (!%p4506_p4)  ;;  %v4054_v18 = vadd.f32 (!%p4506_p4), %v9144_v38, %v4011_v22 }
 0x4c6   : > { %v2937_v0 = vadd.f32 %v2883_v5, %v2519_v21  ;;  %v4009_v61 = vld [vmem:[#allocation2 + $0x10] sm:$0xff] (!%p4506_p4)  ;;  %v4010_v21 = vld [vmem:[#allocation2 + $0x18] sm:$0xff] (!%p4506_p4)  ;;  %v4012_v5 = vld [vmem:[#allocation2 + $0x28] sm:$0xff] (!%p4506_p4) }
 0x4c7   : > { %v2938_v43 = vadd.f32 %v2885_v47, %v2520_v6  ;;  %v2888_v8 = vpop.f32.mrb[22].mxu0  ;;  %v4052_v36 = vadd.f32 (!%p4506_p4), %v9144_v38, %v4009_v61  ;;  %v4013_v47 = vld [vmem:[#allocation2 + $0x30] sm:$0xff] (!%p4506_p4)  ;;  %4086 = vst [vmem:[%s6724_s5 + $0x20] sm:$0xff] (!%p4506_p4), %v4054_v18 }
 0x4c8   : > { %2969 = vst [vmem:[#allocation2 + $0xa0] sm:$0xff] %v2937_v0  ;;  %v2889_v7 = vadd.f32 %v2888_v8, %v2727_v24  ;;  %v2890_v20 = vpop.f32.mrb[23].mxu0  ;;  %v2739_v11 = vpop.f32.mrb[26].mxu1  ;;  %v4007_v24 = vld [vmem:[#allocation2] sm:$0xff] (!%p4506_p4)  ;;  %v4055_v0 = vadd.f32 (!%p4506_p4), %v9148_v51, %v4012_v5  ;;  %v4016_v8 = vld [vmem:[#allocation2 + $0x48] sm:$0xff] (!%p4506_p4) }
 0x4c9   : > { %2970 = vst [vmem:[#allocation2 + $0xa8] sm:$0xff] %v2938_v43  ;;  %v2891_v55 = vadd.f32 %v2890_v20, %v2729_v4  ;;  %v2741_v46 = vpop.f32.mrb[27].mxu1  ;;  %v4008_v4 = vld [vmem:[#allocation2 + $0x8] sm:$0xff] (!%p4506_p4)  ;;  %v4050_v6 = vadd.f32 (!%p4506_p4), %v9144_v38, %v4007_v24  ;;  %v4056_v43 = vadd.f32 (!%p4506_p4), %v9144_v38, %v4013_v47  ;;  %4084 = vst [vmem:[%s6724_s5 + $0x10] sm:$0xff] (!%p4506_p4), %v4052_v36 }
 0x4ca   : > { %v2939_v42 = vadd.f32 %v2889_v7, %v2521_v9  ;;  %v4051_v35 = vadd.f32 (!%p4506_p4), %v9148_v51, %v4008_v4  ;;  %v4017_v7 = vld [vmem:[#allocation2 + $0x50] sm:$0xff] (!%p4506_p4)  ;;  %v4058_v20 = vadd.f32 (!%p4506_p4), %v9144_v38, %v4015_v27  ;;  %4087 = vst [vmem:[%s6724_s5 + $0x28] sm:$0xff] (!%p4506_p4), %v4055_v0 }
 0x4cb   : > { %v2940_v58 = vadd.f32 %v2891_v55, %v2522_v30  ;;  %v2894_v45 = vpop.f32.mrb[24].mxu0  ;;  %v4018_v30 = vld [vmem:[#allocation2 + $0x58] sm:$0xff] (!%p4506_p4)  ;;  %4082 = vst [vmem:[%s6724_s5] sm:$0xff] (!%p4506_p4), %v4050_v6  ;;  %v4060_v55 = vadd.f32 (!%p4506_p4), %v9144_v38, %v4017_v7  ;;  %4088 = vst [vmem:[%s6724_s5 + $0x30] sm:$0xff] (!%p4506_p4), %v4056_v43 }
 0x4cc   : > { %2971 = vst [vmem:[#allocation2 + $0xb0] sm:$0xff] %v2939_v42  ;;  %v2895_v19 = vadd.f32 %v2894_v45, %v2733_v37  ;;  %v2896_v17 = vpop.f32.mrb[25].mxu0  ;;  %v2745_v28 = vpop.f32.mrb[28].mxu1  ;;  %v4053_v37 = vadd.f32 (!%p4506_p4), %v9148_v51, %v4010_v21  ;;  %4083 = vst [vmem:[%s6724_s5 + $0x8] sm:$0xff] (!%p4506_p4), %v4051_v35  ;;  %v4019_v42 = vld [vmem:[#allocation2 + $0x60] sm:$0xff] (!%p4506_p4) }
 0x4cd   : > { %2972 = vst [vmem:[#allocation2 + $0xb8] sm:$0xff] %v2940_v58  ;;  %v2897_v53 = vadd.f32 %v2896_v17, %v2735_v33  ;;  %v2747_v62 = vpop.f32.mrb[29].mxu1  ;;  %v4014_v33 = vld [vmem:[#allocation2 + $0x38] sm:$0xff] (!%p4506_p4)  ;;  %v4020_v58 = vld [vmem:[#allocation2 + $0x68] sm:$0xff] (!%p4506_p4)  ;;  %v4062_v45 = vadd.f32 (!%p4506_p4), %v9144_v38, %v4019_v42  ;;  %4090 = vst [vmem:[%s6724_s5 + $0x40] sm:$0xff] (!%p4506_p4), %v4058_v20 }
 0x4ce   : > { %v2941_v31 = vadd.f32 %v2895_v19, %v2523_v13  ;;  %v4057_v9 = vadd.f32 (!%p4506_p4), %v9148_v51, %v4014_v33  ;;  %4085 = vst [vmem:[%s6724_s5 + $0x18] sm:$0xff] (!%p4506_p4), %v4053_v37  ;;  %v4021_v13 = vld [vmem:[#allocation2 + $0x70] sm:$0xff] (!%p4506_p4)  ;;  %v4063_v19 = vadd.f32 (!%p4506_p4), %v9148_v51, %v4020_v58  ;;  %v4022_v17 = vld [vmem:[#allocation2 + $0x78] sm:$0xff] (!%p4506_p4)  ;;  %4092 = vst [vmem:[%s6724_s5 + $0x50] sm:$0xff] (!%p4506_p4), %v4060_v55 }
 0x4cf   : > { %v2942_v16 = vadd.f32 %v2897_v53, %v2524_v63  ;;  %v2900_v59 = vpop.f32.mrb[26].mxu0  ;;  %v4064_v63 = vadd.f32 (!%p4506_p4), %v9144_v38, %v4021_v13  ;;  %v4024_v53 = vld [vmem:[#allocation2 + $0x88] sm:$0xff] (!%p4506_p4)  ;;  %4094 = vst [vmem:[%s6724_s5 + $0x60] sm:$0xff] (!%p4506_p4), %v4062_v45 }
 0x4d0   : > { %2973 = vst [vmem:[#allocation2 + $0xc0] sm:$0xff] %v2941_v31  ;;  %v2901_v3 = vadd.f32 %v2900_v59, %v2739_v11  ;;  %v2902_v14 = vpop.f32.mrb[27].mxu0  ;;  %v2751_v44 = vpop.f32.mrb[30].mxu1  ;;  %v4059_v11 = vadd.f32 (!%p4506_p4), %v9148_v51, %v4016_v8  ;;  %4089 = vst [vmem:[%s6724_s5 + $0x38] sm:$0xff] (!%p4506_p4), %v4057_v9  ;;  %v4026_v59 = vld [vmem:[#allocation2 + $0x98] sm:$0xff] (!%p4506_p4) }
 0x4d1   : > { %2974 = vst [vmem:[#allocation2 + $0xc8] sm:$0xff] %v2942_v16  ;;  %v2903_v57 = vadd.f32 %v2902_v14, %v2741_v46  ;;  %v2753_v23 = vpop.f32.mrb[31].mxu1  ;;  %v4061_v46 = vadd.f32 (!%p4506_p4), %v9148_v51, %v4018_v30  ;;  %v4067_v16 = vadd.f32 (!%p4506_p4), %v9148_v51, %v4024_v53  ;;  %4095 = vst [vmem:[%s6724_s5 + $0x68] sm:$0xff] (!%p4506_p4), %v4063_v19 }
 0x4d2   : > { %v2943_v52 = vadd.f32 %v2901_v3, %v2525_v26  ;;  %4091 = vst [vmem:[%s6724_s5 + $0x48] sm:$0xff] (!%p4506_p4), %v4059_v11  ;;  %v4025_v26 = vld [vmem:[#allocation2 + $0x90] sm:$0xff] (!%p4506_p4)  ;;  %v4027_v3 = vld [vmem:[#allocation2 + $0xa0] sm:$0xff] (!%p4506_p4)  ;;  %4096 = vst [vmem:[%s6724_s5 + $0x70] sm:$0xff] (!%p4506_p4), %v4064_v63  ;;  %v4069_v14 = vadd.f32 (!%p4506_p4), %v9148_v51, %v4026_v59 }
 0x4d3   : > { %v2944_v41 = vadd.f32 %v2903_v57, %v2526_v25  ;;  %v2906_v10 = vpop.f32.mrb[28].mxu0  ;;  %4093 = vst [vmem:[%s6724_s5 + $0x58] sm:$0xff] (!%p4506_p4), %v4061_v46  ;;  %v4068_v25 = vadd.f32 (!%p4506_p4), %v9144_v38, %v4025_v26  ;;  %v4028_v57 = vld [vmem:[#allocation2 + $0xa8] sm:$0xff] (!%p4506_p4)  ;;  %4099 = vst [vmem:[%s6724_s5 + $0x88] sm:$0xff] (!%p4506_p4), %v4067_v16 }
 0x4d4   : > { %2975 = vst [vmem:[#allocation2 + $0xd0] sm:$0xff] %v2943_v52  ;;  %v2907_v12 = vadd.f32 %v2906_v10, %v2745_v28  ;;  %v2908_v39 = vpop.f32.mrb[29].mxu0  ;;  %v4023_v28 = vld [vmem:[#allocation2 + $0x80] sm:$0xff] (!%p4506_p4)  ;;  %v4030_v52 = vld [vmem:[#allocation2 + $0xb8] sm:$0xff] (!%p4506_p4)  ;;  %4101 = vst [vmem:[%s6724_s5 + $0x98] sm:$0xff] (!%p4506_p4), %v4069_v14 }
 0x4d5   : > { %2976 = vst [vmem:[#allocation2 + $0xd8] sm:$0xff] %v2944_v41  ;;  %v2909_v15 = vadd.f32 %v2908_v39, %v2747_v62  ;;  %v4065_v62 = vadd.f32 (!%p4506_p4), %v9148_v51, %v4022_v17  ;;  %v4066_v31 = vadd.f32 (!%p4506_p4), %v9144_v38, %v4023_v28  ;;  %v4071_v41 = vadd.f32 (!%p4506_p4), %v9148_v51, %v4028_v57 }
 0x4d6   : > { %v2945_v2 = vadd.f32 %v2907_v12, %v2527_v32  ;;  %v4073_v10 = vadd.f32 (!%p4506_p4), %v9148_v51, %v4030_v52  ;;  %4100 = vst [vmem:[%s6724_s5 + $0x90] sm:$0xff] (!%p4506_p4), %v4068_v25 }
 0x4d7   : > { %v2946_v1 = vadd.f32 %v2909_v15, %v2528_v48  ;;  %v2912_v56 = vpop.f32.mrb[30].mxu0  ;;  %4006 = sbr.rel (%p4506_p4) target bundleno = 1256 (0x4e8), region = 84  ;;  %4097 = vst [vmem:[%s6724_s5 + $0x78] sm:$0xff] (!%p4506_p4), %v4065_v62  ;;  %4098 = vst [vmem:[%s6724_s5 + $0x80] sm:$0xff] (!%p4506_p4), %v4066_v31  ;;  %v4031_v12 = vld [vmem:[#allocation2 + $0xc0] sm:$0xff] (!%p4506_p4) }
 0x4d8   : > { %2977 = vst [vmem:[#allocation2 + $0xe0] sm:$0xff] %v2945_v2  ;;  %v2913_v54 = vadd.f32 %v2912_v56, %v2751_v44  ;;  %v2914_v40 = vpop.f32.mrb[31].mxu0  ;;  %v4070_v44 = vadd.f32 (!%p4506_p4), %v9144_v38, %v4027_v3  ;;  %v4032_v48 = vld [vmem:[#allocation2 + $0xc8] sm:$0xff] (!%p4506_p4)  ;;  %v4074_v15 = vadd.f32 (!%p4506_p4), %v9144_v38, %v4031_v12  ;;  %4103 = vst [vmem:[%s6724_s5 + $0xa8] sm:$0xff] (!%p4506_p4), %v4071_v41 }
 0x4d9   : > { %2978 = vst [vmem:[#allocation2 + $0xe8] sm:$0xff] %v2946_v1  ;;  %v2915_v60 = vadd.f32 %v2914_v40, %v2753_v23  ;;  %v4029_v23 = vld [vmem:[#allocation2 + $0xb0] sm:$0xff] (!%p4506_p4)  ;;  %v4075_v2 = vadd.f32 (!%p4506_p4), %v9148_v51, %v4032_v48  ;;  %4105 = vst [vmem:[%s6724_s5 + $0xb8] sm:$0xff] (!%p4506_p4), %v4073_v10 }
 0x4da   : > { %v2947_v34 = vadd.f32 %v2913_v54, %v2529_v29  ;;  %v4072_v32 = vadd.f32 (!%p4506_p4), %v9144_v38, %v4029_v23  ;;  %4102 = vst [vmem:[%s6724_s5 + $0xa0] sm:$0xff] (!%p4506_p4), %v4070_v44  ;;  %4106 = vst [vmem:[%s6724_s5 + $0xc0] sm:$0xff] (!%p4506_p4), %v4074_v15 }
 0x4db   : > { %v2948_v49 = vadd.f32 %v2915_v60, %v2530_v50  ;;  %v4033_v39 = vld [vmem:[#allocation2 + $0xd0] sm:$0xff] (!%p4506_p4)  ;;  %4107 = vst [vmem:[%s6724_s5 + $0xc8] sm:$0xff] (!%p4506_p4), %v4075_v2 }
 0x4dc   : > { %2979 = vst [vmem:[#allocation2 + $0xf0] sm:$0xff] %v2947_v34  ;;  %v4076_v1 = vadd.f32 (!%p4506_p4), %v9144_v38, %v4033_v39  ;;  %v4034_v29 = vld [vmem:[#allocation2 + $0xd8] sm:$0xff] (!%p4506_p4)  ;;  %4104 = vst [vmem:[%s6724_s5 + $0xb0] sm:$0xff] (!%p4506_p4), %v4072_v32 }
 0x4dd   : > { %2980 = vst [vmem:[#allocation2 + $0xf8] sm:$0xff] %v2948_v49  ;;  %v4077_v50 = vadd.f32 (!%p4506_p4), %v9148_v51, %v4034_v29 }
 0x4de   : > { %4108 = vst [vmem:[%s6724_s5 + $0xd0] sm:$0xff] %v4076_v1 }
 0x4df   : > { %v4035_v56 = vld [vmem:[#allocation2 + $0xe0] sm:$0xff]  ;;  %4109 = vst [vmem:[%s6724_s5 + $0xd8] sm:$0xff] %v4077_v50 }
 0x4e0   : > { %v4036_v54 = vld [vmem:[#allocation2 + $0xe8] sm:$0xff]  ;;  %v4078_v40 = vadd.f32 %v9144_v38, %v4035_v56 }
 0x4e1   : > { %v4079_v60 = vadd.f32 %v9148_v51, %v4036_v54 }
 0x4e2   : > { %4110 = vst [vmem:[%s6724_s5 + $0xe0] sm:$0xff] %v4078_v40 }
 0x4e3   : > { %v4037_v34 = vld [vmem:[#allocation2 + $0xf0] sm:$0xff]  ;;  %4111 = vst [vmem:[%s6724_s5 + $0xe8] sm:$0xff] %v4079_v60 }
 0x4e4   : > { %v4038_v49 = vld [vmem:[#allocation2 + $0xf8] sm:$0xff]  ;;  %v4080_v24 = vadd.f32 %v9144_v38, %v4037_v34 }
 0x4e5   : > { %v4081_v4 = vadd.f32 %v9148_v51, %v4038_v49 }
 0x4e6   : > { %4112 = vst [vmem:[%s6724_s5 + $0xf0] sm:$0xff] %v4080_v24 }
 0x4e7   : > { %4113 = vst [vmem:[%s6724_s5 + $0xf8] sm:$0xff] %v4081_v4 }
 0x4e8 PF: > { %s9521_s4 = sld [smem:[#allocation32_spill]]  ;;  %s9522_s7 = sld [smem:[#allocation33_spill]] }
 0x4e9   : > { %s9524_s17 = sld [smem:[#allocation48_spill]]  ;;  %s4147_s3 = sshll.u32 %s6724_s5, 4  ;;  %s9217_s3 = int_to_ptr.vmem [resolvable:$true] %s4147_s3 }
 0x4ea   : > { %s9525_s16 = sld [smem:[#allocation61_spill]]  ;;  %s9226_s15 = scalar_lea.sflag [#allocation5], %s619_s10 }
 0x4eb   : > { %s5881_s12 = scalar_lea.vmem %s9217_s3, 4096  ;;  %s6096_s5 = smov [#allocation15]  }
 0x4ec   : > { %p5882_p3 = scmp.ne.s32.totalorder %s9217_s3, %s5881_s12  ;;  %s5885_s22 = sshll.u32 %s6096_s5, 4  ;;  %s5886_s22 = int_to_ptr.vmem [resolvable:$false] %s5885_s22 }
 0x4ed   : > { %s5887_s20 = scalar_lea.vmem %s5886_s22, 8192  ;;  %p5888_p5 = scmp.lt.s32.totalorder %s9217_s3, %s5886_s22 }
 0x4ee   : > { %s4509_s14 = sshll.u32 %s9521_s4, 1  ;;  %s4521_s29 = sshll.u32 %s9522_s7, 6 }
 0x4ef   : > { %s4144_s21 = sadd.s32 %s4521_s29, %s4509_s14  ;;  %p9527_p9 = scmp.ne.s32.totalorder %s9524_s17, 0 }
 0x4f0   : > { %s4511_s2 = sshll.u32 %s4144_s21, 7  ;;  %s9526_s28 = smov %s9525_s16 }
 0x4f1   : > { %s9222_s25 = scalar_lea.hbm %s9525_s16, %s4511_s2  ;;  %p5883_p1 = pnand %p5882_p3, %p9527_p9 }
 0x4f2   : > { %p5889_p6 = scmp.lt.s32.totalorder %s5887_s20, %s5881_s12 }
 0x4f3   : > { %p5884_p2 = pneg %p5883_p1 }
 0x4f4   : > { %p5890_p13 = por %p5889_p6, %p5888_p5 }
 0x4f6   : > { %p5891_p11 = pnand %p5890_p13, %p5884_p2 }
 0x4f8   : > { %5894 = shalt.err (!%p5891_p11)
}
 0x4f9   : > { %s5895_s10 = scalar_lea.hbm %s9222_s25, 4096  ;;  %s5899_s0 = scalar_lea.hbm %s9526_s28, 16384 }
 0x4fa   : > { %p5896_p10 = scmp.ne.s32.totalorder %s9222_s25, %s5895_s10  ;;  %p5900_p8 = scmp.lt.u32.totalorder %s9222_s25, %s9526_s28 }
 0x4fb   : > { %p5901_p12 = scmp.lt.u32.totalorder %s5899_s0, %s5895_s10  ;;  %p5903_p3 = scmp.lt.u32.totalorder %s5895_s10, %s9222_s25 }
 0x4fc   : > { %p5897_p0 = pnand %p5896_p10, %p9527_p9 }
 0x4fd   : > { %p5902_p4 = por %p5901_p12, %p5900_p8 }
 0x4fe   : > { %p5898_p7 = pneg %p5897_p0 }
 0x4ff   : > { %p5904_p1 = por %p5903_p3, %p5902_p4 }
 0x501   : > { %p5905_p2 = pnand %p5904_p1, %p5898_p7 }
 0x503   : > { %5908 = shalt.err (!%p5905_p2)
}
 0x504   : > { %s6097_s30 = smov 256   ;;  %s6098_s14 = smov 512  }
 0x505   : > { %s6099_s29 = smov 16  }
 0x506   : > { %4708 = dma.vmem_to_hbm [thread:$0]  (%p9527_p9), %s9217_s3, 4096, %s9222_s25, %s9226_s15, %s6097_s30, %s6098_s14, %s6099_s29  }
 0x507 PF: > { %s9528_s21 = sld [smem:[#allocation22_spill]]  ;;  %s9529_s2 = sld [smem:[#allocation49_spill]] }
 0x508   : > { %p4737_p5 = scmp.ge.s32.totalorder %s6083_s27, 2 }
 0x50d   : > { %s4168_s1 = sand.u32 1, %s9528_s21   ;;  %p9530_p6 = scmp.ne.s32.totalorder %s9529_s2, 0 }
 0x50e   : > { %s4169_s19 = scalar_lea.sflag [#allocation5], %s4168_s1 }
 0x50f   : > { %p4733_p13 = pnand %p4737_p5, %p9530_p6 }
 0x511   : > { %6006 = dma.done.wait (!%p4733_p13), %s4169_s19, 4096  }
 0x512   : > { %6008 = vsyncadd (!%p4733_p13), %s4169_s19, 4294963200  ;;  %s35_s27 = sadd.s32 1, %s6083_s27   ;;  %s9532_s30 = sld [smem:[#allocation23_spill]] }
 0x513   : > { %p9255_p11 = scmp.ge.s32.totalorder %s35_s27, 10   ;;  %s9533_s12 = sld [smem:[#allocation24_spill]] }
 0x514   : > { %s9534_s17 = sld [smem:[#allocation25_spill]]  ;;  %s9535_s14 = sld [smem:[#allocation46_spill]] }
 0x515   : > { %s9536_s15 = sld [smem:[#allocation26_spill]]  ;;  %s9537_s3 = sld [smem:[#allocation27_spill]] }
 0x516   : > { %s9538_s25 = sld [smem:[#allocation41_spill]]  ;;  %s9539_s18 = sld [smem:[#allocation29_spill]] }
 0x517   : > { %s9540_s19 = sld [smem:[#allocation30_spill]]  ;;  %s9541_s22 = sld [smem:[#allocation34_spill]] }
 0x518   : > { %s9542_s23 = sld [smem:[#allocation35_spill]]  ;;  %s9543_s5 = sld [smem:[#allocation36_spill]] }
 0x519   : > { %s9544_s0 = sld [smem:[#allocation39_spill]]  ;;  %s9545_s10 = smov %s6019_s11 }
 0x51a   : > { %s9546_s4 = smov %s9564_s13  ;;  %s9547_s11 = smov %s6529_s9 }
 0x51b   : > { %s9549_s13 = smov %s9534_s17  ;;  %s9550_s16 = smov %s9537_s3 }
 0x51c   : > { %s9551_s17 = smov %s9538_s25  ;;  %s9552_s20 = smov %s9566_s26 }
 0x51d   : > { %s9553_s21 = smov %s6071_s24  ;;  %s9556_s26 = smov %s9546_s4 }
 0x51e   : > { %s9554_s24 = smov %s9543_s5  ;;  %34 = sbr.rel (!%p9255_p11) target bundleno = 30 (0x1e), region = 197 }
 0x51f   : > { %s9555_s25 = smov %s9544_s0 }
 0x525   :  { %4196 = vsyncpa [#allocation4], 1 }
 0x526   :  { %4198 = vsyncpa [#allocation4 + $0x1], 1 }
 0x527   :  { %4199 = vsyncpa [#allocation7], 1 }
 0x528   :  { %4201 = vsyncpa [#allocation7 + $0x1], 1 }
 0x529   :  { %4202 = vsyncpa [#allocation10], 1 }
 0x52a   :  { %4204 = vsyncpa [#allocation10 + $0x1], 1 }
 0x52b   :  { %4205 = vsyncpa [#allocation13], 1 }
 0x52c   :  { %4207 = vsyncpa [#allocation13 + $0x1], 1 }
 0x52d   :  { %4208 = vsyncpa [#allocation5], 1 }
 0x52e   :  { %4210 = vsyncpa [#allocation5 + $0x1], 1 }

</bundles_post_ra>
